<compile_context>
chip_gen: v7x
topology: tpu7x:2x2x1
jax: 0.10.0
libtpu: 0.0.40
codegen_flags: <defaults>
</compile_context>

<pallas_src>
import math
import functools

import jax
import jax.numpy as jnp
from jax.experimental import pallas as pl
from jax.experimental.pallas import tpu as pltpu


# ----------------------------------------------------------------------------
# In-kernel helpers (traced inside the Pallas body)
# ----------------------------------------------------------------------------

def _layer_norm(y, g, b, eps):
    """Torch-style LayerNorm: unbiased std, eps added to std."""
    D = y.shape[-1]
    mean = jnp.mean(y, axis=-1, keepdims=True)
    var = jnp.sum((y - mean) ** 2, axis=-1, keepdims=True) / (D - 1)
    inv = pl.reciprocal(jnp.sqrt(var) + eps, approx=False)
    return g * (y - mean) * inv + b


def _mha(q, k, v, mask, wo, bo, num_heads):
    """q pre-scaled (Sq,D); k,v (Sk,D); mask (Sq,Sk) 1=keep 0=masked.
    Returns OutProj(concat_heads(softmax(qk^T)v)) as a lane-dense (Sq,D) f32."""
    Sq, D = q.shape
    dk = D // num_heads
    neg = jnp.float32(-1e9)
    out = jnp.zeros((Sq, D), jnp.float32) + bo            # fold bias into acc
    for h in range(num_heads):                            # static unroll
        s0, s1 = h * dk, (h + 1) * dk
        # scores = q_h @ k_h^T (contract last dims, no explicit transpose)
        scores = jax.lax.dot_general(q[:, s0:s1], k[:, s0:s1],
                                     (((1,), (1,)), ((), ())),
                                     preferred_element_type=jnp.float32)
        scores = jnp.where(mask == 0, neg, scores)
        scores = scores - jnp.max(scores, axis=-1, keepdims=True)
        e = jnp.exp(scores)
        attn = e * pl.reciprocal(jnp.sum(e, axis=-1, keepdims=True), approx=True)
        ctx = jnp.dot(attn, v[:, s0:s1], preferred_element_type=jnp.float32)
        out = out + jnp.dot(ctx, wo[s0:s1, :], preferred_element_type=jnp.float32)
    return out


# ----------------------------------------------------------------------------
# Fused decoder-layer kernel (one grid step per batch element)
# ----------------------------------------------------------------------------

def _decoder_layer_kernel(x_ref, enc_ref, tgtm_ref, srcm_ref,
                          wqkv_s_ref, bqkv_s_ref, wo_s_ref, bo_s_ref,
                          g1_ref, b1_ref,
                          wq_c_ref, bq_c_ref, wkv_c_ref, bkv_c_ref,
                          wo_c_ref, bo_c_ref, g2_ref, b2_ref,
                          w1_ref, b1f_ref, w2_ref, b2f_ref, g3_ref, b3_ref,
                          o_ref, *, num_heads, scale, eps):
    x = x_ref[0].astype(jnp.float32)          # (S, D)
    enc = enc_ref[0].astype(jnp.float32)      # (Ssrc, D)
    tgt_mask = tgtm_ref[0]                    # (S, S)
    src_mask = srcm_ref[0]                    # (S, Ssrc)
    D = x.shape[-1]
    sc = jnp.float32(scale)

    # ---- self-attention block (fused Q|K|V projection, one MXU pass) ----
    qkv = jnp.dot(x, wqkv_s_ref[...], preferred_element_type=jnp.float32)
    qkv = qkv + bqkv_s_ref[...]
    q = qkv[:, :D] * sc
    k = qkv[:, D:2 * D]
    v = qkv[:, 2 * D:]
    attn_out = _mha(q, k, v, tgt_mask, wo_s_ref[...], bo_s_ref[...], num_heads)
    x = _layer_norm(x + attn_out, g1_ref[...], b1_ref[...], eps)

    # ---- cross-attention block (fused K|V projection on encoder output) ----
    q = jnp.dot(x, wq_c_ref[...], preferred_element_type=jnp.float32)
    q = (q + bq_c_ref[...]) * sc
    kv = jnp.dot(enc, wkv_c_ref[...], preferred_element_type=jnp.float32)
    kv = kv + bkv_c_ref[...]
    k = kv[:, :D]
    v = kv[:, D:]
    attn_out = _mha(q, k, v, src_mask, wo_c_ref[...], bo_c_ref[...], num_heads)
    x = _layer_norm(x + attn_out, g2_ref[...], b2_ref[...], eps)

    # ---- feed-forward block ----
    h = jnp.dot(x, w1_ref[...], preferred_element_type=jnp.float32) + b1f_ref[...]
    h = jnp.maximum(h, 0.0)
    y = jnp.dot(h, w2_ref[...], preferred_element_type=jnp.float32) + b2f_ref[...]
    x = _layer_norm(x + y, g3_ref[...], b3_ref[...], eps)

    o_ref[0] = x.astype(o_ref.dtype)


def decoder_layer(p, x, enc_out, src_mask3, tgt_mask3, num_heads, eps=1e-6):
    """x: (B,S,D), enc_out: (B,Ssrc,D), masks (B,S,Sk) -> (B,S,D)."""
    B, S, D = x.shape
    Ssrc = enc_out.shape[1]
    F = p["ffn_w1"].shape[1]
    scale = 1.0 / math.sqrt(D // num_heads)

    kern = functools.partial(_decoder_layer_kernel, num_heads=num_heads,
                             scale=scale, eps=eps)
    rep = lambda b: (0, 0)   # replicated (weight) blocks

    return pl.pallas_call(
        kern,
        out_shape=jax.ShapeDtypeStruct((B, S, D), x.dtype),
        grid=(B,),
        in_specs=[
            pl.BlockSpec((1, S, D), lambda b: (b, 0, 0)),        # x
            pl.BlockSpec((1, Ssrc, D), lambda b: (b, 0, 0)),     # enc_out
            pl.BlockSpec((1, S, S), lambda b: (b, 0, 0)),        # tgt mask
            pl.BlockSpec((1, S, Ssrc), lambda b: (b, 0, 0)),     # src mask
            pl.BlockSpec((D, 3 * D), rep),                       # self wqkv
            pl.BlockSpec((1, 3 * D), rep),                       # self bqkv
            pl.BlockSpec((D, D), rep),                           # self wo
            pl.BlockSpec((1, D), rep),                           # self bo
            pl.BlockSpec((1, D), rep),                           # norm1 gamma
            pl.BlockSpec((1, D), rep),                           # norm1 beta
            pl.BlockSpec((D, D), rep),                           # cross wq
            pl.BlockSpec((1, D), rep),                           # cross bq
            pl.BlockSpec((D, 2 * D), rep),                       # cross wkv
            pl.BlockSpec((1, 2 * D), rep),                       # cross bkv
            pl.BlockSpec((D, D), rep),                           # cross wo
            pl.BlockSpec((1, D), rep),                           # cross bo
            pl.BlockSpec((1, D), rep),                           # norm2 gamma
            pl.BlockSpec((1, D), rep),                           # norm2 beta
            pl.BlockSpec((D, F), rep),                           # ffn w1
            pl.BlockSpec((1, F), rep),                           # ffn b1
            pl.BlockSpec((F, D), rep),                           # ffn w2
            pl.BlockSpec((1, D), rep),                           # ffn b2
            pl.BlockSpec((1, D), rep),                           # norm3 gamma
            pl.BlockSpec((1, D), rep),                           # norm3 beta
        ],
        out_specs=pl.BlockSpec((1, S, D), lambda b: (b, 0, 0)),
        compiler_params=pltpu.CompilerParams(
            dimension_semantics=("parallel",)),
    )(x, enc_out, tgt_mask3, src_mask3,
      p["self_wqkv"], p["self_bqkv"].reshape(1, 3 * D),
      p["self_wo"], p["self_bo"].reshape(1, D),
      p["norm1_g"].reshape(1, D), p["norm1_b"].reshape(1, D),
      p["cross_wq"], p["cross_bq"].reshape(1, D),
      p["cross_wkv"], p["cross_bkv"].reshape(1, 2 * D),
      p["cross_wo"], p["cross_bo"].reshape(1, D),
      p["norm2_g"].reshape(1, D), p["norm2_b"].reshape(1, D),
      p["ffn_w1"], p["ffn_b1"].reshape(1, F),
      p["ffn_w2"], p["ffn_b2"].reshape(1, D),
      p["norm3_g"].reshape(1, D), p["norm3_b"].reshape(1, D))


# ----------------------------------------------------------------------------
# Model glue (plain JAX around the fused Pallas layer)
# ----------------------------------------------------------------------------

def positional_encoding_table(max_len, d_model):
    position = jnp.arange(max_len, dtype=jnp.float32)[:, None]
    div_term = jnp.exp(jnp.arange(0, d_model, 2, dtype=jnp.float32)
                       * (-math.log(10000.0) / d_model))
    pe = jnp.zeros((max_len, d_model), jnp.float32)
    pe = pe.at[:, 0::2].set(jnp.sin(position * div_term))
    pe = pe.at[:, 1::2].set(jnp.cos(position * div_term))
    return pe


def decoder_forward(params, token_ids, enc_out, src_mask, tgt_mask, num_heads):
    # Embedding lookup + positional encoding (glue; dropout = identity).
    x = jnp.take(params["embed"], token_ids, axis=0)          # (B, S, D)
    B, S, _ = x.shape
    x = x + params["pe"][None, :S, :]
    Ssrc = enc_out.shape[1]
    # Masks arrive (B, 1, Sq, Sk) like torch; squeeze the head-broadcast dim.
    tgt_mask3 = tgt_mask.reshape(B, S, S)
    src_mask3 = src_mask.reshape(B, S, Ssrc)
    for layer_params in params["layers"]:
        x = decoder_layer(layer_params, x, enc_out, src_mask3, tgt_mask3,
                          num_heads)
    return x


# ----------------------------------------------------------------------------
# Deterministic parameter initialization
# ----------------------------------------------------------------------------

def _init_linear(key, din, dout):
    w = jax.random.normal(key, (din, dout), jnp.float32) * 0.02
    b = jnp.zeros((dout,), jnp.float32)
    return w, b


def init_params(key, vocab, d_model, num_layers, d_ff, max_len):
    keys = jax.random.split(key, 1 + num_layers)
    params = {
        "embed": jax.random.normal(keys[0], (vocab, d_model), jnp.float32) * 0.02,
        "pe": positional_encoding_table(max_len, d_model),
        "layers": [],
    }
    for l in range(num_layers):
        lk = jax.random.split(keys[1 + l], 10)

        # self-attention: fuse Q|K|V into a single (D, 3D) matmul
        wq_s, bq_s = _init_linear(lk[0], d_model, d_model)
        wk_s, bk_s = _init_linear(lk[1], d_model, d_model)
        wv_s, bv_s = _init_linear(lk[2], d_model, d_model)
        wo_s, bo_s = _init_linear(lk[3], d_model, d_model)

        # cross-attention: Q separate, fuse K|V into a single (D, 2D) matmul
        wq_c, bq_c = _init_linear(lk[4], d_model, d_model)
        wk_c, bk_c = _init_linear(lk[5], d_model, d_model)
        wv_c, bv_c = _init_linear(lk[6], d_model, d_model)
        wo_c, bo_c = _init_linear(lk[7], d_model, d_model)

        w1, b1 = _init_linear(lk[8], d_model, d_ff)
        w2, b2 = _init_linear(lk[9], d_ff, d_model)

        params["layers"].append(dict(
            self_wqkv=jnp.concatenate([wq_s, wk_s, wv_s], axis=1),
            self_bqkv=jnp.concatenate([bq_s, bk_s, bv_s], axis=0),
            self_wo=wo_s, self_bo=bo_s,
            cross_wq=wq_c, cross_bq=bq_c,
            cross_wkv=jnp.concatenate([wk_c, wv_c], axis=1),
            cross_bkv=jnp.concatenate([bk_c, bv_c], axis=0),
            cross_wo=wo_c, cross_bo=bo_c,
            ffn_w1=w1, ffn_b1=b1, ffn_w2=w2, ffn_b2=b2,
            norm1_g=jnp.ones((d_model,), jnp.float32),
            norm1_b=jnp.zeros((d_model,), jnp.float32),
            norm2_g=jnp.ones((d_model,), jnp.float32),
            norm2_b=jnp.zeros((d_model,), jnp.float32),
            norm3_g=jnp.ones((d_model,), jnp.float32),
            norm3_b=jnp.zeros((d_model,), jnp.float32),
        ))
    return params


# ----------------------------------------------------------------------------
# Main
# ----------------------------------------------------------------------------

if __name__ == "__main__":
    # Small synthetic config.
    VOCAB = 50
    D_MODEL = 32
    NUM_LAYERS = 2
    NUM_HEADS = 4
    D_FF = 64
    MAX_LEN = 64
    B = 2
    S_TGT = 8
    S_SRC = 8

    key = jax.random.PRNGKey(0)
    k_params, k_tok, k_enc = jax.random.split(key, 3)

    params = init_params(k_params, VOCAB, D_MODEL, NUM_LAYERS, D_FF, MAX_LEN)

    token_ids = jax.random.randint(k_tok, (B, S_TGT), 0, VOCAB, jnp.int32)
    enc_out = jax.random.normal(k_enc, (B, S_SRC, D_MODEL), jnp.float32)

    # tgt_mask: causal; src_mask: all ones (equivalent to mask=None in torch).
    tgt_mask = jnp.tril(jnp.ones((S_TGT, S_TGT), jnp.float32))[None, None]
    tgt_mask = jnp.broadcast_to(tgt_mask, (B, 1, S_TGT, S_TGT))
    src_mask = jnp.ones((B, 1, S_TGT, S_SRC), jnp.float32)

    fwd = jax.jit(functools.partial(decoder_forward, num_heads=NUM_HEADS))
    out = fwd(params, token_ids, enc_out, src_mask, tgt_mask)
    out = jax.block_until_ready(out)

    assert out.shape == (B, S_TGT, D_MODEL)
    assert bool(jnp.all(jnp.isfinite(out)))
    print("KERNEL_OK")
</pallas_src>

<mosaic_0001>
module attributes {stable_mosaic.version = 11 : i64} {
  func.func @_decoder_layer_kernel(%arg0: i32, %arg1: memref<1x8x32xf32, #tpu.memory_space<vmem>>, %arg2: memref<1x8x32xf32, #tpu.memory_space<vmem>>, %arg3: memref<1x8x8xf32, #tpu.memory_space<vmem>>, %arg4: memref<1x8x8xf32, #tpu.memory_space<vmem>>, %arg5: memref<32x96xf32, #tpu.memory_space<vmem>>, %arg6: memref<1x96xf32, #tpu.memory_space<vmem>>, %arg7: memref<32x32xf32, #tpu.memory_space<vmem>>, %arg8: memref<1x32xf32, #tpu.memory_space<vmem>>, %arg9: memref<1x32xf32, #tpu.memory_space<vmem>>, %arg10: memref<1x32xf32, #tpu.memory_space<vmem>>, %arg11: memref<32x32xf32, #tpu.memory_space<vmem>>, %arg12: memref<1x32xf32, #tpu.memory_space<vmem>>, %arg13: memref<32x64xf32, #tpu.memory_space<vmem>>, %arg14: memref<1x64xf32, #tpu.memory_space<vmem>>, %arg15: memref<32x32xf32, #tpu.memory_space<vmem>>, %arg16: memref<1x32xf32, #tpu.memory_space<vmem>>, %arg17: memref<1x32xf32, #tpu.memory_space<vmem>>, %arg18: memref<1x32xf32, #tpu.memory_space<vmem>>, %arg19: memref<32x64xf32, #tpu.memory_space<vmem>>, %arg20: memref<1x64xf32, #tpu.memory_space<vmem>>, %arg21: memref<64x32xf32, #tpu.memory_space<vmem>>, %arg22: memref<1x32xf32, #tpu.memory_space<vmem>>, %arg23: memref<1x32xf32, #tpu.memory_space<vmem>>, %arg24: memref<1x32xf32, #tpu.memory_space<vmem>>, %arg25: memref<1x8x32xf32, #tpu.memory_space<vmem>>) attributes {dimension_semantics = [#tpu.dimension_semantics<parallel>], iteration_bounds = array<i64: 2>, scalar_prefetch = 0 : i64, scratch_operands = 0 : i64, tpu.core_type = #tpu.core_type<tc>, window_params = [{transform_indices = @transform_0, window_bounds = array<i64: 1, 8, 32>}, {transform_indices = @transform_1, window_bounds = array<i64: 1, 8, 32>}, {transform_indices = @transform_2, window_bounds = array<i64: 1, 8, 8>}, {transform_indices = @transform_3, window_bounds = array<i64: 1, 8, 8>}, {pipeline_mode = #tpu.pipeline_mode<synchronous>, transform_indices = @transform_4, window_bounds = array<i64: 32, 96>}, {pipeline_mode = #tpu.pipeline_mode<synchronous>, transform_indices = @transform_5, window_bounds = array<i64: 1, 96>}, {pipeline_mode = #tpu.pipeline_mode<synchronous>, transform_indices = @transform_6, window_bounds = array<i64: 32, 32>}, {pipeline_mode = #tpu.pipeline_mode<synchronous>, transform_indices = @transform_7, window_bounds = array<i64: 1, 32>}, {pipeline_mode = #tpu.pipeline_mode<synchronous>, transform_indices = @transform_8, window_bounds = array<i64: 1, 32>}, {pipeline_mode = #tpu.pipeline_mode<synchronous>, transform_indices = @transform_9, window_bounds = array<i64: 1, 32>}, {pipeline_mode = #tpu.pipeline_mode<synchronous>, transform_indices = @transform_10, window_bounds = array<i64: 32, 32>}, {pipeline_mode = #tpu.pipeline_mode<synchronous>, transform_indices = @transform_11, window_bounds = array<i64: 1, 32>}, {pipeline_mode = #tpu.pipeline_mode<synchronous>, transform_indices = @transform_12, window_bounds = array<i64: 32, 64>}, {pipeline_mode = #tpu.pipeline_mode<synchronous>, transform_indices = @transform_13, window_bounds = array<i64: 1, 64>}, {pipeline_mode = #tpu.pipeline_mode<synchronous>, transform_indices = @transform_14, window_bounds = array<i64: 32, 32>}, {pipeline_mode = #tpu.pipeline_mode<synchronous>, transform_indices = @transform_15, window_bounds = array<i64: 1, 32>}, {pipeline_mode = #tpu.pipeline_mode<synchronous>, transform_indices = @transform_16, window_bounds = array<i64: 1, 32>}, {pipeline_mode = #tpu.pipeline_mode<synchronous>, transform_indices = @transform_17, window_bounds = array<i64: 1, 32>}, {pipeline_mode = #tpu.pipeline_mode<synchronous>, transform_indices = @transform_18, window_bounds = array<i64: 32, 64>}, {pipeline_mode = #tpu.pipeline_mode<synchronous>, transform_indices = @transform_19, window_bounds = array<i64: 1, 64>}, {pipeline_mode = #tpu.pipeline_mode<synchronous>, transform_indices = @transform_20, window_bounds = array<i64: 64, 32>}, {pipeline_mode = #tpu.pipeline_mode<synchronous>, transform_indices = @transform_21, window_bounds = array<i64: 1, 32>}, {pipeline_mode = #tpu.pipeline_mode<synchronous>, transform_indices = @transform_22, window_bounds = array<i64: 1, 32>}, {pipeline_mode = #tpu.pipeline_mode<synchronous>, transform_indices = @transform_23, window_bounds = array<i64: 1, 32>}, {transform_indices = @transform_24, window_bounds = array<i64: 1, 8, 32>}]} {
    %c0 = arith.constant 0 : index
    %c0_0 = arith.constant 0 : index
    %c0_1 = arith.constant 0 : index
    %0 = vector.load %arg1[%c0, %c0_0, %c0_1] : memref<1x8x32xf32, #tpu.memory_space<vmem>>, vector<1x8x32xf32>
    %1 = vector.shape_cast %0 : vector<1x8x32xf32> to vector<8x32xf32>
    %c0_2 = arith.constant 0 : index
    %c0_3 = arith.constant 0 : index
    %c0_4 = arith.constant 0 : index
    %2 = vector.load %arg2[%c0_2, %c0_3, %c0_4] : memref<1x8x32xf32, #tpu.memory_space<vmem>>, vector<1x8x32xf32>
    %3 = vector.shape_cast %2 : vector<1x8x32xf32> to vector<8x32xf32>
    %c0_5 = arith.constant 0 : index
    %c0_6 = arith.constant 0 : index
    %c0_7 = arith.constant 0 : index
    %4 = vector.load %arg3[%c0_5, %c0_6, %c0_7] : memref<1x8x8xf32, #tpu.memory_space<vmem>>, vector<1x8x8xf32>
    %5 = vector.shape_cast %4 : vector<1x8x8xf32> to vector<8x8xf32>
    %c0_8 = arith.constant 0 : index
    %c0_9 = arith.constant 0 : index
    %c0_10 = arith.constant 0 : index
    %6 = vector.load %arg4[%c0_8, %c0_9, %c0_10] : memref<1x8x8xf32, #tpu.memory_space<vmem>>, vector<1x8x8xf32>
    %7 = vector.shape_cast %6 : vector<1x8x8xf32> to vector<8x8xf32>
    %c0_11 = arith.constant 0 : index
    %c0_12 = arith.constant 0 : index
    %8 = vector.load %arg5[%c0_11, %c0_12] : memref<32x96xf32, #tpu.memory_space<vmem>>, vector<32x96xf32>
    %cst = arith.constant dense<0.000000e+00> : vector<8x96xf32>
    %9 = tpu.matmul %1, %8, %cst {dimension_numbers = #tpu.dot_dimension_numbers<[1], [0], [0], [1], [0, 0, 1, 1], [], []>} : vector<8x32xf32>, vector<32x96xf32>, vector<8x96xf32> -> vector<8x96xf32>
    %c0_13 = arith.constant 0 : index
    %c0_14 = arith.constant 0 : index
    %10 = vector.load %arg6[%c0_13, %c0_14] : memref<1x96xf32, #tpu.memory_space<vmem>>, vector<1x96xf32>
    %11 = vector.broadcast %10 : vector<1x96xf32> to vector<8x96xf32>
    %12 = arith.addf %9, %11 : vector<8x96xf32>
    %13 = vector.extract_strided_slice %12 {offsets = [0, 0], sizes = [8, 32], strides = [1, 1]} : vector<8x96xf32> to vector<8x32xf32>
    %cst_15 = arith.constant 0.353553385 : f32
    %14 = vector.broadcast %cst_15 : f32 to vector<8x32xf32>
    %15 = arith.mulf %13, %14 : vector<8x32xf32>
    %16 = vector.extract_strided_slice %12 {offsets = [0, 32], sizes = [8, 32], strides = [1, 1]} : vector<8x96xf32> to vector<8x32xf32>
    %17 = vector.extract_strided_slice %12 {offsets = [0, 64], sizes = [8, 32], strides = [1, 1]} : vector<8x96xf32> to vector<8x32xf32>
    %c0_16 = arith.constant 0 : index
    %c0_17 = arith.constant 0 : index
    %18 = vector.load %arg7[%c0_16, %c0_17] : memref<32x32xf32, #tpu.memory_space<vmem>>, vector<32x32xf32>
    %c0_18 = arith.constant 0 : index
    %c0_19 = arith.constant 0 : index
    %19 = vector.load %arg8[%c0_18, %c0_19] : memref<1x32xf32, #tpu.memory_space<vmem>>, vector<1x32xf32>
    %cst_20 = arith.constant 0.000000e+00 : f32
    %20 = vector.broadcast %cst_20 : f32 to vector<8x32xf32>
    %21 = vector.broadcast %19 : vector<1x32xf32> to vector<8x32xf32>
    %22 = arith.addf %20, %21 : vector<8x32xf32>
    %23 = vector.extract_strided_slice %15 {offsets = [0, 0], sizes = [8, 8], strides = [1, 1]} : vector<8x32xf32> to vector<8x8xf32>
    %24 = vector.extract_strided_slice %16 {offsets = [0, 0], sizes = [8, 8], strides = [1, 1]} : vector<8x32xf32> to vector<8x8xf32>
    %cst_21 = arith.constant dense<0.000000e+00> : vector<8x8xf32>
    %25 = tpu.matmul %23, %24, %cst_21 {dimension_numbers = #tpu.dot_dimension_numbers<[1], [1], [0], [0], [0, 0, 1, 0], [], []>} : vector<8x8xf32>, vector<8x8xf32>, vector<8x8xf32> -> vector<8x8xf32>
    %cst_22 = arith.constant 0.000000e+00 : f32
    %26 = vector.broadcast %cst_22 : f32 to vector<8x8xf32>
    %27 = arith.cmpf oeq, %5, %26 : vector<8x8xf32>
    %cst_23 = arith.constant -1.000000e+09 : f32
    %28 = vector.broadcast %cst_23 : f32 to vector<8x8xf32>
    %29 = arith.select %27, %28, %25 : vector<8x8xi1>, vector<8x8xf32>
    %cst_24 = arith.constant dense<0xFF800000> : vector<8xf32>
    %30 = vector.multi_reduction <maximumf>, %29, %cst_24 [1] : vector<8x8xf32> to vector<8xf32>
    %31 = vector.shape_cast %30 : vector<8xf32> to vector<8x1xf32>
    %32 = vector.broadcast %31 : vector<8x1xf32> to vector<8x8xf32>
    %33 = arith.subf %29, %32 : vector<8x8xf32>
    %34 = math.exp %33 : vector<8x8xf32>
    %cst_25 = arith.constant dense<0.000000e+00> : vector<8xf32>
    %35 = vector.multi_reduction <add>, %34, %cst_25 [1] : vector<8x8xf32> to vector<8xf32>
    %36 = vector.shape_cast %35 : vector<8xf32> to vector<8x1xf32>
    %37 = tpu.reciprocal %36 {approx = true} : vector<8x1xf32> -> vector<8x1xf32>
    %38 = vector.broadcast %37 : vector<8x1xf32> to vector<8x8xf32>
    %39 = arith.mulf %34, %38 : vector<8x8xf32>
    %40 = vector.extract_strided_slice %17 {offsets = [0, 0], sizes = [8, 8], strides = [1, 1]} : vector<8x32xf32> to vector<8x8xf32>
    %cst_26 = arith.constant dense<0.000000e+00> : vector<8x8xf32>
    %41 = tpu.matmul %39, %40, %cst_26 {dimension_numbers = #tpu.dot_dimension_numbers<[1], [0], [0], [1], [0, 0, 1, 1], [], []>} : vector<8x8xf32>, vector<8x8xf32>, vector<8x8xf32> -> vector<8x8xf32>
    %42 = vector.extract_strided_slice %18 {offsets = [0, 0], sizes = [8, 32], strides = [1, 1]} : vector<32x32xf32> to vector<8x32xf32>
    %cst_27 = arith.constant dense<0.000000e+00> : vector<8x32xf32>
    %43 = tpu.matmul %41, %42, %cst_27 {dimension_numbers = #tpu.dot_dimension_numbers<[1], [0], [0], [1], [0, 0, 1, 1], [], []>} : vector<8x8xf32>, vector<8x32xf32>, vector<8x32xf32> -> vector<8x32xf32>
    %44 = arith.addf %22, %43 : vector<8x32xf32>
    %45 = vector.extract_strided_slice %15 {offsets = [0, 8], sizes = [8, 8], strides = [1, 1]} : vector<8x32xf32> to vector<8x8xf32>
    %46 = vector.extract_strided_slice %16 {offsets = [0, 8], sizes = [8, 8], strides = [1, 1]} : vector<8x32xf32> to vector<8x8xf32>
    %cst_28 = arith.constant dense<0.000000e+00> : vector<8x8xf32>
    %47 = tpu.matmul %45, %46, %cst_28 {dimension_numbers = #tpu.dot_dimension_numbers<[1], [1], [0], [0], [0, 0, 1, 0], [], []>} : vector<8x8xf32>, vector<8x8xf32>, vector<8x8xf32> -> vector<8x8xf32>
    %cst_29 = arith.constant 0.000000e+00 : f32
    %48 = vector.broadcast %cst_29 : f32 to vector<8x8xf32>
    %49 = arith.cmpf oeq, %5, %48 : vector<8x8xf32>
    %cst_30 = arith.constant -1.000000e+09 : f32
    %50 = vector.broadcast %cst_30 : f32 to vector<8x8xf32>
    %51 = arith.select %49, %50, %47 : vector<8x8xi1>, vector<8x8xf32>
    %cst_31 = arith.constant dense<0xFF800000> : vector<8xf32>
    %52 = vector.multi_reduction <maximumf>, %51, %cst_31 [1] : vector<8x8xf32> to vector<8xf32>
    %53 = vector.shape_cast %52 : vector<8xf32> to vector<8x1xf32>
    %54 = vector.broadcast %53 : vector<8x1xf32> to vector<8x8xf32>
    %55 = arith.subf %51, %54 : vector<8x8xf32>
    %56 = math.exp %55 : vector<8x8xf32>
    %cst_32 = arith.constant dense<0.000000e+00> : vector<8xf32>
    %57 = vector.multi_reduction <add>, %56, %cst_32 [1] : vector<8x8xf32> to vector<8xf32>
    %58 = vector.shape_cast %57 : vector<8xf32> to vector<8x1xf32>
    %59 = tpu.reciprocal %58 {approx = true} : vector<8x1xf32> -> vector<8x1xf32>
    %60 = vector.broadcast %59 : vector<8x1xf32> to vector<8x8xf32>
    %61 = arith.mulf %56, %60 : vector<8x8xf32>
    %62 = vector.extract_strided_slice %17 {offsets = [0, 8], sizes = [8, 8], strides = [1, 1]} : vector<8x32xf32> to vector<8x8xf32>
    %cst_33 = arith.constant dense<0.000000e+00> : vector<8x8xf32>
    %63 = tpu.matmul %61, %62, %cst_33 {dimension_numbers = #tpu.dot_dimension_numbers<[1], [0], [0], [1], [0, 0, 1, 1], [], []>} : vector<8x8xf32>, vector<8x8xf32>, vector<8x8xf32> -> vector<8x8xf32>
    %64 = vector.extract_strided_slice %18 {offsets = [8, 0], sizes = [8, 32], strides = [1, 1]} : vector<32x32xf32> to vector<8x32xf32>
    %cst_34 = arith.constant dense<0.000000e+00> : vector<8x32xf32>
    %65 = tpu.matmul %63, %64, %cst_34 {dimension_numbers = #tpu.dot_dimension_numbers<[1], [0], [0], [1], [0, 0, 1, 1], [], []>} : vector<8x8xf32>, vector<8x32xf32>, vector<8x32xf32> -> vector<8x32xf32>
    %66 = arith.addf %44, %65 : vector<8x32xf32>
    %67 = vector.extract_strided_slice %15 {offsets = [0, 16], sizes = [8, 8], strides = [1, 1]} : vector<8x32xf32> to vector<8x8xf32>
    %68 = vector.extract_strided_slice %16 {offsets = [0, 16], sizes = [8, 8], strides = [1, 1]} : vector<8x32xf32> to vector<8x8xf32>
    %cst_35 = arith.constant dense<0.000000e+00> : vector<8x8xf32>
    %69 = tpu.matmul %67, %68, %cst_35 {dimension_numbers = #tpu.dot_dimension_numbers<[1], [1], [0], [0], [0, 0, 1, 0], [], []>} : vector<8x8xf32>, vector<8x8xf32>, vector<8x8xf32> -> vector<8x8xf32>
    %cst_36 = arith.constant 0.000000e+00 : f32
    %70 = vector.broadcast %cst_36 : f32 to vector<8x8xf32>
    %71 = arith.cmpf oeq, %5, %70 : vector<8x8xf32>
    %cst_37 = arith.constant -1.000000e+09 : f32
    %72 = vector.broadcast %cst_37 : f32 to vector<8x8xf32>
    %73 = arith.select %71, %72, %69 : vector<8x8xi1>, vector<8x8xf32>
    %cst_38 = arith.constant dense<0xFF800000> : vector<8xf32>
    %74 = vector.multi_reduction <maximumf>, %73, %cst_38 [1] : vector<8x8xf32> to vector<8xf32>
    %75 = vector.shape_cast %74 : vector<8xf32> to vector<8x1xf32>
    %76 = vector.broadcast %75 : vector<8x1xf32> to vector<8x8xf32>
    %77 = arith.subf %73, %76 : vector<8x8xf32>
    %78 = math.exp %77 : vector<8x8xf32>
    %cst_39 = arith.constant dense<0.000000e+00> : vector<8xf32>
    %79 = vector.multi_reduction <add>, %78, %cst_39 [1] : vector<8x8xf32> to vector<8xf32>
    %80 = vector.shape_cast %79 : vector<8xf32> to vector<8x1xf32>
    %81 = tpu.reciprocal %80 {approx = true} : vector<8x1xf32> -> vector<8x1xf32>
    %82 = vector.broadcast %81 : vector<8x1xf32> to vector<8x8xf32>
    %83 = arith.mulf %78, %82 : vector<8x8xf32>
    %84 = vector.extract_strided_slice %17 {offsets = [0, 16], sizes = [8, 8], strides = [1, 1]} : vector<8x32xf32> to vector<8x8xf32>
    %cst_40 = arith.constant dense<0.000000e+00> : vector<8x8xf32>
    %85 = tpu.matmul %83, %84, %cst_40 {dimension_numbers = #tpu.dot_dimension_numbers<[1], [0], [0], [1], [0, 0, 1, 1], [], []>} : vector<8x8xf32>, vector<8x8xf32>, vector<8x8xf32> -> vector<8x8xf32>
    %86 = vector.extract_strided_slice %18 {offsets = [16, 0], sizes = [8, 32], strides = [1, 1]} : vector<32x32xf32> to vector<8x32xf32>
    %cst_41 = arith.constant dense<0.000000e+00> : vector<8x32xf32>
    %87 = tpu.matmul %85, %86, %cst_41 {dimension_numbers = #tpu.dot_dimension_numbers<[1], [0], [0], [1], [0, 0, 1, 1], [], []>} : vector<8x8xf32>, vector<8x32xf32>, vector<8x32xf32> -> vector<8x32xf32>
    %88 = arith.addf %66, %87 : vector<8x32xf32>
    %89 = vector.extract_strided_slice %15 {offsets = [0, 24], sizes = [8, 8], strides = [1, 1]} : vector<8x32xf32> to vector<8x8xf32>
    %90 = vector.extract_strided_slice %16 {offsets = [0, 24], sizes = [8, 8], strides = [1, 1]} : vector<8x32xf32> to vector<8x8xf32>
    %cst_42 = arith.constant dense<0.000000e+00> : vector<8x8xf32>
    %91 = tpu.matmul %89, %90, %cst_42 {dimension_numbers = #tpu.dot_dimension_numbers<[1], [1], [0], [0], [0, 0, 1, 0], [], []>} : vector<8x8xf32>, vector<8x8xf32>, vector<8x8xf32> -> vector<8x8xf32>
    %cst_43 = arith.constant 0.000000e+00 : f32
    %92 = vector.broadcast %cst_43 : f32 to vector<8x8xf32>
    %93 = arith.cmpf oeq, %5, %92 : vector<8x8xf32>
    %cst_44 = arith.constant -1.000000e+09 : f32
    %94 = vector.broadcast %cst_44 : f32 to vector<8x8xf32>
    %95 = arith.select %93, %94, %91 : vector<8x8xi1>, vector<8x8xf32>
    %cst_45 = arith.constant dense<0xFF800000> : vector<8xf32>
    %96 = vector.multi_reduction <maximumf>, %95, %cst_45 [1] : vector<8x8xf32> to vector<8xf32>
    %97 = vector.shape_cast %96 : vector<8xf32> to vector<8x1xf32>
    %98 = vector.broadcast %97 : vector<8x1xf32> to vector<8x8xf32>
    %99 = arith.subf %95, %98 : vector<8x8xf32>
    %100 = math.exp %99 : vector<8x8xf32>
    %cst_46 = arith.constant dense<0.000000e+00> : vector<8xf32>
    %101 = vector.multi_reduction <add>, %100, %cst_46 [1] : vector<8x8xf32> to vector<8xf32>
    %102 = vector.shape_cast %101 : vector<8xf32> to vector<8x1xf32>
    %103 = tpu.reciprocal %102 {approx = true} : vector<8x1xf32> -> vector<8x1xf32>
    %104 = vector.broadcast %103 : vector<8x1xf32> to vector<8x8xf32>
    %105 = arith.mulf %100, %104 : vector<8x8xf32>
    %106 = vector.extract_strided_slice %17 {offsets = [0, 24], sizes = [8, 8], strides = [1, 1]} : vector<8x32xf32> to vector<8x8xf32>
    %cst_47 = arith.constant dense<0.000000e+00> : vector<8x8xf32>
    %107 = tpu.matmul %105, %106, %cst_47 {dimension_numbers = #tpu.dot_dimension_numbers<[1], [0], [0], [1], [0, 0, 1, 1], [], []>} : vector<8x8xf32>, vector<8x8xf32>, vector<8x8xf32> -> vector<8x8xf32>
    %108 = vector.extract_strided_slice %18 {offsets = [24, 0], sizes = [8, 32], strides = [1, 1]} : vector<32x32xf32> to vector<8x32xf32>
    %cst_48 = arith.constant dense<0.000000e+00> : vector<8x32xf32>
    %109 = tpu.matmul %107, %108, %cst_48 {dimension_numbers = #tpu.dot_dimension_numbers<[1], [0], [0], [1], [0, 0, 1, 1], [], []>} : vector<8x8xf32>, vector<8x32xf32>, vector<8x32xf32> -> vector<8x32xf32>
    %110 = arith.addf %88, %109 : vector<8x32xf32>
    %111 = arith.addf %1, %110 : vector<8x32xf32>
    %c0_49 = arith.constant 0 : index
    %c0_50 = arith.constant 0 : index
    %112 = vector.load %arg9[%c0_49, %c0_50] : memref<1x32xf32, #tpu.memory_space<vmem>>, vector<1x32xf32>
    %c0_51 = arith.constant 0 : index
    %c0_52 = arith.constant 0 : index
    %113 = vector.load %arg10[%c0_51, %c0_52] : memref<1x32xf32, #tpu.memory_space<vmem>>, vector<1x32xf32>
    %cst_53 = arith.constant dense<0.000000e+00> : vector<8xf32>
    %114 = vector.multi_reduction <add>, %111, %cst_53 [1] : vector<8x32xf32> to vector<8xf32>
    %115 = vector.shape_cast %114 : vector<8xf32> to vector<8x1xf32>
    %cst_54 = arith.constant 3.200000e+01 : f32
    %116 = vector.broadcast %cst_54 : f32 to vector<8x1xf32>
    %117 = arith.divf %115, %116 : vector<8x1xf32>
    %118 = vector.broadcast %117 : vector<8x1xf32> to vector<8x32xf32>
    %119 = arith.subf %111, %118 : vector<8x32xf32>
    %120 = arith.mulf %119, %119 : vector<8x32xf32>
    %cst_55 = arith.constant dense<0.000000e+00> : vector<8xf32>
    %121 = vector.multi_reduction <add>, %120, %cst_55 [1] : vector<8x32xf32> to vector<8xf32>
    %122 = vector.shape_cast %121 : vector<8xf32> to vector<8x1xf32>
    %cst_56 = arith.constant 3.100000e+01 : f32
    %123 = vector.broadcast %cst_56 : f32 to vector<8x1xf32>
    %124 = arith.divf %122, %123 : vector<8x1xf32>
    %125 = math.sqrt %124 : vector<8x1xf32>
    %cst_57 = arith.constant 9.99999997E-7 : f32
    %126 = vector.broadcast %cst_57 : f32 to vector<8x1xf32>
    %127 = arith.addf %125, %126 : vector<8x1xf32>
    %128 = tpu.reciprocal %127 : vector<8x1xf32> -> vector<8x1xf32>
    %129 = vector.broadcast %117 : vector<8x1xf32> to vector<8x32xf32>
    %130 = arith.subf %111, %129 : vector<8x32xf32>
    %131 = vector.broadcast %112 : vector<1x32xf32> to vector<8x32xf32>
    %132 = arith.mulf %131, %130 : vector<8x32xf32>
    %133 = vector.broadcast %128 : vector<8x1xf32> to vector<8x32xf32>
    %134 = arith.mulf %132, %133 : vector<8x32xf32>
    %135 = vector.broadcast %113 : vector<1x32xf32> to vector<8x32xf32>
    %136 = arith.addf %134, %135 : vector<8x32xf32>
    %c0_58 = arith.constant 0 : index
    %c0_59 = arith.constant 0 : index
    %137 = vector.load %arg11[%c0_58, %c0_59] : memref<32x32xf32, #tpu.memory_space<vmem>>, vector<32x32xf32>
    %cst_60 = arith.constant dense<0.000000e+00> : vector<8x32xf32>
    %138 = tpu.matmul %136, %137, %cst_60 {dimension_numbers = #tpu.dot_dimension_numbers<[1], [0], [0], [1], [0, 0, 1, 1], [], []>} : vector<8x32xf32>, vector<32x32xf32>, vector<8x32xf32> -> vector<8x32xf32>
    %c0_61 = arith.constant 0 : index
    %c0_62 = arith.constant 0 : index
    %139 = vector.load %arg12[%c0_61, %c0_62] : memref<1x32xf32, #tpu.memory_space<vmem>>, vector<1x32xf32>
    %140 = vector.broadcast %139 : vector<1x32xf32> to vector<8x32xf32>
    %141 = arith.addf %138, %140 : vector<8x32xf32>
    %cst_63 = arith.constant 0.353553385 : f32
    %142 = vector.broadcast %cst_63 : f32 to vector<8x32xf32>
    %143 = arith.mulf %141, %142 : vector<8x32xf32>
    %c0_64 = arith.constant 0 : index
    %c0_65 = arith.constant 0 : index
    %144 = vector.load %arg13[%c0_64, %c0_65] : memref<32x64xf32, #tpu.memory_space<vmem>>, vector<32x64xf32>
    %cst_66 = arith.constant dense<0.000000e+00> : vector<8x64xf32>
    %145 = tpu.matmul %3, %144, %cst_66 {dimension_numbers = #tpu.dot_dimension_numbers<[1], [0], [0], [1], [0, 0, 1, 1], [], []>} : vector<8x32xf32>, vector<32x64xf32>, vector<8x64xf32> -> vector<8x64xf32>
    %c0_67 = arith.constant 0 : index
    %c0_68 = arith.constant 0 : index
    %146 = vector.load %arg14[%c0_67, %c0_68] : memref<1x64xf32, #tpu.memory_space<vmem>>, vector<1x64xf32>
    %147 = vector.broadcast %146 : vector<1x64xf32> to vector<8x64xf32>
    %148 = arith.addf %145, %147 : vector<8x64xf32>
    %149 = vector.extract_strided_slice %148 {offsets = [0, 0], sizes = [8, 32], strides = [1, 1]} : vector<8x64xf32> to vector<8x32xf32>
    %150 = vector.extract_strided_slice %148 {offsets = [0, 32], sizes = [8, 32], strides = [1, 1]} : vector<8x64xf32> to vector<8x32xf32>
    %c0_69 = arith.constant 0 : index
    %c0_70 = arith.constant 0 : index
    %151 = vector.load %arg15[%c0_69, %c0_70] : memref<32x32xf32, #tpu.memory_space<vmem>>, vector<32x32xf32>
    %c0_71 = arith.constant 0 : index
    %c0_72 = arith.constant 0 : index
    %152 = vector.load %arg16[%c0_71, %c0_72] : memref<1x32xf32, #tpu.memory_space<vmem>>, vector<1x32xf32>
    %cst_73 = arith.constant 0.000000e+00 : f32
    %153 = vector.broadcast %cst_73 : f32 to vector<8x32xf32>
    %154 = vector.broadcast %152 : vector<1x32xf32> to vector<8x32xf32>
    %155 = arith.addf %153, %154 : vector<8x32xf32>
    %156 = vector.extract_strided_slice %143 {offsets = [0, 0], sizes = [8, 8], strides = [1, 1]} : vector<8x32xf32> to vector<8x8xf32>
    %157 = vector.extract_strided_slice %149 {offsets = [0, 0], sizes = [8, 8], strides = [1, 1]} : vector<8x32xf32> to vector<8x8xf32>
    %cst_74 = arith.constant dense<0.000000e+00> : vector<8x8xf32>
    %158 = tpu.matmul %156, %157, %cst_74 {dimension_numbers = #tpu.dot_dimension_numbers<[1], [1], [0], [0], [0, 0, 1, 0], [], []>} : vector<8x8xf32>, vector<8x8xf32>, vector<8x8xf32> -> vector<8x8xf32>
    %cst_75 = arith.constant 0.000000e+00 : f32
    %159 = vector.broadcast %cst_75 : f32 to vector<8x8xf32>
    %160 = arith.cmpf oeq, %7, %159 : vector<8x8xf32>
    %cst_76 = arith.constant -1.000000e+09 : f32
    %161 = vector.broadcast %cst_76 : f32 to vector<8x8xf32>
    %162 = arith.select %160, %161, %158 : vector<8x8xi1>, vector<8x8xf32>
    %cst_77 = arith.constant dense<0xFF800000> : vector<8xf32>
    %163 = vector.multi_reduction <maximumf>, %162, %cst_77 [1] : vector<8x8xf32> to vector<8xf32>
    %164 = vector.shape_cast %163 : vector<8xf32> to vector<8x1xf32>
    %165 = vector.broadcast %164 : vector<8x1xf32> to vector<8x8xf32>
    %166 = arith.subf %162, %165 : vector<8x8xf32>
    %167 = math.exp %166 : vector<8x8xf32>
    %cst_78 = arith.constant dense<0.000000e+00> : vector<8xf32>
    %168 = vector.multi_reduction <add>, %167, %cst_78 [1] : vector<8x8xf32> to vector<8xf32>
    %169 = vector.shape_cast %168 : vector<8xf32> to vector<8x1xf32>
    %170 = tpu.reciprocal %169 {approx = true} : vector<8x1xf32> -> vector<8x1xf32>
    %171 = vector.broadcast %170 : vector<8x1xf32> to vector<8x8xf32>
    %172 = arith.mulf %167, %171 : vector<8x8xf32>
    %173 = vector.extract_strided_slice %150 {offsets = [0, 0], sizes = [8, 8], strides = [1, 1]} : vector<8x32xf32> to vector<8x8xf32>
    %cst_79 = arith.constant dense<0.000000e+00> : vector<8x8xf32>
    %174 = tpu.matmul %172, %173, %cst_79 {dimension_numbers = #tpu.dot_dimension_numbers<[1], [0], [0], [1], [0, 0, 1, 1], [], []>} : vector<8x8xf32>, vector<8x8xf32>, vector<8x8xf32> -> vector<8x8xf32>
    %175 = vector.extract_strided_slice %151 {offsets = [0, 0], sizes = [8, 32], strides = [1, 1]} : vector<32x32xf32> to vector<8x32xf32>
    %cst_80 = arith.constant dense<0.000000e+00> : vector<8x32xf32>
    %176 = tpu.matmul %174, %175, %cst_80 {dimension_numbers = #tpu.dot_dimension_numbers<[1], [0], [0], [1], [0, 0, 1, 1], [], []>} : vector<8x8xf32>, vector<8x32xf32>, vector<8x32xf32> -> vector<8x32xf32>
    %177 = arith.addf %155, %176 : vector<8x32xf32>
    %178 = vector.extract_strided_slice %143 {offsets = [0, 8], sizes = [8, 8], strides = [1, 1]} : vector<8x32xf32> to vector<8x8xf32>
    %179 = vector.extract_strided_slice %149 {offsets = [0, 8], sizes = [8, 8], strides = [1, 1]} : vector<8x32xf32> to vector<8x8xf32>
    %cst_81 = arith.constant dense<0.000000e+00> : vector<8x8xf32>
    %180 = tpu.matmul %178, %179, %cst_81 {dimension_numbers = #tpu.dot_dimension_numbers<[1], [1], [0], [0], [0, 0, 1, 0], [], []>} : vector<8x8xf32>, vector<8x8xf32>, vector<8x8xf32> -> vector<8x8xf32>
    %cst_82 = arith.constant 0.000000e+00 : f32
    %181 = vector.broadcast %cst_82 : f32 to vector<8x8xf32>
    %182 = arith.cmpf oeq, %7, %181 : vector<8x8xf32>
    %cst_83 = arith.constant -1.000000e+09 : f32
    %183 = vector.broadcast %cst_83 : f32 to vector<8x8xf32>
    %184 = arith.select %182, %183, %180 : vector<8x8xi1>, vector<8x8xf32>
    %cst_84 = arith.constant dense<0xFF800000> : vector<8xf32>
    %185 = vector.multi_reduction <maximumf>, %184, %cst_84 [1] : vector<8x8xf32> to vector<8xf32>
    %186 = vector.shape_cast %185 : vector<8xf32> to vector<8x1xf32>
    %187 = vector.broadcast %186 : vector<8x1xf32> to vector<8x8xf32>
    %188 = arith.subf %184, %187 : vector<8x8xf32>
    %189 = math.exp %188 : vector<8x8xf32>
    %cst_85 = arith.constant dense<0.000000e+00> : vector<8xf32>
    %190 = vector.multi_reduction <add>, %189, %cst_85 [1] : vector<8x8xf32> to vector<8xf32>
    %191 = vector.shape_cast %190 : vector<8xf32> to vector<8x1xf32>
    %192 = tpu.reciprocal %191 {approx = true} : vector<8x1xf32> -> vector<8x1xf32>
    %193 = vector.broadcast %192 : vector<8x1xf32> to vector<8x8xf32>
    %194 = arith.mulf %189, %193 : vector<8x8xf32>
    %195 = vector.extract_strided_slice %150 {offsets = [0, 8], sizes = [8, 8], strides = [1, 1]} : vector<8x32xf32> to vector<8x8xf32>
    %cst_86 = arith.constant dense<0.000000e+00> : vector<8x8xf32>
    %196 = tpu.matmul %194, %195, %cst_86 {dimension_numbers = #tpu.dot_dimension_numbers<[1], [0], [0], [1], [0, 0, 1, 1], [], []>} : vector<8x8xf32>, vector<8x8xf32>, vector<8x8xf32> -> vector<8x8xf32>
    %197 = vector.extract_strided_slice %151 {offsets = [8, 0], sizes = [8, 32], strides = [1, 1]} : vector<32x32xf32> to vector<8x32xf32>
    %cst_87 = arith.constant dense<0.000000e+00> : vector<8x32xf32>
    %198 = tpu.matmul %196, %197, %cst_87 {dimension_numbers = #tpu.dot_dimension_numbers<[1], [0], [0], [1], [0, 0, 1, 1], [], []>} : vector<8x8xf32>, vector<8x32xf32>, vector<8x32xf32> -> vector<8x32xf32>
    %199 = arith.addf %177, %198 : vector<8x32xf32>
    %200 = vector.extract_strided_slice %143 {offsets = [0, 16], sizes = [8, 8], strides = [1, 1]} : vector<8x32xf32> to vector<8x8xf32>
    %201 = vector.extract_strided_slice %149 {offsets = [0, 16], sizes = [8, 8], strides = [1, 1]} : vector<8x32xf32> to vector<8x8xf32>
    %cst_88 = arith.constant dense<0.000000e+00> : vector<8x8xf32>
    %202 = tpu.matmul %200, %201, %cst_88 {dimension_numbers = #tpu.dot_dimension_numbers<[1], [1], [0], [0], [0, 0, 1, 0], [], []>} : vector<8x8xf32>, vector<8x8xf32>, vector<8x8xf32> -> vector<8x8xf32>
    %cst_89 = arith.constant 0.000000e+00 : f32
    %203 = vector.broadcast %cst_89 : f32 to vector<8x8xf32>
    %204 = arith.cmpf oeq, %7, %203 : vector<8x8xf32>
    %cst_90 = arith.constant -1.000000e+09 : f32
    %205 = vector.broadcast %cst_90 : f32 to vector<8x8xf32>
    %206 = arith.select %204, %205, %202 : vector<8x8xi1>, vector<8x8xf32>
    %cst_91 = arith.constant dense<0xFF800000> : vector<8xf32>
    %207 = vector.multi_reduction <maximumf>, %206, %cst_91 [1] : vector<8x8xf32> to vector<8xf32>
    %208 = vector.shape_cast %207 : vector<8xf32> to vector<8x1xf32>
    %209 = vector.broadcast %208 : vector<8x1xf32> to vector<8x8xf32>
    %210 = arith.subf %206, %209 : vector<8x8xf32>
    %211 = math.exp %210 : vector<8x8xf32>
    %cst_92 = arith.constant dense<0.000000e+00> : vector<8xf32>
    %212 = vector.multi_reduction <add>, %211, %cst_92 [1] : vector<8x8xf32> to vector<8xf32>
    %213 = vector.shape_cast %212 : vector<8xf32> to vector<8x1xf32>
    %214 = tpu.reciprocal %213 {approx = true} : vector<8x1xf32> -> vector<8x1xf32>
    %215 = vector.broadcast %214 : vector<8x1xf32> to vector<8x8xf32>
    %216 = arith.mulf %211, %215 : vector<8x8xf32>
    %217 = vector.extract_strided_slice %150 {offsets = [0, 16], sizes = [8, 8], strides = [1, 1]} : vector<8x32xf32> to vector<8x8xf32>
    %cst_93 = arith.constant dense<0.000000e+00> : vector<8x8xf32>
    %218 = tpu.matmul %216, %217, %cst_93 {dimension_numbers = #tpu.dot_dimension_numbers<[1], [0], [0], [1], [0, 0, 1, 1], [], []>} : vector<8x8xf32>, vector<8x8xf32>, vector<8x8xf32> -> vector<8x8xf32>
    %219 = vector.extract_strided_slice %151 {offsets = [16, 0], sizes = [8, 32], strides = [1, 1]} : vector<32x32xf32> to vector<8x32xf32>
    %cst_94 = arith.constant dense<0.000000e+00> : vector<8x32xf32>
    %220 = tpu.matmul %218, %219, %cst_94 {dimension_numbers = #tpu.dot_dimension_numbers<[1], [0], [0], [1], [0, 0, 1, 1], [], []>} : vector<8x8xf32>, vector<8x32xf32>, vector<8x32xf32> -> vector<8x32xf32>
    %221 = arith.addf %199, %220 : vector<8x32xf32>
    %222 = vector.extract_strided_slice %143 {offsets = [0, 24], sizes = [8, 8], strides = [1, 1]} : vector<8x32xf32> to vector<8x8xf32>
    %223 = vector.extract_strided_slice %149 {offsets = [0, 24], sizes = [8, 8], strides = [1, 1]} : vector<8x32xf32> to vector<8x8xf32>
    %cst_95 = arith.constant dense<0.000000e+00> : vector<8x8xf32>
    %224 = tpu.matmul %222, %223, %cst_95 {dimension_numbers = #tpu.dot_dimension_numbers<[1], [1], [0], [0], [0, 0, 1, 0], [], []>} : vector<8x8xf32>, vector<8x8xf32>, vector<8x8xf32> -> vector<8x8xf32>
    %cst_96 = arith.constant 0.000000e+00 : f32
    %225 = vector.broadcast %cst_96 : f32 to vector<8x8xf32>
    %226 = arith.cmpf oeq, %7, %225 : vector<8x8xf32>
    %cst_97 = arith.constant -1.000000e+09 : f32
    %227 = vector.broadcast %cst_97 : f32 to vector<8x8xf32>
    %228 = arith.select %226, %227, %224 : vector<8x8xi1>, vector<8x8xf32>
    %cst_98 = arith.constant dense<0xFF800000> : vector<8xf32>
    %229 = vector.multi_reduction <maximumf>, %228, %cst_98 [1] : vector<8x8xf32> to vector<8xf32>
    %230 = vector.shape_cast %229 : vector<8xf32> to vector<8x1xf32>
    %231 = vector.broadcast %230 : vector<8x1xf32> to vector<8x8xf32>
    %232 = arith.subf %228, %231 : vector<8x8xf32>
    %233 = math.exp %232 : vector<8x8xf32>
    %cst_99 = arith.constant dense<0.000000e+00> : vector<8xf32>
    %234 = vector.multi_reduction <add>, %233, %cst_99 [1] : vector<8x8xf32> to vector<8xf32>
    %235 = vector.shape_cast %234 : vector<8xf32> to vector<8x1xf32>
    %236 = tpu.reciprocal %235 {approx = true} : vector<8x1xf32> -> vector<8x1xf32>
    %237 = vector.broadcast %236 : vector<8x1xf32> to vector<8x8xf32>
    %238 = arith.mulf %233, %237 : vector<8x8xf32>
    %239 = vector.extract_strided_slice %150 {offsets = [0, 24], sizes = [8, 8], strides = [1, 1]} : vector<8x32xf32> to vector<8x8xf32>
    %cst_100 = arith.constant dense<0.000000e+00> : vector<8x8xf32>
    %240 = tpu.matmul %238, %239, %cst_100 {dimension_numbers = #tpu.dot_dimension_numbers<[1], [0], [0], [1], [0, 0, 1, 1], [], []>} : vector<8x8xf32>, vector<8x8xf32>, vector<8x8xf32> -> vector<8x8xf32>
    %241 = vector.extract_strided_slice %151 {offsets = [24, 0], sizes = [8, 32], strides = [1, 1]} : vector<32x32xf32> to vector<8x32xf32>
    %cst_101 = arith.constant dense<0.000000e+00> : vector<8x32xf32>
    %242 = tpu.matmul %240, %241, %cst_101 {dimension_numbers = #tpu.dot_dimension_numbers<[1], [0], [0], [1], [0, 0, 1, 1], [], []>} : vector<8x8xf32>, vector<8x32xf32>, vector<8x32xf32> -> vector<8x32xf32>
    %243 = arith.addf %221, %242 : vector<8x32xf32>
    %244 = arith.addf %136, %243 : vector<8x32xf32>
    %c0_102 = arith.constant 0 : index
    %c0_103 = arith.constant 0 : index
    %245 = vector.load %arg17[%c0_102, %c0_103] : memref<1x32xf32, #tpu.memory_space<vmem>>, vector<1x32xf32>
    %c0_104 = arith.constant 0 : index
    %c0_105 = arith.constant 0 : index
    %246 = vector.load %arg18[%c0_104, %c0_105] : memref<1x32xf32, #tpu.memory_space<vmem>>, vector<1x32xf32>
    %cst_106 = arith.constant dense<0.000000e+00> : vector<8xf32>
    %247 = vector.multi_reduction <add>, %244, %cst_106 [1] : vector<8x32xf32> to vector<8xf32>
    %248 = vector.shape_cast %247 : vector<8xf32> to vector<8x1xf32>
    %cst_107 = arith.constant 3.200000e+01 : f32
    %249 = vector.broadcast %cst_107 : f32 to vector<8x1xf32>
    %250 = arith.divf %248, %249 : vector<8x1xf32>
    %251 = vector.broadcast %250 : vector<8x1xf32> to vector<8x32xf32>
    %252 = arith.subf %244, %251 : vector<8x32xf32>
    %253 = arith.mulf %252, %252 : vector<8x32xf32>
    %cst_108 = arith.constant dense<0.000000e+00> : vector<8xf32>
    %254 = vector.multi_reduction <add>, %253, %cst_108 [1] : vector<8x32xf32> to vector<8xf32>
    %255 = vector.shape_cast %254 : vector<8xf32> to vector<8x1xf32>
    %cst_109 = arith.constant 3.100000e+01 : f32
    %256 = vector.broadcast %cst_109 : f32 to vector<8x1xf32>
    %257 = arith.divf %255, %256 : vector<8x1xf32>
    %258 = math.sqrt %257 : vector<8x1xf32>
    %cst_110 = arith.constant 9.99999997E-7 : f32
    %259 = vector.broadcast %cst_110 : f32 to vector<8x1xf32>
    %260 = arith.addf %258, %259 : vector<8x1xf32>
    %261 = tpu.reciprocal %260 : vector<8x1xf32> -> vector<8x1xf32>
    %262 = vector.broadcast %250 : vector<8x1xf32> to vector<8x32xf32>
    %263 = arith.subf %244, %262 : vector<8x32xf32>
    %264 = vector.broadcast %245 : vector<1x32xf32> to vector<8x32xf32>
    %265 = arith.mulf %264, %263 : vector<8x32xf32>
    %266 = vector.broadcast %261 : vector<8x1xf32> to vector<8x32xf32>
    %267 = arith.mulf %265, %266 : vector<8x32xf32>
    %268 = vector.broadcast %246 : vector<1x32xf32> to vector<8x32xf32>
    %269 = arith.addf %267, %268 : vector<8x32xf32>
    %c0_111 = arith.constant 0 : index
    %c0_112 = arith.constant 0 : index
    %270 = vector.load %arg19[%c0_111, %c0_112] : memref<32x64xf32, #tpu.memory_space<vmem>>, vector<32x64xf32>
    %cst_113 = arith.constant dense<0.000000e+00> : vector<8x64xf32>
    %271 = tpu.matmul %269, %270, %cst_113 {dimension_numbers = #tpu.dot_dimension_numbers<[1], [0], [0], [1], [0, 0, 1, 1], [], []>} : vector<8x32xf32>, vector<32x64xf32>, vector<8x64xf32> -> vector<8x64xf32>
    %c0_114 = arith.constant 0 : index
    %c0_115 = arith.constant 0 : index
    %272 = vector.load %arg20[%c0_114, %c0_115] : memref<1x64xf32, #tpu.memory_space<vmem>>, vector<1x64xf32>
    %273 = vector.broadcast %272 : vector<1x64xf32> to vector<8x64xf32>
    %274 = arith.addf %271, %273 : vector<8x64xf32>
    %cst_116 = arith.constant 0.000000e+00 : f32
    %275 = vector.broadcast %cst_116 : f32 to vector<8x64xf32>
    %276 = arith.maximumf %274, %275 : vector<8x64xf32>
    %c0_117 = arith.constant 0 : index
    %c0_118 = arith.constant 0 : index
    %277 = vector.load %arg21[%c0_117, %c0_118] : memref<64x32xf32, #tpu.memory_space<vmem>>, vector<64x32xf32>
    %cst_119 = arith.constant dense<0.000000e+00> : vector<8x32xf32>
    %278 = tpu.matmul %276, %277, %cst_119 {dimension_numbers = #tpu.dot_dimension_numbers<[1], [0], [0], [1], [0, 0, 1, 1], [], []>} : vector<8x64xf32>, vector<64x32xf32>, vector<8x32xf32> -> vector<8x32xf32>
    %c0_120 = arith.constant 0 : index
    %c0_121 = arith.constant 0 : index
    %279 = vector.load %arg22[%c0_120, %c0_121] : memref<1x32xf32, #tpu.memory_space<vmem>>, vector<1x32xf32>
    %280 = vector.broadcast %279 : vector<1x32xf32> to vector<8x32xf32>
    %281 = arith.addf %278, %280 : vector<8x32xf32>
    %282 = arith.addf %269, %281 : vector<8x32xf32>
    %c0_122 = arith.constant 0 : index
    %c0_123 = arith.constant 0 : index
    %283 = vector.load %arg23[%c0_122, %c0_123] : memref<1x32xf32, #tpu.memory_space<vmem>>, vector<1x32xf32>
    %c0_124 = arith.constant 0 : index
    %c0_125 = arith.constant 0 : index
    %284 = vector.load %arg24[%c0_124, %c0_125] : memref<1x32xf32, #tpu.memory_space<vmem>>, vector<1x32xf32>
    %cst_126 = arith.constant dense<0.000000e+00> : vector<8xf32>
    %285 = vector.multi_reduction <add>, %282, %cst_126 [1] : vector<8x32xf32> to vector<8xf32>
    %286 = vector.shape_cast %285 : vector<8xf32> to vector<8x1xf32>
    %cst_127 = arith.constant 3.200000e+01 : f32
    %287 = vector.broadcast %cst_127 : f32 to vector<8x1xf32>
    %288 = arith.divf %286, %287 : vector<8x1xf32>
    %289 = vector.broadcast %288 : vector<8x1xf32> to vector<8x32xf32>
    %290 = arith.subf %282, %289 : vector<8x32xf32>
    %291 = arith.mulf %290, %290 : vector<8x32xf32>
    %cst_128 = arith.constant dense<0.000000e+00> : vector<8xf32>
    %292 = vector.multi_reduction <add>, %291, %cst_128 [1] : vector<8x32xf32> to vector<8xf32>
    %293 = vector.shape_cast %292 : vector<8xf32> to vector<8x1xf32>
    %cst_129 = arith.constant 3.100000e+01 : f32
    %294 = vector.broadcast %cst_129 : f32 to vector<8x1xf32>
    %295 = arith.divf %293, %294 : vector<8x1xf32>
    %296 = math.sqrt %295 : vector<8x1xf32>
    %cst_130 = arith.constant 9.99999997E-7 : f32
    %297 = vector.broadcast %cst_130 : f32 to vector<8x1xf32>
    %298 = arith.addf %296, %297 : vector<8x1xf32>
    %299 = tpu.reciprocal %298 : vector<8x1xf32> -> vector<8x1xf32>
    %300 = vector.broadcast %288 : vector<8x1xf32> to vector<8x32xf32>
    %301 = arith.subf %282, %300 : vector<8x32xf32>
    %302 = vector.broadcast %283 : vector<1x32xf32> to vector<8x32xf32>
    %303 = arith.mulf %302, %301 : vector<8x32xf32>
    %304 = vector.broadcast %299 : vector<8x1xf32> to vector<8x32xf32>
    %305 = arith.mulf %303, %304 : vector<8x32xf32>
    %306 = vector.broadcast %284 : vector<1x32xf32> to vector<8x32xf32>
    %307 = arith.addf %305, %306 : vector<8x32xf32>
    %c0_131 = arith.constant 0 : index
    %c0_132 = arith.constant 0 : index
    %c0_133 = arith.constant 0 : index
    %308 = vector.load %arg25[%c0_131, %c0_132, %c0_133] : memref<1x8x32xf32, #tpu.memory_space<vmem>>, vector<1x8x32xf32>
    %309 = vector.shape_cast %308 : vector<1x8x32xf32> to vector<8x32xf32>
    %310 = vector.shape_cast %307 : vector<8x32xf32> to vector<1x8x32xf32>
    tpu.vector_store %arg25[%c0_131, %c0_132, %c0_133], %310 {strides = array<i32>} : memref<1x8x32xf32, #tpu.memory_space<vmem>>, vector<1x8x32xf32>,
    return
  }
  func.func @transform_0(%arg0: i32) -> (i32, i32, i32) {
    %c0_i32 = arith.constant 0 : i32
    %c0_i32_0 = arith.constant 0 : i32
    %c0_i32_1 = arith.constant 0 : i32
    return %arg0, %c0_i32, %c0_i32_0 : i32, i32, i32
  }
  func.func @transform_1(%arg0: i32) -> (i32, i32, i32) {
    %c0_i32 = arith.constant 0 : i32
    %c0_i32_0 = arith.constant 0 : i32
    %c0_i32_1 = arith.constant 0 : i32
    return %arg0, %c0_i32, %c0_i32_0 : i32, i32, i32
  }
  func.func @transform_2(%arg0: i32) -> (i32, i32, i32) {
    %c0_i32 = arith.constant 0 : i32
    %c0_i32_0 = arith.constant 0 : i32
    %c0_i32_1 = arith.constant 0 : i32
    return %arg0, %c0_i32, %c0_i32_0 : i32, i32, i32
  }
  func.func @transform_3(%arg0: i32) -> (i32, i32, i32) {
    %c0_i32 = arith.constant 0 : i32
    %c0_i32_0 = arith.constant 0 : i32
    %c0_i32_1 = arith.constant 0 : i32
    return %arg0, %c0_i32, %c0_i32_0 : i32, i32, i32
  }
  func.func @transform_4(%arg0: i32) -> (i32, i32) {
    %c0_i32 = arith.constant 0 : i32
    %c0_i32_0 = arith.constant 0 : i32
    %c0_i32_1 = arith.constant 0 : i32
    return %c0_i32, %c0_i32_0 : i32, i32
  }
  func.func @transform_5(%arg0: i32) -> (i32, i32) {
    %c0_i32 = arith.constant 0 : i32
    %c0_i32_0 = arith.constant 0 : i32
    %c0_i32_1 = arith.constant 0 : i32
    return %c0_i32, %c0_i32_0 : i32, i32
  }
  func.func @transform_6(%arg0: i32) -> (i32, i32) {
    %c0_i32 = arith.constant 0 : i32
    %c0_i32_0 = arith.constant 0 : i32
    %c0_i32_1 = arith.constant 0 : i32
    return %c0_i32, %c0_i32_0 : i32, i32
  }
  func.func @transform_7(%arg0: i32) -> (i32, i32) {
    %c0_i32 = arith.constant 0 : i32
    %c0_i32_0 = arith.constant 0 : i32
    %c0_i32_1 = arith.constant 0 : i32
    return %c0_i32, %c0_i32_0 : i32, i32
  }
  func.func @transform_8(%arg0: i32) -> (i32, i32) {
    %c0_i32 = arith.constant 0 : i32
    %c0_i32_0 = arith.constant 0 : i32
    %c0_i32_1 = arith.constant 0 : i32
    return %c0_i32, %c0_i32_0 : i32, i32
  }
  func.func @transform_9(%arg0: i32) -> (i32, i32) {
    %c0_i32 = arith.constant 0 : i32
    %c0_i32_0 = arith.constant 0 : i32
    %c0_i32_1 = arith.constant 0 : i32
    return %c0_i32, %c0_i32_0 : i32, i32
  }
  func.func @transform_10(%arg0: i32) -> (i32, i32) {
    %c0_i32 = arith.constant 0 : i32
    %c0_i32_0 = arith.constant 0 : i32
    %c0_i32_1 = arith.constant 0 : i32
    return %c0_i32, %c0_i32_0 : i32, i32
  }
  func.func @transform_11(%arg0: i32) -> (i32, i32) {
    %c0_i32 = arith.constant 0 : i32
    %c0_i32_0 = arith.constant 0 : i32
    %c0_i32_1 = arith.constant 0 : i32
    return %c0_i32, %c0_i32_0 : i32, i32
  }
  func.func @transform_12(%arg0: i32) -> (i32, i32) {
    %c0_i32 = arith.constant 0 : i32
    %c0_i32_0 = arith.constant 0 : i32
    %c0_i32_1 = arith.constant 0 : i32
    return %c0_i32, %c0_i32_0 : i32, i32
  }
  func.func @transform_13(%arg0: i32) -> (i32, i32) {
    %c0_i32 = arith.constant 0 : i32
    %c0_i32_0 = arith.constant 0 : i32
    %c0_i32_1 = arith.constant 0 : i32
    return %c0_i32, %c0_i32_0 : i32, i32
  }
  func.func @transform_14(%arg0: i32) -> (i32, i32) {
    %c0_i32 = arith.constant 0 : i32
    %c0_i32_0 = arith.constant 0 : i32
    %c0_i32_1 = arith.constant 0 : i32
    return %c0_i32, %c0_i32_0 : i32, i32
  }
  func.func @transform_15(%arg0: i32) -> (i32, i32) {
    %c0_i32 = arith.constant 0 : i32
    %c0_i32_0 = arith.constant 0 : i32
    %c0_i32_1 = arith.constant 0 : i32
    return %c0_i32, %c0_i32_0 : i32, i32
  }
  func.func @transform_16(%arg0: i32) -> (i32, i32) {
    %c0_i32 = arith.constant 0 : i32
    %c0_i32_0 = arith.constant 0 : i32
    %c0_i32_1 = arith.constant 0 : i32
    return %c0_i32, %c0_i32_0 : i32, i32
  }
  func.func @transform_17(%arg0: i32) -> (i32, i32) {
    %c0_i32 = arith.constant 0 : i32
    %c0_i32_0 = arith.constant 0 : i32
    %c0_i32_1 = arith.constant 0 : i32
    return %c0_i32, %c0_i32_0 : i32, i32
  }
  func.func @transform_18(%arg0: i32) -> (i32, i32) {
    %c0_i32 = arith.constant 0 : i32
    %c0_i32_0 = arith.constant 0 : i32
    %c0_i32_1 = arith.constant 0 : i32
    return %c0_i32, %c0_i32_0 : i32, i32
  }
  func.func @transform_19(%arg0: i32) -> (i32, i32) {
    %c0_i32 = arith.constant 0 : i32
    %c0_i32_0 = arith.constant 0 : i32
    %c0_i32_1 = arith.constant 0 : i32
    return %c0_i32, %c0_i32_0 : i32, i32
  }
  func.func @transform_20(%arg0: i32) -> (i32, i32) {
    %c0_i32 = arith.constant 0 : i32
    %c0_i32_0 = arith.constant 0 : i32
    %c0_i32_1 = arith.constant 0 : i32
    return %c0_i32, %c0_i32_0 : i32, i32
  }
  func.func @transform_21(%arg0: i32) -> (i32, i32) {
    %c0_i32 = arith.constant 0 : i32
    %c0_i32_0 = arith.constant 0 : i32
    %c0_i32_1 = arith.constant 0 : i32
    return %c0_i32, %c0_i32_0 : i32, i32
  }
  func.func @transform_22(%arg0: i32) -> (i32, i32) {
    %c0_i32 = arith.constant 0 : i32
    %c0_i32_0 = arith.constant 0 : i32
    %c0_i32_1 = arith.constant 0 : i32
    return %c0_i32, %c0_i32_0 : i32, i32
  }
  func.func @transform_23(%arg0: i32) -> (i32, i32) {
    %c0_i32 = arith.constant 0 : i32
    %c0_i32_0 = arith.constant 0 : i32
    %c0_i32_1 = arith.constant 0 : i32
    return %c0_i32, %c0_i32_0 : i32, i32
  }
  func.func @transform_24(%arg0: i32) -> (i32, i32, i32) {
    %c0_i32 = arith.constant 0 : i32
    %c0_i32_0 = arith.constant 0 : i32
    %c0_i32_1 = arith.constant 0 : i32
    return %arg0, %c0_i32, %c0_i32_0 : i32, i32, i32
  }
}

module attributes {stable_mosaic.version = 11 : i64} {
  func.func @_decoder_layer_kernel(%arg0: i32, %arg1: memref<1x8x32xf32, #tpu.memory_space<vmem>>, %arg2: memref<1x8x32xf32, #tpu.memory_space<vmem>>, %arg3: memref<1x8x8xf32, #tpu.memory_space<vmem>>, %arg4: memref<1x8x8xf32, #tpu.memory_space<vmem>>, %arg5: memref<32x96xf32, #tpu.memory_space<vmem>>, %arg6: memref<1x96xf32, #tpu.memory_space<vmem>>, %arg7: memref<32x32xf32, #tpu.memory_space<vmem>>, %arg8: memref<1x32xf32, #tpu.memory_space<vmem>>, %arg9: memref<1x32xf32, #tpu.memory_space<vmem>>, %arg10: memref<1x32xf32, #tpu.memory_space<vmem>>, %arg11: memref<32x32xf32, #tpu.memory_space<vmem>>, %arg12: memref<1x32xf32, #tpu.memory_space<vmem>>, %arg13: memref<32x64xf32, #tpu.memory_space<vmem>>, %arg14: memref<1x64xf32, #tpu.memory_space<vmem>>, %arg15: memref<32x32xf32, #tpu.memory_space<vmem>>, %arg16: memref<1x32xf32, #tpu.memory_space<vmem>>, %arg17: memref<1x32xf32, #tpu.memory_space<vmem>>, %arg18: memref<1x32xf32, #tpu.memory_space<vmem>>, %arg19: memref<32x64xf32, #tpu.memory_space<vmem>>, %arg20: memref<1x64xf32, #tpu.memory_space<vmem>>, %arg21: memref<64x32xf32, #tpu.memory_space<vmem>>, %arg22: memref<1x32xf32, #tpu.memory_space<vmem>>, %arg23: memref<1x32xf32, #tpu.memory_space<vmem>>, %arg24: memref<1x32xf32, #tpu.memory_space<vmem>>, %arg25: memref<1x8x32xf32, #tpu.memory_space<vmem>>) attributes {dimension_semantics = [#tpu.dimension_semantics<parallel>], iteration_bounds = array<i64: 2>, scalar_prefetch = 0 : i64, scratch_operands = 0 : i64, tpu.core_type = #tpu.core_type<tc>, window_params = [{transform_indices = @transform_0, window_bounds = array<i64: 1, 8, 32>}, {transform_indices = @transform_1, window_bounds = array<i64: 1, 8, 32>}, {transform_indices = @transform_2, window_bounds = array<i64: 1, 8, 8>}, {transform_indices = @transform_3, window_bounds = array<i64: 1, 8, 8>}, {pipeline_mode = #tpu.pipeline_mode<synchronous>, transform_indices = @transform_4, window_bounds = array<i64: 32, 96>}, {pipeline_mode = #tpu.pipeline_mode<synchronous>, transform_indices = @transform_5, window_bounds = array<i64: 1, 96>}, {pipeline_mode = #tpu.pipeline_mode<synchronous>, transform_indices = @transform_6, window_bounds = array<i64: 32, 32>}, {pipeline_mode = #tpu.pipeline_mode<synchronous>, transform_indices = @transform_7, window_bounds = array<i64: 1, 32>}, {pipeline_mode = #tpu.pipeline_mode<synchronous>, transform_indices = @transform_8, window_bounds = array<i64: 1, 32>}, {pipeline_mode = #tpu.pipeline_mode<synchronous>, transform_indices = @transform_9, window_bounds = array<i64: 1, 32>}, {pipeline_mode = #tpu.pipeline_mode<synchronous>, transform_indices = @transform_10, window_bounds = array<i64: 32, 32>}, {pipeline_mode = #tpu.pipeline_mode<synchronous>, transform_indices = @transform_11, window_bounds = array<i64: 1, 32>}, {pipeline_mode = #tpu.pipeline_mode<synchronous>, transform_indices = @transform_12, window_bounds = array<i64: 32, 64>}, {pipeline_mode = #tpu.pipeline_mode<synchronous>, transform_indices = @transform_13, window_bounds = array<i64: 1, 64>}, {pipeline_mode = #tpu.pipeline_mode<synchronous>, transform_indices = @transform_14, window_bounds = array<i64: 32, 32>}, {pipeline_mode = #tpu.pipeline_mode<synchronous>, transform_indices = @transform_15, window_bounds = array<i64: 1, 32>}, {pipeline_mode = #tpu.pipeline_mode<synchronous>, transform_indices = @transform_16, window_bounds = array<i64: 1, 32>}, {pipeline_mode = #tpu.pipeline_mode<synchronous>, transform_indices = @transform_17, window_bounds = array<i64: 1, 32>}, {pipeline_mode = #tpu.pipeline_mode<synchronous>, transform_indices = @transform_18, window_bounds = array<i64: 32, 64>}, {pipeline_mode = #tpu.pipeline_mode<synchronous>, transform_indices = @transform_19, window_bounds = array<i64: 1, 64>}, {pipeline_mode = #tpu.pipeline_mode<synchronous>, transform_indices = @transform_20, window_bounds = array<i64: 64, 32>}, {pipeline_mode = #tpu.pipeline_mode<synchronous>, transform_indices = @transform_21, window_bounds = array<i64: 1, 32>}, {pipeline_mode = #tpu.pipeline_mode<synchronous>, transform_indices = @transform_22, window_bounds = array<i64: 1, 32>}, {pipeline_mode = #tpu.pipeline_mode<synchronous>, transform_indices = @transform_23, window_bounds = array<i64: 1, 32>}, {transform_indices = @transform_24, window_bounds = array<i64: 1, 8, 32>}]} {
    %c0 = arith.constant 0 : index
    %c0_0 = arith.constant 0 : index
    %c0_1 = arith.constant 0 : index
    %0 = vector.load %arg1[%c0, %c0_0, %c0_1] : memref<1x8x32xf32, #tpu.memory_space<vmem>>, vector<1x8x32xf32>
    %1 = vector.shape_cast %0 : vector<1x8x32xf32> to vector<8x32xf32>
    %c0_2 = arith.constant 0 : index
    %c0_3 = arith.constant 0 : index
    %c0_4 = arith.constant 0 : index
    %2 = vector.load %arg2[%c0_2, %c0_3, %c0_4] : memref<1x8x32xf32, #tpu.memory_space<vmem>>, vector<1x8x32xf32>
    %3 = vector.shape_cast %2 : vector<1x8x32xf32> to vector<8x32xf32>
    %c0_5 = arith.constant 0 : index
    %c0_6 = arith.constant 0 : index
    %c0_7 = arith.constant 0 : index
    %4 = vector.load %arg3[%c0_5, %c0_6, %c0_7] : memref<1x8x8xf32, #tpu.memory_space<vmem>>, vector<1x8x8xf32>
    %5 = vector.shape_cast %4 : vector<1x8x8xf32> to vector<8x8xf32>
    %c0_8 = arith.constant 0 : index
    %c0_9 = arith.constant 0 : index
    %c0_10 = arith.constant 0 : index
    %6 = vector.load %arg4[%c0_8, %c0_9, %c0_10] : memref<1x8x8xf32, #tpu.memory_space<vmem>>, vector<1x8x8xf32>
    %7 = vector.shape_cast %6 : vector<1x8x8xf32> to vector<8x8xf32>
    %c0_11 = arith.constant 0 : index
    %c0_12 = arith.constant 0 : index
    %8 = vector.load %arg5[%c0_11, %c0_12] : memref<32x96xf32, #tpu.memory_space<vmem>>, vector<32x96xf32>
    %cst = arith.constant dense<0.000000e+00> : vector<8x96xf32>
    %9 = tpu.matmul %1, %8, %cst {dimension_numbers = #tpu.dot_dimension_numbers<[1], [0], [0], [1], [0, 0, 1, 1], [], []>} : vector<8x32xf32>, vector<32x96xf32>, vector<8x96xf32> -> vector<8x96xf32>
    %c0_13 = arith.constant 0 : index
    %c0_14 = arith.constant 0 : index
    %10 = vector.load %arg6[%c0_13, %c0_14] : memref<1x96xf32, #tpu.memory_space<vmem>>, vector<1x96xf32>
    %11 = vector.broadcast %10 : vector<1x96xf32> to vector<8x96xf32>
    %12 = arith.addf %9, %11 : vector<8x96xf32>
    %13 = vector.extract_strided_slice %12 {offsets = [0, 0], sizes = [8, 32], strides = [1, 1]} : vector<8x96xf32> to vector<8x32xf32>
    %cst_15 = arith.constant 0.353553385 : f32
    %14 = vector.broadcast %cst_15 : f32 to vector<8x32xf32>
    %15 = arith.mulf %13, %14 : vector<8x32xf32>
    %16 = vector.extract_strided_slice %12 {offsets = [0, 32], sizes = [8, 32], strides = [1, 1]} : vector<8x96xf32> to vector<8x32xf32>
    %17 = vector.extract_strided_slice %12 {offsets = [0, 64], sizes = [8, 32], strides = [1, 1]} : vector<8x96xf32> to vector<8x32xf32>
    %c0_16 = arith.constant 0 : index
    %c0_17 = arith.constant 0 : index
    %18 = vector.load %arg7[%c0_16, %c0_17] : memref<32x32xf32, #tpu.memory_space<vmem>>, vector<32x32xf32>
    %c0_18 = arith.constant 0 : index
    %c0_19 = arith.constant 0 : index
    %19 = vector.load %arg8[%c0_18, %c0_19] : memref<1x32xf32, #tpu.memory_space<vmem>>, vector<1x32xf32>
    %cst_20 = arith.constant 0.000000e+00 : f32
    %20 = vector.broadcast %cst_20 : f32 to vector<8x32xf32>
    %21 = vector.broadcast %19 : vector<1x32xf32> to vector<8x32xf32>
    %22 = arith.addf %20, %21 : vector<8x32xf32>
    %23 = vector.extract_strided_slice %15 {offsets = [0, 0], sizes = [8, 8], strides = [1, 1]} : vector<8x32xf32> to vector<8x8xf32>
    %24 = vector.extract_strided_slice %16 {offsets = [0, 0], sizes = [8, 8], strides = [1, 1]} : vector<8x32xf32> to vector<8x8xf32>
    %cst_21 = arith.constant dense<0.000000e+00> : vector<8x8xf32>
    %25 = tpu.matmul %23, %24, %cst_21 {dimension_numbers = #tpu.dot_dimension_numbers<[1], [1], [0], [0], [0, 0, 1, 0], [], []>} : vector<8x8xf32>, vector<8x8xf32>, vector<8x8xf32> -> vector<8x8xf32>
    %cst_22 = arith.constant 0.000000e+00 : f32
    %26 = vector.broadcast %cst_22 : f32 to vector<8x8xf32>
    %27 = arith.cmpf oeq, %5, %26 : vector<8x8xf32>
    %cst_23 = arith.constant -1.000000e+09 : f32
    %28 = vector.broadcast %cst_23 : f32 to vector<8x8xf32>
    %29 = arith.select %27, %28, %25 : vector<8x8xi1>, vector<8x8xf32>
    %cst_24 = arith.constant dense<0xFF800000> : vector<8xf32>
    %30 = vector.multi_reduction <maximumf>, %29, %cst_24 [1] : vector<8x8xf32> to vector<8xf32>
    %31 = vector.shape_cast %30 : vector<8xf32> to vector<8x1xf32>
    %32 = vector.broadcast %31 : vector<8x1xf32> to vector<8x8xf32>
    %33 = arith.subf %29, %32 : vector<8x8xf32>
    %34 = math.exp %33 : vector<8x8xf32>
    %cst_25 = arith.constant dense<0.000000e+00> : vector<8xf32>
    %35 = vector.multi_reduction <add>, %34, %cst_25 [1] : vector<8x8xf32> to vector<8xf32>
    %36 = vector.shape_cast %35 : vector<8xf32> to vector<8x1xf32>
    %37 = tpu.reciprocal %36 {approx = true} : vector<8x1xf32> -> vector<8x1xf32>
    %38 = vector.broadcast %37 : vector<8x1xf32> to vector<8x8xf32>
    %39 = arith.mulf %34, %38 : vector<8x8xf32>
    %40 = vector.extract_strided_slice %17 {offsets = [0, 0], sizes = [8, 8], strides = [1, 1]} : vector<8x32xf32> to vector<8x8xf32>
    %cst_26 = arith.constant dense<0.000000e+00> : vector<8x8xf32>
    %41 = tpu.matmul %39, %40, %cst_26 {dimension_numbers = #tpu.dot_dimension_numbers<[1], [0], [0], [1], [0, 0, 1, 1], [], []>} : vector<8x8xf32>, vector<8x8xf32>, vector<8x8xf32> -> vector<8x8xf32>
    %42 = vector.extract_strided_slice %18 {offsets = [0, 0], sizes = [8, 32], strides = [1, 1]} : vector<32x32xf32> to vector<8x32xf32>
    %cst_27 = arith.constant dense<0.000000e+00> : vector<8x32xf32>
    %43 = tpu.matmul %41, %42, %cst_27 {dimension_numbers = #tpu.dot_dimension_numbers<[1], [0], [0], [1], [0, 0, 1, 1], [], []>} : vector<8x8xf32>, vector<8x32xf32>, vector<8x32xf32> -> vector<8x32xf32>
    %44 = arith.addf %22, %43 : vector<8x32xf32>
    %45 = vector.extract_strided_slice %15 {offsets = [0, 8], sizes = [8, 8], strides = [1, 1]} : vector<8x32xf32> to vector<8x8xf32>
    %46 = vector.extract_strided_slice %16 {offsets = [0, 8], sizes = [8, 8], strides = [1, 1]} : vector<8x32xf32> to vector<8x8xf32>
    %cst_28 = arith.constant dense<0.000000e+00> : vector<8x8xf32>
    %47 = tpu.matmul %45, %46, %cst_28 {dimension_numbers = #tpu.dot_dimension_numbers<[1], [1], [0], [0], [0, 0, 1, 0], [], []>} : vector<8x8xf32>, vector<8x8xf32>, vector<8x8xf32> -> vector<8x8xf32>
    %cst_29 = arith.constant 0.000000e+00 : f32
    %48 = vector.broadcast %cst_29 : f32 to vector<8x8xf32>
    %49 = arith.cmpf oeq, %5, %48 : vector<8x8xf32>
    %cst_30 = arith.constant -1.000000e+09 : f32
    %50 = vector.broadcast %cst_30 : f32 to vector<8x8xf32>
    %51 = arith.select %49, %50, %47 : vector<8x8xi1>, vector<8x8xf32>
    %cst_31 = arith.constant dense<0xFF800000> : vector<8xf32>
    %52 = vector.multi_reduction <maximumf>, %51, %cst_31 [1] : vector<8x8xf32> to vector<8xf32>
    %53 = vector.shape_cast %52 : vector<8xf32> to vector<8x1xf32>
    %54 = vector.broadcast %53 : vector<8x1xf32> to vector<8x8xf32>
    %55 = arith.subf %51, %54 : vector<8x8xf32>
    %56 = math.exp %55 : vector<8x8xf32>
    %cst_32 = arith.constant dense<0.000000e+00> : vector<8xf32>
    %57 = vector.multi_reduction <add>, %56, %cst_32 [1] : vector<8x8xf32> to vector<8xf32>
    %58 = vector.shape_cast %57 : vector<8xf32> to vector<8x1xf32>
    %59 = tpu.reciprocal %58 {approx = true} : vector<8x1xf32> -> vector<8x1xf32>
    %60 = vector.broadcast %59 : vector<8x1xf32> to vector<8x8xf32>
    %61 = arith.mulf %56, %60 : vector<8x8xf32>
    %62 = vector.extract_strided_slice %17 {offsets = [0, 8], sizes = [8, 8], strides = [1, 1]} : vector<8x32xf32> to vector<8x8xf32>
    %cst_33 = arith.constant dense<0.000000e+00> : vector<8x8xf32>
    %63 = tpu.matmul %61, %62, %cst_33 {dimension_numbers = #tpu.dot_dimension_numbers<[1], [0], [0], [1], [0, 0, 1, 1], [], []>} : vector<8x8xf32>, vector<8x8xf32>, vector<8x8xf32> -> vector<8x8xf32>
    %64 = vector.extract_strided_slice %18 {offsets = [8, 0], sizes = [8, 32], strides = [1, 1]} : vector<32x32xf32> to vector<8x32xf32>
    %cst_34 = arith.constant dense<0.000000e+00> : vector<8x32xf32>
    %65 = tpu.matmul %63, %64, %cst_34 {dimension_numbers = #tpu.dot_dimension_numbers<[1], [0], [0], [1], [0, 0, 1, 1], [], []>} : vector<8x8xf32>, vector<8x32xf32>, vector<8x32xf32> -> vector<8x32xf32>
    %66 = arith.addf %44, %65 : vector<8x32xf32>
    %67 = vector.extract_strided_slice %15 {offsets = [0, 16], sizes = [8, 8], strides = [1, 1]} : vector<8x32xf32> to vector<8x8xf32>
    %68 = vector.extract_strided_slice %16 {offsets = [0, 16], sizes = [8, 8], strides = [1, 1]} : vector<8x32xf32> to vector<8x8xf32>
    %cst_35 = arith.constant dense<0.000000e+00> : vector<8x8xf32>
    %69 = tpu.matmul %67, %68, %cst_35 {dimension_numbers = #tpu.dot_dimension_numbers<[1], [1], [0], [0], [0, 0, 1, 0], [], []>} : vector<8x8xf32>, vector<8x8xf32>, vector<8x8xf32> -> vector<8x8xf32>
    %cst_36 = arith.constant 0.000000e+00 : f32
    %70 = vector.broadcast %cst_36 : f32 to vector<8x8xf32>
    %71 = arith.cmpf oeq, %5, %70 : vector<8x8xf32>
    %cst_37 = arith.constant -1.000000e+09 : f32
    %72 = vector.broadcast %cst_37 : f32 to vector<8x8xf32>
    %73 = arith.select %71, %72, %69 : vector<8x8xi1>, vector<8x8xf32>
    %cst_38 = arith.constant dense<0xFF800000> : vector<8xf32>
    %74 = vector.multi_reduction <maximumf>, %73, %cst_38 [1] : vector<8x8xf32> to vector<8xf32>
    %75 = vector.shape_cast %74 : vector<8xf32> to vector<8x1xf32>
    %76 = vector.broadcast %75 : vector<8x1xf32> to vector<8x8xf32>
    %77 = arith.subf %73, %76 : vector<8x8xf32>
    %78 = math.exp %77 : vector<8x8xf32>
    %cst_39 = arith.constant dense<0.000000e+00> : vector<8xf32>
    %79 = vector.multi_reduction <add>, %78, %cst_39 [1] : vector<8x8xf32> to vector<8xf32>
    %80 = vector.shape_cast %79 : vector<8xf32> to vector<8x1xf32>
    %81 = tpu.reciprocal %80 {approx = true} : vector<8x1xf32> -> vector<8x1xf32>
    %82 = vector.broadcast %81 : vector<8x1xf32> to vector<8x8xf32>
    %83 = arith.mulf %78, %82 : vector<8x8xf32>
    %84 = vector.extract_strided_slice %17 {offsets = [0, 16], sizes = [8, 8], strides = [1, 1]} : vector<8x32xf32> to vector<8x8xf32>
    %cst_40 = arith.constant dense<0.000000e+00> : vector<8x8xf32>
    %85 = tpu.matmul %83, %84, %cst_40 {dimension_numbers = #tpu.dot_dimension_numbers<[1], [0], [0], [1], [0, 0, 1, 1], [], []>} : vector<8x8xf32>, vector<8x8xf32>, vector<8x8xf32> -> vector<8x8xf32>
    %86 = vector.extract_strided_slice %18 {offsets = [16, 0], sizes = [8, 32], strides = [1, 1]} : vector<32x32xf32> to vector<8x32xf32>
    %cst_41 = arith.constant dense<0.000000e+00> : vector<8x32xf32>
    %87 = tpu.matmul %85, %86, %cst_41 {dimension_numbers = #tpu.dot_dimension_numbers<[1], [0], [0], [1], [0, 0, 1, 1], [], []>} : vector<8x8xf32>, vector<8x32xf32>, vector<8x32xf32> -> vector<8x32xf32>
    %88 = arith.addf %66, %87 : vector<8x32xf32>
    %89 = vector.extract_strided_slice %15 {offsets = [0, 24], sizes = [8, 8], strides = [1, 1]} : vector<8x32xf32> to vector<8x8xf32>
    %90 = vector.extract_strided_slice %16 {offsets = [0, 24], sizes = [8, 8], strides = [1, 1]} : vector<8x32xf32> to vector<8x8xf32>
    %cst_42 = arith.constant dense<0.000000e+00> : vector<8x8xf32>
    %91 = tpu.matmul %89, %90, %cst_42 {dimension_numbers = #tpu.dot_dimension_numbers<[1], [1], [0], [0], [0, 0, 1, 0], [], []>} : vector<8x8xf32>, vector<8x8xf32>, vector<8x8xf32> -> vector<8x8xf32>
    %cst_43 = arith.constant 0.000000e+00 : f32
    %92 = vector.broadcast %cst_43 : f32 to vector<8x8xf32>
    %93 = arith.cmpf oeq, %5, %92 : vector<8x8xf32>
    %cst_44 = arith.constant -1.000000e+09 : f32
    %94 = vector.broadcast %cst_44 : f32 to vector<8x8xf32>
    %95 = arith.select %93, %94, %91 : vector<8x8xi1>, vector<8x8xf32>
    %cst_45 = arith.constant dense<0xFF800000> : vector<8xf32>
    %96 = vector.multi_reduction <maximumf>, %95, %cst_45 [1] : vector<8x8xf32> to vector<8xf32>
    %97 = vector.shape_cast %96 : vector<8xf32> to vector<8x1xf32>
    %98 = vector.broadcast %97 : vector<8x1xf32> to vector<8x8xf32>
    %99 = arith.subf %95, %98 : vector<8x8xf32>
    %100 = math.exp %99 : vector<8x8xf32>
    %cst_46 = arith.constant dense<0.000000e+00> : vector<8xf32>
    %101 = vector.multi_reduction <add>, %100, %cst_46 [1] : vector<8x8xf32> to vector<8xf32>
    %102 = vector.shape_cast %101 : vector<8xf32> to vector<8x1xf32>
    %103 = tpu.reciprocal %102 {approx = true} : vector<8x1xf32> -> vector<8x1xf32>
    %104 = vector.broadcast %103 : vector<8x1xf32> to vector<8x8xf32>
    %105 = arith.mulf %100, %104 : vector<8x8xf32>
    %106 = vector.extract_strided_slice %17 {offsets = [0, 24], sizes = [8, 8], strides = [1, 1]} : vector<8x32xf32> to vector<8x8xf32>
    %cst_47 = arith.constant dense<0.000000e+00> : vector<8x8xf32>
    %107 = tpu.matmul %105, %106, %cst_47 {dimension_numbers = #tpu.dot_dimension_numbers<[1], [0], [0], [1], [0, 0, 1, 1], [], []>} : vector<8x8xf32>, vector<8x8xf32>, vector<8x8xf32> -> vector<8x8xf32>
    %108 = vector.extract_strided_slice %18 {offsets = [24, 0], sizes = [8, 32], strides = [1, 1]} : vector<32x32xf32> to vector<8x32xf32>
    %cst_48 = arith.constant dense<0.000000e+00> : vector<8x32xf32>
    %109 = tpu.matmul %107, %108, %cst_48 {dimension_numbers = #tpu.dot_dimension_numbers<[1], [0], [0], [1], [0, 0, 1, 1], [], []>} : vector<8x8xf32>, vector<8x32xf32>, vector<8x32xf32> -> vector<8x32xf32>
    %110 = arith.addf %88, %109 : vector<8x32xf32>
    %111 = arith.addf %1, %110 : vector<8x32xf32>
    %c0_49 = arith.constant 0 : index
    %c0_50 = arith.constant 0 : index
    %112 = vector.load %arg9[%c0_49, %c0_50] : memref<1x32xf32, #tpu.memory_space<vmem>>, vector<1x32xf32>
    %c0_51 = arith.constant 0 : index
    %c0_52 = arith.constant 0 : index
    %113 = vector.load %arg10[%c0_51, %c0_52] : memref<1x32xf32, #tpu.memory_space<vmem>>, vector<1x32xf32>
    %cst_53 = arith.constant dense<0.000000e+00> : vector<8xf32>
    %114 = vector.multi_reduction <add>, %111, %cst_53 [1] : vector<8x32xf32> to vector<8xf32>
    %115 = vector.shape_cast %114 : vector<8xf32> to vector<8x1xf32>
    %cst_54 = arith.constant 3.200000e+01 : f32
    %116 = vector.broadcast %cst_54 : f32 to vector<8x1xf32>
    %117 = arith.divf %115, %116 : vector<8x1xf32>
    %118 = vector.broadcast %117 : vector<8x1xf32> to vector<8x32xf32>
    %119 = arith.subf %111, %118 : vector<8x32xf32>
    %120 = arith.mulf %119, %119 : vector<8x32xf32>
    %cst_55 = arith.constant dense<0.000000e+00> : vector<8xf32>
    %121 = vector.multi_reduction <add>, %120, %cst_55 [1] : vector<8x32xf32> to vector<8xf32>
    %122 = vector.shape_cast %121 : vector<8xf32> to vector<8x1xf32>
    %cst_56 = arith.constant 3.100000e+01 : f32
    %123 = vector.broadcast %cst_56 : f32 to vector<8x1xf32>
    %124 = arith.divf %122, %123 : vector<8x1xf32>
    %125 = math.sqrt %124 : vector<8x1xf32>
    %cst_57 = arith.constant 9.99999997E-7 : f32
    %126 = vector.broadcast %cst_57 : f32 to vector<8x1xf32>
    %127 = arith.addf %125, %126 : vector<8x1xf32>
    %128 = tpu.reciprocal %127 : vector<8x1xf32> -> vector<8x1xf32>
    %129 = vector.broadcast %117 : vector<8x1xf32> to vector<8x32xf32>
    %130 = arith.subf %111, %129 : vector<8x32xf32>
    %131 = vector.broadcast %112 : vector<1x32xf32> to vector<8x32xf32>
    %132 = arith.mulf %131, %130 : vector<8x32xf32>
    %133 = vector.broadcast %128 : vector<8x1xf32> to vector<8x32xf32>
    %134 = arith.mulf %132, %133 : vector<8x32xf32>
    %135 = vector.broadcast %113 : vector<1x32xf32> to vector<8x32xf32>
    %136 = arith.addf %134, %135 : vector<8x32xf32>
    %c0_58 = arith.constant 0 : index
    %c0_59 = arith.constant 0 : index
    %137 = vector.load %arg11[%c0_58, %c0_59] : memref<32x32xf32, #tpu.memory_space<vmem>>, vector<32x32xf32>
    %cst_60 = arith.constant dense<0.000000e+00> : vector<8x32xf32>
    %138 = tpu.matmul %136, %137, %cst_60 {dimension_numbers = #tpu.dot_dimension_numbers<[1], [0], [0], [1], [0, 0, 1, 1], [], []>} : vector<8x32xf32>, vector<32x32xf32>, vector<8x32xf32> -> vector<8x32xf32>
    %c0_61 = arith.constant 0 : index
    %c0_62 = arith.constant 0 : index
    %139 = vector.load %arg12[%c0_61, %c0_62] : memref<1x32xf32, #tpu.memory_space<vmem>>, vector<1x32xf32>
    %140 = vector.broadcast %139 : vector<1x32xf32> to vector<8x32xf32>
    %141 = arith.addf %138, %140 : vector<8x32xf32>
    %cst_63 = arith.constant 0.353553385 : f32
    %142 = vector.broadcast %cst_63 : f32 to vector<8x32xf32>
    %143 = arith.mulf %141, %142 : vector<8x32xf32>
    %c0_64 = arith.constant 0 : index
    %c0_65 = arith.constant 0 : index
    %144 = vector.load %arg13[%c0_64, %c0_65] : memref<32x64xf32, #tpu.memory_space<vmem>>, vector<32x64xf32>
    %cst_66 = arith.constant dense<0.000000e+00> : vector<8x64xf32>
    %145 = tpu.matmul %3, %144, %cst_66 {dimension_numbers = #tpu.dot_dimension_numbers<[1], [0], [0], [1], [0, 0, 1, 1], [], []>} : vector<8x32xf32>, vector<32x64xf32>, vector<8x64xf32> -> vector<8x64xf32>
    %c0_67 = arith.constant 0 : index
    %c0_68 = arith.constant 0 : index
    %146 = vector.load %arg14[%c0_67, %c0_68] : memref<1x64xf32, #tpu.memory_space<vmem>>, vector<1x64xf32>
    %147 = vector.broadcast %146 : vector<1x64xf32> to vector<8x64xf32>
    %148 = arith.addf %145, %147 : vector<8x64xf32>
    %149 = vector.extract_strided_slice %148 {offsets = [0, 0], sizes = [8, 32], strides = [1, 1]} : vector<8x64xf32> to vector<8x32xf32>
    %150 = vector.extract_strided_slice %148 {offsets = [0, 32], sizes = [8, 32], strides = [1, 1]} : vector<8x64xf32> to vector<8x32xf32>
    %c0_69 = arith.constant 0 : index
    %c0_70 = arith.constant 0 : index
    %151 = vector.load %arg15[%c0_69, %c0_70] : memref<32x32xf32, #tpu.memory_space<vmem>>, vector<32x32xf32>
    %c0_71 = arith.constant 0 : index
    %c0_72 = arith.constant 0 : index
    %152 = vector.load %arg16[%c0_71, %c0_72] : memref<1x32xf32, #tpu.memory_space<vmem>>, vector<1x32xf32>
    %cst_73 = arith.constant 0.000000e+00 : f32
    %153 = vector.broadcast %cst_73 : f32 to vector<8x32xf32>
    %154 = vector.broadcast %152 : vector<1x32xf32> to vector<8x32xf32>
    %155 = arith.addf %153, %154 : vector<8x32xf32>
    %156 = vector.extract_strided_slice %143 {offsets = [0, 0], sizes = [8, 8], strides = [1, 1]} : vector<8x32xf32> to vector<8x8xf32>
    %157 = vector.extract_strided_slice %149 {offsets = [0, 0], sizes = [8, 8], strides = [1, 1]} : vector<8x32xf32> to vector<8x8xf32>
    %cst_74 = arith.constant dense<0.000000e+00> : vector<8x8xf32>
    %158 = tpu.matmul %156, %157, %cst_74 {dimension_numbers = #tpu.dot_dimension_numbers<[1], [1], [0], [0], [0, 0, 1, 0], [], []>} : vector<8x8xf32>, vector<8x8xf32>, vector<8x8xf32> -> vector<8x8xf32>
    %cst_75 = arith.constant 0.000000e+00 : f32
    %159 = vector.broadcast %cst_75 : f32 to vector<8x8xf32>
    %160 = arith.cmpf oeq, %7, %159 : vector<8x8xf32>
    %cst_76 = arith.constant -1.000000e+09 : f32
    %161 = vector.broadcast %cst_76 : f32 to vector<8x8xf32>
    %162 = arith.select %160, %161, %158 : vector<8x8xi1>, vector<8x8xf32>
    %cst_77 = arith.constant dense<0xFF800000> : vector<8xf32>
    %163 = vector.multi_reduction <maximumf>, %162, %cst_77 [1] : vector<8x8xf32> to vector<8xf32>
    %164 = vector.shape_cast %163 : vector<8xf32> to vector<8x1xf32>
    %165 = vector.broadcast %164 : vector<8x1xf32> to vector<8x8xf32>
    %166 = arith.subf %162, %165 : vector<8x8xf32>
    %167 = math.exp %166 : vector<8x8xf32>
    %cst_78 = arith.constant dense<0.000000e+00> : vector<8xf32>
    %168 = vector.multi_reduction <add>, %167, %cst_78 [1] : vector<8x8xf32> to vector<8xf32>
    %169 = vector.shape_cast %168 : vector<8xf32> to vector<8x1xf32>
    %170 = tpu.reciprocal %169 {approx = true} : vector<8x1xf32> -> vector<8x1xf32>
    %171 = vector.broadcast %170 : vector<8x1xf32> to vector<8x8xf32>
    %172 = arith.mulf %167, %171 : vector<8x8xf32>
    %173 = vector.extract_strided_slice %150 {offsets = [0, 0], sizes = [8, 8], strides = [1, 1]} : vector<8x32xf32> to vector<8x8xf32>
    %cst_79 = arith.constant dense<0.000000e+00> : vector<8x8xf32>
    %174 = tpu.matmul %172, %173, %cst_79 {dimension_numbers = #tpu.dot_dimension_numbers<[1], [0], [0], [1], [0, 0, 1, 1], [], []>} : vector<8x8xf32>, vector<8x8xf32>, vector<8x8xf32> -> vector<8x8xf32>
    %175 = vector.extract_strided_slice %151 {offsets = [0, 0], sizes = [8, 32], strides = [1, 1]} : vector<32x32xf32> to vector<8x32xf32>
    %cst_80 = arith.constant dense<0.000000e+00> : vector<8x32xf32>
    %176 = tpu.matmul %174, %175, %cst_80 {dimension_numbers = #tpu.dot_dimension_numbers<[1], [0], [0], [1], [0, 0, 1, 1], [], []>} : vector<8x8xf32>, vector<8x32xf32>, vector<8x32xf32> -> vector<8x32xf32>
    %177 = arith.addf %155, %176 : vector<8x32xf32>
    %178 = vector.extract_strided_slice %143 {offsets = [0, 8], sizes = [8, 8], strides = [1, 1]} : vector<8x32xf32> to vector<8x8xf32>
    %179 = vector.extract_strided_slice %149 {offsets = [0, 8], sizes = [8, 8], strides = [1, 1]} : vector<8x32xf32> to vector<8x8xf32>
    %cst_81 = arith.constant dense<0.000000e+00> : vector<8x8xf32>
    %180 = tpu.matmul %178, %179, %cst_81 {dimension_numbers = #tpu.dot_dimension_numbers<[1], [1], [0], [0], [0, 0, 1, 0], [], []>} : vector<8x8xf32>, vector<8x8xf32>, vector<8x8xf32> -> vector<8x8xf32>
    %cst_82 = arith.constant 0.000000e+00 : f32
    %181 = vector.broadcast %cst_82 : f32 to vector<8x8xf32>
    %182 = arith.cmpf oeq, %7, %181 : vector<8x8xf32>
    %cst_83 = arith.constant -1.000000e+09 : f32
    %183 = vector.broadcast %cst_83 : f32 to vector<8x8xf32>
    %184 = arith.select %182, %183, %180 : vector<8x8xi1>, vector<8x8xf32>
    %cst_84 = arith.constant dense<0xFF800000> : vector<8xf32>
    %185 = vector.multi_reduction <maximumf>, %184, %cst_84 [1] : vector<8x8xf32> to vector<8xf32>
    %186 = vector.shape_cast %185 : vector<8xf32> to vector<8x1xf32>
    %187 = vector.broadcast %186 : vector<8x1xf32> to vector<8x8xf32>
    %188 = arith.subf %184, %187 : vector<8x8xf32>
    %189 = math.exp %188 : vector<8x8xf32>
    %cst_85 = arith.constant dense<0.000000e+00> : vector<8xf32>
    %190 = vector.multi_reduction <add>, %189, %cst_85 [1] : vector<8x8xf32> to vector<8xf32>
    %191 = vector.shape_cast %190 : vector<8xf32> to vector<8x1xf32>
    %192 = tpu.reciprocal %191 {approx = true} : vector<8x1xf32> -> vector<8x1xf32>
    %193 = vector.broadcast %192 : vector<8x1xf32> to vector<8x8xf32>
    %194 = arith.mulf %189, %193 : vector<8x8xf32>
    %195 = vector.extract_strided_slice %150 {offsets = [0, 8], sizes = [8, 8], strides = [1, 1]} : vector<8x32xf32> to vector<8x8xf32>
    %cst_86 = arith.constant dense<0.000000e+00> : vector<8x8xf32>
    %196 = tpu.matmul %194, %195, %cst_86 {dimension_numbers = #tpu.dot_dimension_numbers<[1], [0], [0], [1], [0, 0, 1, 1], [], []>} : vector<8x8xf32>, vector<8x8xf32>, vector<8x8xf32> -> vector<8x8xf32>
    %197 = vector.extract_strided_slice %151 {offsets = [8, 0], sizes = [8, 32], strides = [1, 1]} : vector<32x32xf32> to vector<8x32xf32>
    %cst_87 = arith.constant dense<0.000000e+00> : vector<8x32xf32>
    %198 = tpu.matmul %196, %197, %cst_87 {dimension_numbers = #tpu.dot_dimension_numbers<[1], [0], [0], [1], [0, 0, 1, 1], [], []>} : vector<8x8xf32>, vector<8x32xf32>, vector<8x32xf32> -> vector<8x32xf32>
    %199 = arith.addf %177, %198 : vector<8x32xf32>
    %200 = vector.extract_strided_slice %143 {offsets = [0, 16], sizes = [8, 8], strides = [1, 1]} : vector<8x32xf32> to vector<8x8xf32>
    %201 = vector.extract_strided_slice %149 {offsets = [0, 16], sizes = [8, 8], strides = [1, 1]} : vector<8x32xf32> to vector<8x8xf32>
    %cst_88 = arith.constant dense<0.000000e+00> : vector<8x8xf32>
    %202 = tpu.matmul %200, %201, %cst_88 {dimension_numbers = #tpu.dot_dimension_numbers<[1], [1], [0], [0], [0, 0, 1, 0], [], []>} : vector<8x8xf32>, vector<8x8xf32>, vector<8x8xf32> -> vector<8x8xf32>
    %cst_89 = arith.constant 0.000000e+00 : f32
    %203 = vector.broadcast %cst_89 : f32 to vector<8x8xf32>
    %204 = arith.cmpf oeq, %7, %203 : vector<8x8xf32>
    %cst_90 = arith.constant -1.000000e+09 : f32
    %205 = vector.broadcast %cst_90 : f32 to vector<8x8xf32>
    %206 = arith.select %204, %205, %202 : vector<8x8xi1>, vector<8x8xf32>
    %cst_91 = arith.constant dense<0xFF800000> : vector<8xf32>
    %207 = vector.multi_reduction <maximumf>, %206, %cst_91 [1] : vector<8x8xf32> to vector<8xf32>
    %208 = vector.shape_cast %207 : vector<8xf32> to vector<8x1xf32>
    %209 = vector.broadcast %208 : vector<8x1xf32> to vector<8x8xf32>
    %210 = arith.subf %206, %209 : vector<8x8xf32>
    %211 = math.exp %210 : vector<8x8xf32>
    %cst_92 = arith.constant dense<0.000000e+00> : vector<8xf32>
    %212 = vector.multi_reduction <add>, %211, %cst_92 [1] : vector<8x8xf32> to vector<8xf32>
    %213 = vector.shape_cast %212 : vector<8xf32> to vector<8x1xf32>
    %214 = tpu.reciprocal %213 {approx = true} : vector<8x1xf32> -> vector<8x1xf32>
    %215 = vector.broadcast %214 : vector<8x1xf32> to vector<8x8xf32>
    %216 = arith.mulf %211, %215 : vector<8x8xf32>
    %217 = vector.extract_strided_slice %150 {offsets = [0, 16], sizes = [8, 8], strides = [1, 1]} : vector<8x32xf32> to vector<8x8xf32>
    %cst_93 = arith.constant dense<0.000000e+00> : vector<8x8xf32>
    %218 = tpu.matmul %216, %217, %cst_93 {dimension_numbers = #tpu.dot_dimension_numbers<[1], [0], [0], [1], [0, 0, 1, 1], [], []>} : vector<8x8xf32>, vector<8x8xf32>, vector<8x8xf32> -> vector<8x8xf32>
    %219 = vector.extract_strided_slice %151 {offsets = [16, 0], sizes = [8, 32], strides = [1, 1]} : vector<32x32xf32> to vector<8x32xf32>
    %cst_94 = arith.constant dense<0.000000e+00> : vector<8x32xf32>
    %220 = tpu.matmul %218, %219, %cst_94 {dimension_numbers = #tpu.dot_dimension_numbers<[1], [0], [0], [1], [0, 0, 1, 1], [], []>} : vector<8x8xf32>, vector<8x32xf32>, vector<8x32xf32> -> vector<8x32xf32>
    %221 = arith.addf %199, %220 : vector<8x32xf32>
    %222 = vector.extract_strided_slice %143 {offsets = [0, 24], sizes = [8, 8], strides = [1, 1]} : vector<8x32xf32> to vector<8x8xf32>
    %223 = vector.extract_strided_slice %149 {offsets = [0, 24], sizes = [8, 8], strides = [1, 1]} : vector<8x32xf32> to vector<8x8xf32>
    %cst_95 = arith.constant dense<0.000000e+00> : vector<8x8xf32>
    %224 = tpu.matmul %222, %223, %cst_95 {dimension_numbers = #tpu.dot_dimension_numbers<[1], [1], [0], [0], [0, 0, 1, 0], [], []>} : vector<8x8xf32>, vector<8x8xf32>, vector<8x8xf32> -> vector<8x8xf32>
    %cst_96 = arith.constant 0.000000e+00 : f32
    %225 = vector.broadcast %cst_96 : f32 to vector<8x8xf32>
    %226 = arith.cmpf oeq, %7, %225 : vector<8x8xf32>
    %cst_97 = arith.constant -1.000000e+09 : f32
    %227 = vector.broadcast %cst_97 : f32 to vector<8x8xf32>
    %228 = arith.select %226, %227, %224 : vector<8x8xi1>, vector<8x8xf32>
    %cst_98 = arith.constant dense<0xFF800000> : vector<8xf32>
    %229 = vector.multi_reduction <maximumf>, %228, %cst_98 [1] : vector<8x8xf32> to vector<8xf32>
    %230 = vector.shape_cast %229 : vector<8xf32> to vector<8x1xf32>
    %231 = vector.broadcast %230 : vector<8x1xf32> to vector<8x8xf32>
    %232 = arith.subf %228, %231 : vector<8x8xf32>
    %233 = math.exp %232 : vector<8x8xf32>
    %cst_99 = arith.constant dense<0.000000e+00> : vector<8xf32>
    %234 = vector.multi_reduction <add>, %233, %cst_99 [1] : vector<8x8xf32> to vector<8xf32>
    %235 = vector.shape_cast %234 : vector<8xf32> to vector<8x1xf32>
    %236 = tpu.reciprocal %235 {approx = true} : vector<8x1xf32> -> vector<8x1xf32>
    %237 = vector.broadcast %236 : vector<8x1xf32> to vector<8x8xf32>
    %238 = arith.mulf %233, %237 : vector<8x8xf32>
    %239 = vector.extract_strided_slice %150 {offsets = [0, 24], sizes = [8, 8], strides = [1, 1]} : vector<8x32xf32> to vector<8x8xf32>
    %cst_100 = arith.constant dense<0.000000e+00> : vector<8x8xf32>
    %240 = tpu.matmul %238, %239, %cst_100 {dimension_numbers = #tpu.dot_dimension_numbers<[1], [0], [0], [1], [0, 0, 1, 1], [], []>} : vector<8x8xf32>, vector<8x8xf32>, vector<8x8xf32> -> vector<8x8xf32>
    %241 = vector.extract_strided_slice %151 {offsets = [24, 0], sizes = [8, 32], strides = [1, 1]} : vector<32x32xf32> to vector<8x32xf32>
    %cst_101 = arith.constant dense<0.000000e+00> : vector<8x32xf32>
    %242 = tpu.matmul %240, %241, %cst_101 {dimension_numbers = #tpu.dot_dimension_numbers<[1], [0], [0], [1], [0, 0, 1, 1], [], []>} : vector<8x8xf32>, vector<8x32xf32>, vector<8x32xf32> -> vector<8x32xf32>
    %243 = arith.addf %221, %242 : vector<8x32xf32>
    %244 = arith.addf %136, %243 : vector<8x32xf32>
    %c0_102 = arith.constant 0 : index
    %c0_103 = arith.constant 0 : index
    %245 = vector.load %arg17[%c0_102, %c0_103] : memref<1x32xf32, #tpu.memory_space<vmem>>, vector<1x32xf32>
    %c0_104 = arith.constant 0 : index
    %c0_105 = arith.constant 0 : index
    %246 = vector.load %arg18[%c0_104, %c0_105] : memref<1x32xf32, #tpu.memory_space<vmem>>, vector<1x32xf32>
    %cst_106 = arith.constant dense<0.000000e+00> : vector<8xf32>
    %247 = vector.multi_reduction <add>, %244, %cst_106 [1] : vector<8x32xf32> to vector<8xf32>
    %248 = vector.shape_cast %247 : vector<8xf32> to vector<8x1xf32>
    %cst_107 = arith.constant 3.200000e+01 : f32
    %249 = vector.broadcast %cst_107 : f32 to vector<8x1xf32>
    %250 = arith.divf %248, %249 : vector<8x1xf32>
    %251 = vector.broadcast %250 : vector<8x1xf32> to vector<8x32xf32>
    %252 = arith.subf %244, %251 : vector<8x32xf32>
    %253 = arith.mulf %252, %252 : vector<8x32xf32>
    %cst_108 = arith.constant dense<0.000000e+00> : vector<8xf32>
    %254 = vector.multi_reduction <add>, %253, %cst_108 [1] : vector<8x32xf32> to vector<8xf32>
    %255 = vector.shape_cast %254 : vector<8xf32> to vector<8x1xf32>
    %cst_109 = arith.constant 3.100000e+01 : f32
    %256 = vector.broadcast %cst_109 : f32 to vector<8x1xf32>
    %257 = arith.divf %255, %256 : vector<8x1xf32>
    %258 = math.sqrt %257 : vector<8x1xf32>
    %cst_110 = arith.constant 9.99999997E-7 : f32
    %259 = vector.broadcast %cst_110 : f32 to vector<8x1xf32>
    %260 = arith.addf %258, %259 : vector<8x1xf32>
    %261 = tpu.reciprocal %260 : vector<8x1xf32> -> vector<8x1xf32>
    %262 = vector.broadcast %250 : vector<8x1xf32> to vector<8x32xf32>
    %263 = arith.subf %244, %262 : vector<8x32xf32>
    %264 = vector.broadcast %245 : vector<1x32xf32> to vector<8x32xf32>
    %265 = arith.mulf %264, %263 : vector<8x32xf32>
    %266 = vector.broadcast %261 : vector<8x1xf32> to vector<8x32xf32>
    %267 = arith.mulf %265, %266 : vector<8x32xf32>
    %268 = vector.broadcast %246 : vector<1x32xf32> to vector<8x32xf32>
    %269 = arith.addf %267, %268 : vector<8x32xf32>
    %c0_111 = arith.constant 0 : index
    %c0_112 = arith.constant 0 : index
    %270 = vector.load %arg19[%c0_111, %c0_112] : memref<32x64xf32, #tpu.memory_space<vmem>>, vector<32x64xf32>
    %cst_113 = arith.constant dense<0.000000e+00> : vector<8x64xf32>
    %271 = tpu.matmul %269, %270, %cst_113 {dimension_numbers = #tpu.dot_dimension_numbers<[1], [0], [0], [1], [0, 0, 1, 1], [], []>} : vector<8x32xf32>, vector<32x64xf32>, vector<8x64xf32> -> vector<8x64xf32>
    %c0_114 = arith.constant 0 : index
    %c0_115 = arith.constant 0 : index
    %272 = vector.load %arg20[%c0_114, %c0_115] : memref<1x64xf32, #tpu.memory_space<vmem>>, vector<1x64xf32>
    %273 = vector.broadcast %272 : vector<1x64xf32> to vector<8x64xf32>
    %274 = arith.addf %271, %273 : vector<8x64xf32>
    %cst_116 = arith.constant 0.000000e+00 : f32
    %275 = vector.broadcast %cst_116 : f32 to vector<8x64xf32>
    %276 = arith.maximumf %274, %275 : vector<8x64xf32>
    %c0_117 = arith.constant 0 : index
    %c0_118 = arith.constant 0 : index
    %277 = vector.load %arg21[%c0_117, %c0_118] : memref<64x32xf32, #tpu.memory_space<vmem>>, vector<64x32xf32>
    %cst_119 = arith.constant dense<0.000000e+00> : vector<8x32xf32>
    %278 = tpu.matmul %276, %277, %cst_119 {dimension_numbers = #tpu.dot_dimension_numbers<[1], [0], [0], [1], [0, 0, 1, 1], [], []>} : vector<8x64xf32>, vector<64x32xf32>, vector<8x32xf32> -> vector<8x32xf32>
    %c0_120 = arith.constant 0 : index
    %c0_121 = arith.constant 0 : index
    %279 = vector.load %arg22[%c0_120, %c0_121] : memref<1x32xf32, #tpu.memory_space<vmem>>, vector<1x32xf32>
    %280 = vector.broadcast %279 : vector<1x32xf32> to vector<8x32xf32>
    %281 = arith.addf %278, %280 : vector<8x32xf32>
    %282 = arith.addf %269, %281 : vector<8x32xf32>
    %c0_122 = arith.constant 0 : index
    %c0_123 = arith.constant 0 : index
    %283 = vector.load %arg23[%c0_122, %c0_123] : memref<1x32xf32, #tpu.memory_space<vmem>>, vector<1x32xf32>
    %c0_124 = arith.constant 0 : index
    %c0_125 = arith.constant 0 : index
    %284 = vector.load %arg24[%c0_124, %c0_125] : memref<1x32xf32, #tpu.memory_space<vmem>>, vector<1x32xf32>
    %cst_126 = arith.constant dense<0.000000e+00> : vector<8xf32>
    %285 = vector.multi_reduction <add>, %282, %cst_126 [1] : vector<8x32xf32> to vector<8xf32>
    %286 = vector.shape_cast %285 : vector<8xf32> to vector<8x1xf32>
    %cst_127 = arith.constant 3.200000e+01 : f32
    %287 = vector.broadcast %cst_127 : f32 to vector<8x1xf32>
    %288 = arith.divf %286, %287 : vector<8x1xf32>
    %289 = vector.broadcast %288 : vector<8x1xf32> to vector<8x32xf32>
    %290 = arith.subf %282, %289 : vector<8x32xf32>
    %291 = arith.mulf %290, %290 : vector<8x32xf32>
    %cst_128 = arith.constant dense<0.000000e+00> : vector<8xf32>
    %292 = vector.multi_reduction <add>, %291, %cst_128 [1] : vector<8x32xf32> to vector<8xf32>
    %293 = vector.shape_cast %292 : vector<8xf32> to vector<8x1xf32>
    %cst_129 = arith.constant 3.100000e+01 : f32
    %294 = vector.broadcast %cst_129 : f32 to vector<8x1xf32>
    %295 = arith.divf %293, %294 : vector<8x1xf32>
    %296 = math.sqrt %295 : vector<8x1xf32>
    %cst_130 = arith.constant 9.99999997E-7 : f32
    %297 = vector.broadcast %cst_130 : f32 to vector<8x1xf32>
    %298 = arith.addf %296, %297 : vector<8x1xf32>
    %299 = tpu.reciprocal %298 : vector<8x1xf32> -> vector<8x1xf32>
    %300 = vector.broadcast %288 : vector<8x1xf32> to vector<8x32xf32>
    %301 = arith.subf %282, %300 : vector<8x32xf32>
    %302 = vector.broadcast %283 : vector<1x32xf32> to vector<8x32xf32>
    %303 = arith.mulf %302, %301 : vector<8x32xf32>
    %304 = vector.broadcast %299 : vector<8x1xf32> to vector<8x32xf32>
    %305 = arith.mulf %303, %304 : vector<8x32xf32>
    %306 = vector.broadcast %284 : vector<1x32xf32> to vector<8x32xf32>
    %307 = arith.addf %305, %306 : vector<8x32xf32>
    %c0_131 = arith.constant 0 : index
    %c0_132 = arith.constant 0 : index
    %c0_133 = arith.constant 0 : index
    %308 = vector.load %arg25[%c0_131, %c0_132, %c0_133] : memref<1x8x32xf32, #tpu.memory_space<vmem>>, vector<1x8x32xf32>
    %309 = vector.shape_cast %308 : vector<1x8x32xf32> to vector<8x32xf32>
    %310 = vector.shape_cast %307 : vector<8x32xf32> to vector<1x8x32xf32>
    tpu.vector_store %arg25[%c0_131, %c0_132, %c0_133], %310 {strides = array<i32>} : memref<1x8x32xf32, #tpu.memory_space<vmem>>, vector<1x8x32xf32>,
    return
  }
  func.func @transform_0(%arg0: i32) -> (i32, i32, i32) {
    %c0_i32 = arith.constant 0 : i32
    %c0_i32_0 = arith.constant 0 : i32
    %c0_i32_1 = arith.constant 0 : i32
    return %arg0, %c0_i32, %c0_i32_0 : i32, i32, i32
  }
  func.func @transform_1(%arg0: i32) -> (i32, i32, i32) {
    %c0_i32 = arith.constant 0 : i32
    %c0_i32_0 = arith.constant 0 : i32
    %c0_i32_1 = arith.constant 0 : i32
    return %arg0, %c0_i32, %c0_i32_0 : i32, i32, i32
  }
  func.func @transform_2(%arg0: i32) -> (i32, i32, i32) {
    %c0_i32 = arith.constant 0 : i32
    %c0_i32_0 = arith.constant 0 : i32
    %c0_i32_1 = arith.constant 0 : i32
    return %arg0, %c0_i32, %c0_i32_0 : i32, i32, i32
  }
  func.func @transform_3(%arg0: i32) -> (i32, i32, i32) {
    %c0_i32 = arith.constant 0 : i32
    %c0_i32_0 = arith.constant 0 : i32
    %c0_i32_1 = arith.constant 0 : i32
    return %arg0, %c0_i32, %c0_i32_0 : i32, i32, i32
  }
  func.func @transform_4(%arg0: i32) -> (i32, i32) {
    %c0_i32 = arith.constant 0 : i32
    %c0_i32_0 = arith.constant 0 : i32
    %c0_i32_1 = arith.constant 0 : i32
    return %c0_i32, %c0_i32_0 : i32, i32
  }
  func.func @transform_5(%arg0: i32) -> (i32, i32) {
    %c0_i32 = arith.constant 0 : i32
    %c0_i32_0 = arith.constant 0 : i32
    %c0_i32_1 = arith.constant 0 : i32
    return %c0_i32, %c0_i32_0 : i32, i32
  }
  func.func @transform_6(%arg0: i32) -> (i32, i32) {
    %c0_i32 = arith.constant 0 : i32
    %c0_i32_0 = arith.constant 0 : i32
    %c0_i32_1 = arith.constant 0 : i32
    return %c0_i32, %c0_i32_0 : i32, i32
  }
  func.func @transform_7(%arg0: i32) -> (i32, i32) {
    %c0_i32 = arith.constant 0 : i32
    %c0_i32_0 = arith.constant 0 : i32
    %c0_i32_1 = arith.constant 0 : i32
    return %c0_i32, %c0_i32_0 : i32, i32
  }
  func.func @transform_8(%arg0: i32) -> (i32, i32) {
    %c0_i32 = arith.constant 0 : i32
    %c0_i32_0 = arith.constant 0 : i32
    %c0_i32_1 = arith.constant 0 : i32
    return %c0_i32, %c0_i32_0 : i32, i32
  }
  func.func @transform_9(%arg0: i32) -> (i32, i32) {
    %c0_i32 = arith.constant 0 : i32
    %c0_i32_0 = arith.constant 0 : i32
    %c0_i32_1 = arith.constant 0 : i32
    return %c0_i32, %c0_i32_0 : i32, i32
  }
  func.func @transform_10(%arg0: i32) -> (i32, i32) {
    %c0_i32 = arith.constant 0 : i32
    %c0_i32_0 = arith.constant 0 : i32
    %c0_i32_1 = arith.constant 0 : i32
    return %c0_i32, %c0_i32_0 : i32, i32
  }
  func.func @transform_11(%arg0: i32) -> (i32, i32) {
    %c0_i32 = arith.constant 0 : i32
    %c0_i32_0 = arith.constant 0 : i32
    %c0_i32_1 = arith.constant 0 : i32
    return %c0_i32, %c0_i32_0 : i32, i32
  }
  func.func @transform_12(%arg0: i32) -> (i32, i32) {
    %c0_i32 = arith.constant 0 : i32
    %c0_i32_0 = arith.constant 0 : i32
    %c0_i32_1 = arith.constant 0 : i32
    return %c0_i32, %c0_i32_0 : i32, i32
  }
  func.func @transform_13(%arg0: i32) -> (i32, i32) {
    %c0_i32 = arith.constant 0 : i32
    %c0_i32_0 = arith.constant 0 : i32
    %c0_i32_1 = arith.constant 0 : i32
    return %c0_i32, %c0_i32_0 : i32, i32
  }
  func.func @transform_14(%arg0: i32) -> (i32, i32) {
    %c0_i32 = arith.constant 0 : i32
    %c0_i32_0 = arith.constant 0 : i32
    %c0_i32_1 = arith.constant 0 : i32
    return %c0_i32, %c0_i32_0 : i32, i32
  }
  func.func @transform_15(%arg0: i32) -> (i32, i32) {
    %c0_i32 = arith.constant 0 : i32
    %c0_i32_0 = arith.constant 0 : i32
    %c0_i32_1 = arith.constant 0 : i32
    return %c0_i32, %c0_i32_0 : i32, i32
  }
  func.func @transform_16(%arg0: i32) -> (i32, i32) {
    %c0_i32 = arith.constant 0 : i32
    %c0_i32_0 = arith.constant 0 : i32
    %c0_i32_1 = arith.constant 0 : i32
    return %c0_i32, %c0_i32_0 : i32, i32
  }
  func.func @transform_17(%arg0: i32) -> (i32, i32) {
    %c0_i32 = arith.constant 0 : i32
    %c0_i32_0 = arith.constant 0 : i32
    %c0_i32_1 = arith.constant 0 : i32
    return %c0_i32, %c0_i32_0 : i32, i32
  }
  func.func @transform_18(%arg0: i32) -> (i32, i32) {
    %c0_i32 = arith.constant 0 : i32
    %c0_i32_0 = arith.constant 0 : i32
    %c0_i32_1 = arith.constant 0 : i32
    return %c0_i32, %c0_i32_0 : i32, i32
  }
  func.func @transform_19(%arg0: i32) -> (i32, i32) {
    %c0_i32 = arith.constant 0 : i32
    %c0_i32_0 = arith.constant 0 : i32
    %c0_i32_1 = arith.constant 0 : i32
    return %c0_i32, %c0_i32_0 : i32, i32
  }
  func.func @transform_20(%arg0: i32) -> (i32, i32) {
    %c0_i32 = arith.constant 0 : i32
    %c0_i32_0 = arith.constant 0 : i32
    %c0_i32_1 = arith.constant 0 : i32
    return %c0_i32, %c0_i32_0 : i32, i32
  }
  func.func @transform_21(%arg0: i32) -> (i32, i32) {
    %c0_i32 = arith.constant 0 : i32
    %c0_i32_0 = arith.constant 0 : i32
    %c0_i32_1 = arith.constant 0 : i32
    return %c0_i32, %c0_i32_0 : i32, i32
  }
  func.func @transform_22(%arg0: i32) -> (i32, i32) {
    %c0_i32 = arith.constant 0 : i32
    %c0_i32_0 = arith.constant 0 : i32
    %c0_i32_1 = arith.constant 0 : i32
    return %c0_i32, %c0_i32_0 : i32, i32
  }
  func.func @transform_23(%arg0: i32) -> (i32, i32) {
    %c0_i32 = arith.constant 0 : i32
    %c0_i32_0 = arith.constant 0 : i32
    %c0_i32_1 = arith.constant 0 : i32
    return %c0_i32, %c0_i32_0 : i32, i32
  }
  func.func @transform_24(%arg0: i32) -> (i32, i32, i32) {
    %c0_i32 = arith.constant 0 : i32
    %c0_i32_0 = arith.constant 0 : i32
    %c0_i32_1 = arith.constant 0 : i32
    return %arg0, %c0_i32, %c0_i32_0 : i32, i32, i32
  }
}

</mosaic_0001>

<bundles_post_ra>
// kernel: decoder_forward.3
= control target key start
LH: loop header
LB: loop body
LE: loop exit
PB: predicated region body
PF: predicated region fallthrough
CT: control target
= control target key end

     0   :  { %s4819_s0 = inlined_call_operand.vmem [shape: f32[2,8,32], index: 0, kind: input, shape index: {}]   ;;  %s4820_s1 = inlined_call_operand.vmem [shape: f32[2,8,32], index: 1, kind: input, shape index: {}]   ;;  %s4821_s2 = inlined_call_operand.vmem [shape: f32[2,8,8], index: 2, kind: input, shape index: {}]   ;;  %s4822_s3 = inlined_call_operand.vmem [shape: f32[2,8,8], index: 3, kind: input, shape index: {}]   ;;  %s4823_s4 = inlined_call_operand.vmem [shape: f32[32,96], index: 4, kind: input, shape index: {}]   ;;  %s4824_s5 = inlined_call_operand.vmem [shape: f32[1,96], index: 5, kind: input, shape index: {}]   ;;  %s4825_s6 = inlined_call_operand.vmem [shape: f32[32,32], index: 6, kind: input, shape index: {}]   ;;  %s4826_s7 = inlined_call_operand.vmem [shape: f32[1,32], index: 7, kind: input, shape index: {}]   ;;  %s4827_s8 = inlined_call_operand.vmem [shape: f32[1,32], index: 8, kind: input, shape index: {}]   ;;  %s4828_s9 = inlined_call_operand.vmem [shape: f32[1,32], index: 9, kind: input, shape index: {}]   ;;  %s4829_s10 = inlined_call_operand.vmem [shape: f32[32,32], index: 10, kind: input, shape index: {}]   ;;  %s4830_s11 = inlined_call_operand.vmem [shape: f32[1,32], index: 11, kind: input, shape index: {}]   ;;  %s4831_s12 = inlined_call_operand.vmem [shape: f32[32,64], index: 12, kind: input, shape index: {}]   ;;  %s4832_s13 = inlined_call_operand.vmem [shape: f32[1,64], index: 13, kind: input, shape index: {}]   ;;  %s4833_s14 = inlined_call_operand.vmem [shape: f32[32,32], index: 14, kind: input, shape index: {}]   ;;  %s4834_s15 = inlined_call_operand.vmem [shape: f32[1,32], index: 15, kind: input, shape index: {}]   ;;  %s4835_s16 = inlined_call_operand.vmem [shape: f32[1,32], index: 16, kind: input, shape index: {}]   ;;  %s4836_s17 = inlined_call_operand.vmem [shape: f32[1,32], index: 17, kind: input, shape index: {}]   ;;  %s4837_s18 = inlined_call_operand.vmem [shape: f32[32,64], index: 18, kind: input, shape index: {}]   ;;  %s4838_s19 = inlined_call_operand.vmem [shape: f32[1,64], index: 19, kind: input, shape index: {}]   ;;  %s4839_s20 = inlined_call_operand.vmem [shape: f32[64,32], index: 20, kind: input, shape index: {}]   ;;  %s4840_s21 = inlined_call_operand.hbm [shape: f32[1,32], index: 21, kind: input, shape index: {}]   ;;  %s4841_s22 = inlined_call_operand.hbm [shape: f32[1,32], index: 22, kind: input, shape index: {}]   ;;  %s4842_s23 = inlined_call_operand.hbm [shape: f32[1,32], index: 23, kind: input, shape index: {}]   ;;  %s4843_s24 = inlined_call_operand.hbm [shape: f32[2,8,32], index: 24, kind: output, shape index: {}]  }
   0x1   :  { %4867 = sst [smem:[#allocation20_spill]] %s4819_s0 }
   0x2   :  { %4868 = sst [smem:[#allocation21_spill]] %s4820_s1 }
   0x3   :  { %4869 = sst [smem:[#allocation22_spill]] %s4821_s2 }
   0x4   :  { %4870 = sst [smem:[#allocation23_spill]] %s4822_s3 }
   0x5   :  { %4871 = sst [smem:[#allocation24_spill]] %s4823_s4 }
   0x6   :  { %4872 = sst [smem:[#allocation25_spill]] %s4824_s5 }
   0x7   :  { %4873 = sst [smem:[#allocation26_spill]] %s4825_s6 }
   0x8   :  { %4874 = sst [smem:[#allocation27_spill]] %s4826_s7 }
   0x9   :  { %4875 = sst [smem:[#allocation28_spill]] %s4827_s8 }
   0xa   :  { %4876 = sst [smem:[#allocation29_spill]] %s4843_s24 }
   0xb   :  { %29 = vsyncpa [#allocation3], 0 }
   0xc   :  { %30 = vsyncpa [#allocation6], 0 }
   0xd   :  { %31 = vsyncpa [#allocation4], 0 }
   0xe   :  { %33 = vsyncpa [#allocation4 + $0x1], 0  ;;  %s4246_s5 = smov 0   ;;  %s4248_s26 = smov 0  }
   0xf   :  { %s4250_s27 = smov 0   ;;  %s4252_s28 = smov 0  }
  0x10 LB: > { %4877 = sst [smem:[#allocation12_spill]] %s4089_s5  ;;  %s4267_s6 = sadd.s32 4294967295, %s4101_s28   ;;  %s4101_s28 = sphi %s4252_s28, %s4918_s28   ;;  %s4097_s27 = sphi %s4250_s27, %s4921_s27   ;;  %s4093_s26 = sphi %s4248_s26, %s4920_s26   ;;  %s4089_s5 = sphi %s4246_s5, %s4919_s5  }
  0x11   : > { %4878 = sst [smem:[#allocation13_spill]] %s4093_s26  ;;  %s3454_s2 = sadd.s32 4294967294, %s4101_s28  }
  0x12   : > { %4879 = sst [smem:[#allocation14_spill]] %s4097_s27  ;;  %s4271_s29 = sadd.s32 1, %s4101_s28  }
  0x13   : > { %4880 = sst [smem:[#allocation15_spill]] %s4101_s28  ;;  %s570_s0 = sadd.s32 1, %s4097_s27 }
  0x14   : > { %4881 = sst [smem:[#allocation16_spill]] %s4271_s29  ;;  %s567_s7 = ssub.s32 %s4101_s28, %s4271_s29 }
  0x15   : > { %p580_p0 = scmp.ne.s32.totalorder %s4097_s27, %s4093_s26  ;;  %p568_p1 = scmp.eq.s32.totalorder %s567_s7, 0 }
  0x16   : > { %p581_p2 = scmp.eq.s32.totalorder %s4267_s6, 1  ;;  %p586_p3 = scmp.ne.s32.totalorder %s4093_s26, %s4089_s5 }
  0x17   : > { %p587_p4 = scmp.eq.s32.totalorder %s3454_s2, 1  ;;  %p3455_p7 = scmp.ge.s32.totalorder %s4101_s28, 1 }
  0x18   : > { %s4282_s30 = scalar_select %p568_p1, %s4097_s27, %s570_s0  }
  0x19   : > { %p4284_p5 = por %p581_p2, %p580_p0  ;;  %p4288_p6 = por %p587_p4, %p586_p3 }
  0x1a   : > { %4882 = sst [smem:[#allocation17_spill]] %s4282_s30  ;;  %p594_p8 = scmp.lt.s32.totalorder %s4101_s28, 3 }
  0x1b   : > { %s4883_s3 = scalar_select %p4284_p5, 1, 0 }
  0x1c   : > { %s4885_s25 = scalar_select %p4288_p6, 1, 0 }
  0x1d   : > { %4884 = sst [smem:[#allocation18_spill]] %s4883_s3  ;;  %p4853_p9 = scmp.eq.s32.totalorder %s4267_s6, 0 }
  0x1e   : > { %4886 = sst [smem:[#allocation19_spill]] %s4885_s25  ;;  %p4295_p10 = pnand %p3455_p7, %p594_p8 }
  0x1f   : > { %s4103_s4 = smov [#allocation5]   ;;  %s4104_s2 = smov [#allocation2]  }
  0x20   : > { %s4887_s8 = scalar_select %p4295_p10, 1, 0 }
  0x21   : > { %s669_s1 = sshll.u32 %s4103_s4, 4  ;;  %p3833_p11 = pneg %p4295_p10  ;;  %s670_s1 = int_to_ptr.vmem [resolvable:$true] %s669_s1 }
  0x22   : > { %s658_s0 = sshll.u32 %s4104_s2, 4  ;;  %s4105_s30 = smov [#allocation7]   ;;  %s4307_s0 = int_to_ptr.vmem [resolvable:$true] %s658_s0 }
  0x23   : > { %p4303_p12 = pnand %p4853_p9, %p3833_p11  ;;  %s680_s27 = sshll.u32 %s4105_s30, 4  ;;  %s4309_s27 = int_to_ptr.vmem [resolvable:$true] %s680_s27 }
  0x24   : > { %s3947_s4 = scalar_lea.hbm %s4841_s22, 16 }
  0x25   : > { %p3948_p13 = scmp.ne.s32.totalorder %s4841_s22, %s3947_s4  ;;  %p4319_p0 = pneg %p4303_p12 }
  0x26   : > { %p3954_p3 = scmp.lt.u32.totalorder %s3947_s4, %s4841_s22 }
  0x27   : > { %p3950_p1 = pnand %p4319_p0, %p3948_p13 }
  0x29   : > { %p3951_p2 = pneg %p3950_p1 }
  0x2b   : > { %p3956_p4 = pnand %p3954_p3, %p3951_p2 }
  0x2d   : > { %3959 = shalt.err (!%p3956_p4)
}
  0x2e   : > { %s3960_s29 = scalar_lea.vmem %s670_s1, 16  ;;  %s3967_s5 = scalar_lea.vmem %s670_s1, 32 }
  0x2f   : > { %p3961_p7 = scmp.ne.s32.totalorder %s670_s1, %s3960_s29  ;;  %p3968_p9 = scmp.lt.s32.totalorder %s670_s1, %s670_s1 }
  0x30   : > { %p3969_p6 = scmp.lt.s32.totalorder %s3967_s5, %s3960_s29 }
  0x31   : > { %p3963_p8 = pnand %p3961_p7, %p4319_p0 }
  0x32   : > { %p3970_p5 = por %p3969_p6, %p3968_p9 }
  0x33   : > { %p3964_p11 = pneg %p3963_p8 }
  0x35   : > { %p3971_p10 = pnand %p3970_p5, %p3964_p11 }
  0x37   : > { %3974 = shalt.err (!%p3971_p10)
}
  0x38   : > { %3839 = dma.hbm_to_vmem [thread:$0]  (!%p4303_p12), %s4841_s22, 16, %s670_s1, [#allocation6]  }
  0x39   : > { %s3975_s30 = scalar_lea.hbm %s4840_s21, 16 }
  0x3a   : > { %p3976_p13 = scmp.ne.s32.totalorder %s4840_s21, %s3975_s30  ;;  %p3982_p5 = scmp.lt.u32.totalorder %s3975_s30, %s4840_s21 }
  0x3c   : > { %p3978_p1 = pnand %p3976_p13, %p4319_p0 }
  0x3e   : > { %p3979_p6 = pneg %p3978_p1 }
  0x40   : > { %p3984_p9 = pnand %p3982_p5, %p3979_p6 }
  0x42   : > { %3987 = shalt.err (!%p3984_p9)
}
  0x43   : > { %s3988_s1 = scalar_lea.vmem %s4307_s0, 16  ;;  %s3995_s26 = scalar_lea.vmem %s4307_s0, 32 }
  0x44   : > { %p3989_p10 = scmp.ne.s32.totalorder %s4307_s0, %s3988_s1  ;;  %p3996_p4 = scmp.lt.s32.totalorder %s4307_s0, %s4307_s0 }
  0x45   : > { %p3997_p7 = scmp.lt.s32.totalorder %s3995_s26, %s3988_s1 }
  0x46   : > { %p3991_p2 = pnand %p3989_p10, %p4319_p0 }
  0x47   : > { %p3998_p8 = por %p3997_p7, %p3996_p4 }
  0x48   : > { %p3992_p3 = pneg %p3991_p2 }
  0x4a   : > { %p3999_p11 = pnand %p3998_p8, %p3992_p3 }
  0x4c   : > { %4002 = shalt.err (!%p3999_p11)
}
  0x4d   : > { %3836 = dma.hbm_to_vmem [thread:$0]  (!%p4303_p12), %s4840_s21, 16, %s4307_s0, [#allocation3]  }
  0x4e   : > { %s4003_s4 = scalar_lea.hbm %s4842_s23, 16 }
  0x4f   : > { %p4004_p13 = scmp.ne.s32.totalorder %s4842_s23, %s4003_s4  ;;  %p4010_p5 = scmp.lt.u32.totalorder %s4003_s4, %s4842_s23 }
  0x51   : > { %p4006_p1 = pnand %p4004_p13, %p4319_p0 }
  0x53   : > { %p4007_p6 = pneg %p4006_p1 }
  0x55   : > { %p4012_p9 = pnand %p4010_p5, %p4007_p6 }
  0x57   : > { %4015 = shalt.err (!%p4012_p9)
}
  0x58   : > { %s4016_s0 = scalar_lea.vmem %s4309_s27, 16  ;;  %s4023_s26 = scalar_lea.vmem %s4309_s27, 32 }
  0x59   : > { %p4017_p10 = scmp.ne.s32.totalorder %s4309_s27, %s4016_s0  ;;  %p4024_p4 = scmp.lt.s32.totalorder %s4309_s27, %s4309_s27 }
  0x5a   : > { %p4025_p7 = scmp.lt.s32.totalorder %s4023_s26, %s4016_s0 }
  0x5b   : > { %p4019_p2 = pnand %p4017_p10, %p4319_p0 }
  0x5c   : > { %p4026_p8 = por %p4025_p7, %p4024_p4 }
  0x5d   : > { %p4020_p3 = pneg %p4019_p2 }
  0x5f   : > { %p4027_p11 = pnand %p4026_p8, %p4020_p3 }
  0x61   : > { %4030 = shalt.err (!%p4027_p11)
}
  0x62   : > { %3842 = dma.hbm_to_vmem [thread:$0]  (!%p4303_p12), %s4842_s23, 16, %s4309_s27, [#allocation6]  }
  0x63   : > { %p4890_p13 = scmp.ne.s32.totalorder %s4887_s8, 0 }
  0x64   : > { %p4891_p0 = scmp.eq.s32.totalorder (!%p4890_p13), %s4267_s6, 0 }
  0x65   : > { %721 = sbr.rel (%p4890_p13) target bundleno = 7196 (0x1c1c), region = 116 }
  0x6c   : > { %4076 = dma.done.wait (%p4891_p0), [#allocation3], 16   ;;  %p4892_p1 = pmov %p4891_p0 }
  0x6d   : > { %p4893_p6 = pmov %p4891_p0 }
  0x6e   : > { %4078 = vsyncadd (%p4892_p1), [#allocation3], 4294967280 }
  0x6f   : > { %4080 = dma.done.wait (%p4893_p6), [#allocation6], 32   ;;  %p4894_p5 = pmov %p4891_p0 }
  0x70   : > { %p806_p9 = scmp.lt.s32.totalorder %s4267_s6, 1  ;;  %v4106_v0 = vmov 0.0|0.0   ;;  %vm4107_vm0 = vmmov 0   ;;  %v4108_v1 = vmov 0.0   ;;  %s4895_s2 = sld [smem:[#allocation24_spill]]  ;;  %vm837_vm1 = vcmask 261120  }
  0x71   : > { %4082 = vsyncadd (%p4894_p5), [#allocation6], 4294967264  ;;  %3783 = vmatprep.subr.bf16.mxu0 %v4106_v0  ;;  %3608 = vmatprep.mubr.msk.f32.mxu0 %vm4107_vm0, %v4108_v1  ;;  %s4896_s3 = sld [smem:[#allocation20_spill]]  ;;  %s4897_s7 = sld [smem:[#allocation25_spill]]  ;;  %vm927_vm2 = vcmask 64512   ;;  %vm3202_vm9 = vcmask 523264  }
  0x72   : > { %3616 = vmatprep.subr.mxu1 %v4108_v1  ;;  %3618 = vmatprep.mubr.msk.f32.mxu1 %vm4107_vm0, %v4108_v1  ;;  %s807_s27 = scalar_select %p806_p9, %s4267_s6, 1 }
  0x73   : > { %s4109_s25 = smov 64   ;;  %s4110_s24 = smov 96  }
  0x74   : > { %s4413_s1 = sshll.u32 %s807_s27, 3  ;;  %s4865_s4 = smov 88  }
  0x75   : > { %s4898_s5 = sld [smem:[#allocation22_spill]]  ;;  %s4112_s26 = smov 56  }
  0x76   : > { %v826_v2 = vld [vmem:[%s4895_s2] sm:$0xff]  ;;  %v827_v3 = vld [vmem:[%s4895_s2 + $0x8] sm:$0xff]  ;;  %v828_v4 = vld [vmem:[%s4895_s2 + $0x10] sm:$0xff]  ;;  %s4900_s30 = sld [smem:[#allocation27_spill]]  ;;  %s4119_s27 = smov 40  }
  0x77   : > { %v3784_v5 = vpack.c.bf16 %v827_v3, %v826_v2  ;;  %v829_v6 = vld [vmem:[%s4895_s2 + $0x18] sm:$0xff]  ;;  %s809_s28 = scalar_lea.vmem %s4896_s3, %s4413_s1  ;;  %v3469_v9 = vld [vmem:[%s4897_s7] ss:$0 sm:$0xff]  ;;  %s4862_s3 = smov 80  }
  0x78   : > { %v3787_v7 = vpack.c.bf16 %v829_v6, %v828_v4  ;;  %v4420_v8 = vld [vmem:[%s809_s28] sm:$0xff]  ;;  %s4114_s28 = smov 120   ;;  %s4899_s7 = sld [smem:[#allocation26_spill]] }
  0x79   : > { %3785 = vmatpush3.bf16.msra.mxu0 %v3784_v5  ;;  %s4905_s8 = smov 112   ;;  %s3520_s29 = sshll.u32 %s4267_s6, 7 }
  0x7a   : > { %3786 = vmatprep.subr.bf16.mxu0 %v4106_v0  ;;  %s4120_s6 = smov [#allocation8]  }
  0x7b   : > { %s817_s0 = scalar_lea.vmem %s4898_s5, %s4413_s1  ;;  %s4116_s5 = smov 48  }
  0x7c   : > { %v4451_v16 = vld [vmem:[%s817_s0] sm:$0xff]  ;;  %s4859_s0 = smov 72  }
  0x7d   : > { %3788 = vmatpush3.bf16.msra.mxu0 %v3787_v7  ;;  %vm1003_vm3 = vcmp.eq.f32.partialorder %v4451_v16, 0.0  ;;  %v3471_v2 = vld [vmem:[%s4900_s30] ss:$0 sm:$0xff] }
  0x7e   : > { %3611 = vmatprep.subr.mxu0 %v4108_v1  ;;  %v912_v26 = vld [vmem:[%s4899_s7] sm:$0xff]  ;;  %v913_v51 = vld [vmem:[%s4899_s7 + $0x8] sm:$0xff]  ;;  %v915_v16 = vld [vmem:[%s4899_s7 + $0x18] sm:$0xff] }
  0x80   : > { %3609 = vmatmul.mubr.msk.f32.vlgmr.msra.gmra.mrb[0].mxu0 %vm837_vm1, %v4420_v8 }
  0x81   : > { %3613 = vmatprep.mubr.msk.f32.mxu0 %vm4107_vm0, %v4108_v1 }
 0x153   : > { %v907_v10 = vpop.f32.mrb[0].mxu0 }
 0x154   : > { %v4430_v11 = vadd.f32 %v3469_v9, %v907_v10  ;;  %v3610_v12 = vpop.f32.mrb[1].mxu0 }
 0x156   : > { %1016 = vrot.lane.b32.xlu1 %v4430_v11, %s4109_s25  ;;  %925 = vrot.lane.b32.xlu0 %v4430_v11, %s4110_s24  ;;  %v4439_v15 = vmul.f32 0.35355338, %v4430_v11  ;;  %s4863_s25 = smov 112  }
 0x15a   : > { %1168 = vrot.lane.b32.xlu1 %v4430_v11, %s4865_s4  ;;  %s4906_s4 = smov 80  }
 0x1c8   : > { %v1017_v13 = vpop.permute.xlu1 %1016  ;;  %v926_v14 = vpop.permute.xlu0 %925 }
 0x1c9   : > { %3612 = vmatpush3.xpose.msk.msra.mxu0 %vm927_vm2, %v926_v14  ;;  %3617 = vmatpush3.msra.mxu1 %v1017_v13  ;;  %v914_v14 = vld [vmem:[%s4899_s7 + $0x10] sm:$0xff] }
 0x1ca   : > { %3626 = vmatprep.subr.mxu1 %v4108_v1  ;;  %3621 = vmatprep.subr.mxu0 %v4108_v1 }
 0x1cc   : > { %3614 = vmatmul.mubr.msk.f32.vlgmr.msra.gmra.mrb[2].mxu0 %vm927_vm2, %v4439_v15  ;;  %v1169_v27 = vpop.permute.xlu1 %1168 }
 0x1cd   : > { %3623 = vmatprep.mubr.msk.f32.mxu0 %vm4107_vm0, %v4108_v1  ;;  %3622 = vmatpush3.msra.mxu0 %v912_v26 }
 0x1ce   : > { %3631 = vmatprep.subr.mxu0 %v4108_v1 }
 0x29f   : > { %v999_v17 = vpop.f32.mrb[2].mxu0 }
 0x2a0   : > { %v1004_v18 = vsel %vm1003_vm3, -1e+09, %v999_v17  ;;  %v3615_v19 = vpop.f32.mrb[3].mxu0 }
 0x2a1   : > { %v1005_v20 = vsel %vm927_vm2, %v1004_v18, -inf }
 0x2a2   : > { %1006 = vmax.xlane.f32.xlu0 %v1005_v20 }
 0x2b8   : > { %1256 = vrot.lane.b32.xlu0 %v4430_v11, %s4112_s26  ;;  %s4860_s26 = smov 104  }
 0x2bc   : > { %1408 = vrot.lane.b32.xlu0 %v4430_v11, %s4862_s3  ;;  %s4907_s3 = smov 104  }
 0x32f   : > { %v1007_v21 = vpop.xlane.xlu0 %1006 }
 0x330   : > { %v1008_v22 = vsub.f32 %v1004_v18, %v1007_v21 }
 0x332   : > { %v1009_v23 = vmul.f32 1.442695, %v1008_v22 }
 0x333   : > { %v1257_v33 = vpop.permute.xlu0 %1256 }
 0x334   : > { %3903 = vpow2.f32 %v1009_v23 }
 0x337   : > { %v1409_v46 = vpop.permute.xlu0 %1408 }
 0x33e   : > { %v3904_v24 = vpop.eup %3903 }
 0x33f   : > { %v1011_v25 = vsel %vm927_vm2, %v3904_v24, 0.0 }
 0x340   : > { %1012 = vadd.xlane.f32.xlu1 %v1011_v25 }
 0x351   : > { %1166 = vrot.lane.b32.xlu1 %v4439_v15, %s4114_s28 }
 0x3cd   : > { %v1013_v28 = vpop.xlane.xlu1 %1012 }
 0x3ce   : > { %3905 = vrcp.f32 %v1013_v28 }
 0x3d1   : > { %v1167_v31 = vpop.permute.xlu1 %1166 }
 0x3d8   : > { %v3906_v29 = vpop.eup %3905 }
 0x3d9   : > { %v1015_v30 = vmul.f32 %v3906_v29, %v3904_v24 }
 0x3db   : > { %3619 = vmatmul.mubr.msk.f32.vlgmr.msra.gmra.mrb[0].mxu1 %vm927_vm2, %v1015_v30 }
 0x3dc   : > { %3627 = vmatpush3.xpose.msk.msra.mxu1 %vm927_vm2, %v1169_v27  ;;  %3628 = vmatprep.mubr.msk.f32.mxu1 %vm4107_vm0, %v4108_v1 }
 0x3dd   : > { %3636 = vmatprep.subr.mxu1 %v4108_v1 }
 0x3df   : > { %3629 = vmatmul.mubr.msk.f32.vlgmr.msra.gmra.mrb[2].mxu1 %vm927_vm2, %v1167_v31 }
 0x3e0   : > { %3638 = vmatprep.mubr.msk.f32.mxu1 %vm4107_vm0, %v4108_v1  ;;  %3637 = vmatpush3.msra.mxu1 %v913_v51 }
 0x3e1   : > { %3646 = vmatprep.subr.mxu1 %v4108_v1 }
 0x4ae   : > { %v1088_v32 = vpop.f32.mrb[0].mxu1 }
 0x4af   : > { %v3620_v34 = vpop.f32.mrb[1].mxu1  ;;  %3624 = vmatmul.mubr.msk.f32.vlgmr.msra.gmra.mrb[4].mxu0 %vm927_vm2, %v1088_v32 }
 0x4b0   : > { %3632 = vmatpush3.msra.mxu0 %v1257_v33  ;;  %3633 = vmatprep.mubr.msk.f32.mxu0 %vm4107_vm0, %v4108_v1 }
 0x4b1   : > { %3641 = vmatprep.subr.mxu0 %v4108_v1 }
 0x4b2   : > { %v1240_v35 = vpop.f32.mrb[2].mxu1 }
 0x4b3   : > { %v1244_v36 = vsel %vm1003_vm3, -1e+09, %v1240_v35  ;;  %v3630_v37 = vpop.f32.mrb[3].mxu1 }
 0x4b4   : > { %v1245_v38 = vsel %vm927_vm2, %v1244_v36, -inf }
 0x4b5   : > { %1246 = vmax.xlane.f32.xlu1 %v1245_v38 }
 0x542   : > { %v1247_v39 = vpop.xlane.xlu1 %1246 }
 0x543   : > { %v1248_v40 = vsub.f32 %v1244_v36, %v1247_v39 }
 0x545   : > { %v1249_v41 = vmul.f32 1.442695, %v1248_v40 }
 0x547   : > { %3907 = vpow2.f32 %v1249_v41 }
 0x551   : > { %v3908_v42 = vpop.eup %3907 }
 0x552   : > { %v1251_v43 = vsel %vm927_vm2, %v3908_v42, 0.0 }
 0x553   : > { %1252 = vadd.xlane.f32.xlu0 %v1251_v43 }
 0x569   : > { %1406 = vrot.lane.b32.xlu0 %v4439_v15, %s4863_s25  ;;  %s4901_s25 = sld [smem:[#allocation21_spill]] }
 0x582   : > { %v1161_v44 = vpop.f32.mrb[4].mxu0 }
 0x583   : > { %v3625_v45 = vpop.f32.mrb[5].mxu0  ;;  %v1165_v3 = vadd.f32 %v3471_v2, %v1161_v44 }
 0x584   : > { %v2010_v45 = vld [vmem:[%s4831_s12] sm:$0xff] }
 0x5e0   : > { %v1253_v47 = vpop.xlane.xlu0 %1252 }
 0x5e1   : > { %3909 = vrcp.f32 %v1253_v47 }
 0x5e4   : > { %v1407_v50 = vpop.permute.xlu0 %1406 }
 0x5eb   : > { %v3910_v48 = vpop.eup %3909 }
 0x5ec   : > { %v1255_v49 = vmul.f32 %v3910_v48, %v3908_v42  ;;  %v1926_v48 = vld [vmem:[%s4829_s10 + $0x8] sm:$0xff] }
 0x5ee   : > { %3634 = vmatmul.mubr.msk.f32.vlgmr.msra.gmra.mrb[6].mxu0 %vm927_vm2, %v1255_v49  ;;  %v2012_v49 = vld [vmem:[%s4831_s12 + $0x10] sm:$0xff] }
 0x5ef   : > { %3642 = vmatpush3.xpose.msk.msra.mxu0 %vm927_vm2, %v1409_v46  ;;  %3643 = vmatprep.mubr.msk.f32.mxu0 %vm4107_vm0, %v4108_v1  ;;  %v2011_v46 = vld [vmem:[%s4831_s12 + $0x8] sm:$0xff] }
 0x5f0   : > { %3651 = vmatprep.subr.mxu0 %v4108_v1  ;;  %v3796_v47 = vpack.c.bf16 %v2011_v46, %v2010_v45 }
 0x5f2   : > { %3644 = vmatmul.mubr.msk.f32.vlgmr.msra.gmra.mrb[8].mxu0 %vm927_vm2, %v1407_v50  ;;  %v2013_v50 = vld [vmem:[%s4831_s12 + $0x18] sm:$0xff] }
 0x5f3   : > { %3653 = vmatprep.mubr.msk.f32.mxu0 %vm4107_vm0, %v4108_v1  ;;  %3652 = vmatpush3.msra.mxu0 %v914_v14 }
 0x5f4   : > { %3661 = vmatprep.subr.mxu0 %v4108_v1 }
 0x6c1   : > { %v1328_v52 = vpop.f32.mrb[6].mxu0 }
 0x6c2   : > { %v3635_v53 = vpop.f32.mrb[7].mxu0  ;;  %3639 = vmatmul.mubr.msk.f32.vlgmr.msra.gmra.mrb[4].mxu1 %vm927_vm2, %v1328_v52  ;;  %v1927_v52 = vld [vmem:[%s4829_s10 + $0x10] sm:$0xff] }
 0x6c3   : > { %3648 = vmatprep.mubr.msk.f32.mxu1 %vm4107_vm0, %v4108_v1  ;;  %v1928_v53 = vld [vmem:[%s4829_s10 + $0x18] sm:$0xff] }
 0x6c5   : > { %v1480_v54 = vpop.f32.mrb[8].mxu0 }
 0x6c6   : > { %v1484_v55 = vsel %vm1003_vm3, -1e+09, %v1480_v54  ;;  %v3645_v56 = vpop.f32.mrb[9].mxu0  ;;  %v3799_v54 = vpack.c.bf16 %v2013_v50, %v2012_v49 }
 0x6c7   : > { %v1485_v57 = vsel %vm927_vm2, %v1484_v55, -inf }
 0x6c8   : > { %1486 = vmax.xlane.f32.xlu1 %v1485_v57 }
 0x6d9   : > { %1496 = vrot.lane.b32.xlu1 %v4430_v11, %s4116_s5  ;;  %s4903_s5 = sld [smem:[#allocation23_spill]] }
 0x6dd   : > { %1648 = vrot.lane.b32.xlu1 %v4430_v11, %s4859_s0 }
 0x6e1   : > { %1646 = vrot.lane.b32.xlu1 %v4439_v15, %s4860_s26  ;;  %s813_s26 = scalar_lea.vmem %s4901_s25, %s4413_s1 }
 0x6e2   : > { %v823_v56 = vld [vmem:[%s813_s26] sm:$0xff]  ;;  %s4910_s26 = sld [smem:[#allocation18_spill]] }
 0x6e8   : > { %p4913_p10 = scmp.ne.s32.totalorder %s4910_s26, 0 }
 0x755   : > { %v1487_v58 = vpop.xlane.xlu1 %1486 }
 0x756   : > { %v1488_v59 = vsub.f32 %v1484_v55, %v1487_v58  ;;  %v3793_v55 = vpack.c.bf16 %v1928_v53, %v1927_v52 }
 0x758   : > { %v1489_v60 = vmul.f32 1.442695, %v1488_v59 }
 0x759   : > { %v1497_v61 = vpop.permute.xlu1 %1496 }
 0x75a   : > { %3911 = vpow2.f32 %v1489_v60  ;;  %3647 = vmatpush3.msra.mxu1 %v1497_v61 }
 0x75b   : > { %3656 = vmatprep.subr.mxu1 %v4108_v1 }
 0x75d   : > { %v1649_v10 = vpop.permute.xlu1 %1648 }
 0x761   : > { %v1647_v13 = vpop.permute.xlu1 %1646 }
 0x764   : > { %v3912_v62 = vpop.eup %3911 }
 0x765   : > { %v1491_v63 = vsel %vm927_vm2, %v3912_v62, 0.0 }
 0x766   : > { %1492 = vadd.xlane.f32.xlu0 %v1491_v63 }
 0x795   : > { %v1401_v4 = vpop.f32.mrb[4].mxu1 }
 0x796   : > { %v1405_v5 = vadd.f32 %v1401_v4, %v1165_v3  ;;  %v3640_v6 = vpop.f32.mrb[5].mxu1 }
 0x797   : > { %v3489_v6 = vld [vmem:[%s4828_s9] ss:$0 sm:$0xff] }
 0x7f3   : > { %v1493_v7 = vpop.xlane.xlu0 %1492 }
 0x7f4   : > { %3913 = vrcp.f32 %v1493_v7 }
 0x7fe   : > { %v3914_v9 = vpop.eup %3913 }
 0x7ff   : > { %v1495_v12 = vmul.f32 %v3914_v9, %v3912_v62 }
 0x801   : > { %3649 = vmatmul.mubr.msk.f32.vlgmr.msra.gmra.mrb[6].mxu1 %vm927_vm2, %v1495_v12 }
 0x802   : > { %3657 = vmatpush3.xpose.msk.msra.mxu1 %vm927_vm2, %v1649_v10  ;;  %3658 = vmatprep.mubr.msk.f32.mxu1 %vm4107_vm0, %v4108_v1  ;;  %v3492_v10 = vld [vmem:[%s4832_s13] ss:$0 sm:$0xff] }
 0x803   : > { %3666 = vmatprep.subr.mxu1 %v4108_v1 }
 0x805   : > { %3659 = vmatmul.mubr.msk.f32.vlgmr.msra.gmra.mrb[8].mxu1 %vm927_vm2, %v1647_v13 }
 0x806   : > { %3668 = vmatprep.mubr.msk.f32.mxu1 %vm4107_vm0, %v4108_v1  ;;  %3667 = vmatpush3.msra.mxu1 %v915_v16 }
 0x807   : > { %3795 = vmatprep.subr.bf16.mxu1 %v4106_v0 }
 0x8d4   : > { %v1568_v15 = vpop.f32.mrb[6].mxu1 }
 0x8d5   : > { %v3650_v17 = vpop.f32.mrb[7].mxu1  ;;  %3654 = vmatmul.mubr.msk.f32.vlgmr.msra.gmra.mrb[10].mxu0 %vm927_vm2, %v1568_v15  ;;  %v3490_v15 = vld [vmem:[%s4830_s11] ss:$0 sm:$0xff] }
 0x8d6   : > { %3663 = vmatprep.mubr.msk.f32.mxu0 %vm4107_vm0, %v4108_v1 }
 0x8d8   : > { %v1720_v18 = vpop.f32.mrb[8].mxu1 }
 0x8d9   : > { %v1724_v19 = vsel %vm1003_vm3, -1e+09, %v1720_v18  ;;  %v3660_v20 = vpop.f32.mrb[9].mxu1 }
 0x8da   : > { %v1725_v21 = vsel %vm927_vm2, %v1724_v19, -inf }
 0x8db   : > { %1726 = vmax.xlane.f32.xlu1 %v1725_v21 }
 0x968   : > { %v1727_v22 = vpop.xlane.xlu1 %1726 }
 0x969   : > { %v1728_v23 = vsub.f32 %v1724_v19, %v1727_v22 }
 0x96b   : > { %v1729_v24 = vmul.f32 1.442695, %v1728_v23 }
 0x96d   : > { %3915 = vpow2.f32 %v1729_v24 }
 0x977   : > { %v3916_v25 = vpop.eup %3915 }
 0x978   : > { %v1731_v26 = vsel %vm927_vm2, %v3916_v25, 0.0 }
 0x979   : > { %1732 = vadd.xlane.f32.xlu0 %v1731_v26 }
 0x98f   : > { %1736 = vrot.lane.b32.xlu0 %v4430_v11, %s4119_s27  ;;  %s4902_s27 = sld [smem:[#allocation28_spill]] }
 0x995   : > { %v3488_v3 = vld [vmem:[%s4902_s27] ss:$0 sm:$0xff]  ;;  %s821_s27 = scalar_lea.vmem %s4903_s5, %s4413_s1 }
 0x996   : > { %v4617_v21 = vld [vmem:[%s821_s27] sm:$0xff]  ;;  %s4908_s27 = smov 72  }
 0x997   : > { %vm2182_vm6 = vcmp.eq.f32.partialorder %v4617_v21, 0.0  ;;  %v2097_v21 = vld [vmem:[%s4833_s14 + $0x18] sm:$0xff] }
 0x9a8   : > { %v1641_v27 = vpop.f32.mrb[10].mxu0 }
 0x9a9   : > { %v1645_v28 = vadd.f32 %v1641_v27, %v1405_v5  ;;  %v3655_v29 = vpop.f32.mrb[11].mxu0 }
 0xa06   : > { %v1733_v30 = vpop.xlane.xlu0 %1732 }
 0xa07   : > { %3917 = vrcp.f32 %v1733_v30 }
 0xa0a   : > { %v1737_v31 = vpop.permute.xlu0 %1736 }
 0xa0b   : > { %3662 = vmatpush3.msra.mxu0 %v1737_v31 }
 0xa0c   : > { %3789 = vmatprep.subr.bf16.mxu0 %v4106_v0 }
 0xa11   : > { %v3918_v32 = vpop.eup %3917 }
 0xa12   : > { %v1735_v33 = vmul.f32 %v3918_v32, %v3916_v25 }
 0xa14   : > { %3664 = vmatmul.mubr.msk.f32.vlgmr.msra.gmra.mrb[12].mxu0 %vm927_vm2, %v1735_v33 }
 0xa15   : > { %3679 = vmatprep.mubr.msk.f32.mxu0 %vm4107_vm0, %v4108_v1 }
 0xae7   : > { %v1808_v11 = vpop.f32.mrb[12].mxu0 }
 0xae8   : > { %v3665_v34 = vpop.f32.mrb[13].mxu0  ;;  %3669 = vmatmul.mubr.msk.f32.vlgmr.msra.gmra.mrb[10].mxu1 %vm927_vm2, %v1808_v11 }
 0xae9   : > { %3690 = vmatprep.mubr.msk.f32.mxu1 %vm4107_vm0, %v4108_v1  ;;  %3797 = vmatpush3.bf16.msra.mxu1 %v3796_v47 }
 0xaea   : > { %3798 = vmatprep.subr.bf16.mxu1 %v4106_v0 }
 0xaed   : > { %3800 = vmatpush3.bf16.msra.mxu1 %v3799_v54  ;;  %v2095_v54 = vld [vmem:[%s4833_s14 + $0x8] sm:$0xff] }
 0xaee   : > { %3698 = vmatprep.subr.mxu1 %v4108_v1 }
 0xaf0   : > { %3691 = vmatmul.mubr.msk.f32.vlgmr.msra.gmra.mrb[12].mxu1 %vm837_vm1, %v823_v56 }
 0xaf1   : > { %3700 = vmatprep.mubr.msk.f32.mxu1 %vm4107_vm0, %v4108_v1 }
 0xbbb   : > { %v1881_v35 = vpop.f32.mrb[10].mxu1 }
 0xbbc   : > { %v1885_v36 = vadd.f32 %v1881_v35, %v1645_v28  ;;  %v3670_v37 = vpop.f32.mrb[11].mxu1  ;;  %v2094_v35 = vld [vmem:[%s4833_s14] sm:$0xff] }
 0xbbe   : > { %v1886_v38 = vadd.f32 %v1885_v36, %v4420_v8  ;;  %v1925_v8 = vld [vmem:[%s4829_s10] sm:$0xff] }
 0xbbf   : > { %v3790_v51 = vpack.c.bf16 %v1926_v48, %v1925_v8 }
 0xbc0   : > { %v1889_v39 = vsel %vm837_vm1, %v1886_v38, 0.0 }
 0xbc1   : > { %1890 = vadd.xlane.f32.xlu0 %v1889_v39  ;;  %3791 = vmatpush3.bf16.msra.mxu0 %v3790_v51 }
 0xbc2   : > { %3792 = vmatprep.subr.bf16.mxu0 %v4106_v0 }
 0xbc3   : > { %v2090_v12 = vpop.f32.mrb[12].mxu1 }
 0xbc4   : > { %v4597_v13 = vadd.f32 %v3492_v10, %v2090_v12  ;;  %v3692_v14 = vpop.f32.mrb[13].mxu1 }
 0xbc5   : > { %3794 = vmatpush3.bf16.msra.mxu0 %v3793_v55 }
 0xbc6   : > { %3693 = vmatprep.subr.mxu0 %v4108_v1 }
 0xbd7   : > { %2347 = vrot.lane.b32.xlu0 %v4597_v13, %s4114_s28 }
 0xc4e   : > { %v1891_v40 = vpop.xlane.xlu0 %1890 }
 0xc4f   : > { %v1893_v41 = vmul.f32 0.03125, %v1891_v40 }
 0xc51   : > { %v1894_v42 = vsub.f32 %v1886_v38, %v1893_v41 }
 0xc52   : > { %v2348_v11 = vpop.permute.xlu0 %2347 }
 0xc53   : > { %v1895_v43 = vmul.f32 %v1894_v42, %v1894_v42  ;;  %v1916_v4 = vmul.f32 %v3488_v3, %v1894_v42 }
 0xc55   : > { %v1896_v44 = vsel %vm837_vm1, %v1895_v43, 0.0 }
 0xc56   : > { %1897 = vadd.xlane.f32.xlu1 %v1896_v44 }
 0xce3   : > { %v1898_v57 = vpop.xlane.xlu1 %1897 }
 0xce4   : > { %v1900_v58 = vmul.f32 0.032258064, %v1898_v57 }
 0xce6   : > { %3919 = vrsqrt.f32 %v1900_v58  ;;  %vm1903_vm4 = vcmp.eq.f32.partialorder %v1900_v58, inf  ;;  %v1906_v61 = vand.u32 2147483648, %v1900_v58  ;;  %vm1905_vm5 = vcmp.eq.f32.partialorder %v1900_v58, 0.0 }
 0xcf0   : > { %v3920_v59 = vpop.eup %3919 }
 0xcf1   : > { %v1902_v60 = vmul.f32 %v3920_v59, %v1900_v58 }
 0xcf3   : > { %v1904_v62 = vsel %vm1903_vm4, %v1900_v58, %v1902_v60 }
 0xcf4   : > { %v1907_v63 = vsel %vm1905_vm5, %v1906_v61, %v1904_v62 }
 0xcf5   : > { %v1908_v2 = vadd.f32 1e-06, %v1907_v63 }
 0xcf7   : > { %3921 = vrcp.f32 %v1908_v2 }
 0xd01   : > { %v3922_v5 = vpop.eup %3921 }
 0xd02   : > { %v1917_v7 = vmul.f32 %v3922_v5, %v1916_v4  ;;  %v3494_v5 = vld [vmem:[%s4834_s15] ss:$0 sm:$0xff] }
 0xd04   : > { %v4588_v9 = vadd.f32 %v3489_v6, %v1917_v7 }
 0xd06   : > { %3680 = vmatmul.mubr.msk.f32.vlgmr.msra.gmra.mrb[14].mxu0 %vm837_vm1, %v4588_v9 }
 0xd07   : > { %3695 = vmatprep.mubr.msk.f32.mxu0 %vm4107_vm0, %v4108_v1  ;;  %3694 = vmatpush3.xpose.msk.msra.mxu0 %vm927_vm2, %v4597_v13 }
 0xd08   : > { %3703 = vmatprep.subr.mxu0 %v4108_v1 }
 0xdd9   : > { %v2005_v17 = vpop.f32.mrb[14].mxu0 }
 0xdda   : > { %v2006_v18 = vadd.f32 %v3490_v15, %v2005_v17  ;;  %v3681_v19 = vpop.f32.mrb[15].mxu0 }
 0xddc   : > { %v4607_v20 = vmul.f32 0.35355338, %v2006_v18 }
 0xdde   : > { %3696 = vmatmul.mubr.msk.f32.vlgmr.msra.gmra.mrb[16].mxu0 %vm927_vm2, %v4607_v20 }
 0xddf   : > { %3705 = vmatprep.mubr.msk.f32.mxu0 %vm4107_vm0, %v4108_v1  ;;  %3704 = vmatpush3.msra.mxu0 %v2094_v35 }
 0xde0   : > { %3713 = vmatprep.subr.mxu0 %v4108_v1 }
 0xeb1   : > { %v2178_v22 = vpop.f32.mrb[16].mxu0 }
 0xeb2   : > { %v2183_v23 = vsel %vm2182_vm6, -1e+09, %v2178_v22  ;;  %v3697_v24 = vpop.f32.mrb[17].mxu0 }
 0xeb3   : > { %v2184_v25 = vsel %vm927_vm2, %v2183_v23, -inf }
 0xeb4   : > { %2185 = vmax.xlane.f32.xlu1 %v2184_v25 }
 0xec5   : > { %2195 = vrot.lane.b32.xlu1 %v4597_v13, %s4110_s24 }
 0xf41   : > { %v2186_v26 = vpop.xlane.xlu1 %2185 }
 0xf42   : > { %v2187_v16 = vsub.f32 %v2183_v23, %v2186_v26 }
 0xf44   : > { %v2188_v27 = vmul.f32 1.442695, %v2187_v16 }
 0xf45   : > { %v2196_v28 = vpop.permute.xlu1 %2195 }
 0xf46   : > { %3923 = vpow2.f32 %v2188_v27  ;;  %3699 = vmatpush3.msra.mxu1 %v2196_v28 }
 0xf47   : > { %3708 = vmatprep.subr.mxu1 %v4108_v1 }
 0xf50   : > { %v3924_v29 = vpop.eup %3923 }
 0xf51   : > { %v2190_v30 = vsel %vm927_vm2, %v3924_v29, 0.0 }
 0xf52   : > { %2191 = vadd.xlane.f32.xlu1 %v2190_v30 }
 0xf63   : > { %2345 = vrot.lane.b32.xlu1 %v4607_v20, %s4114_s28  ;;  %s4904_s28 = smov 88  }
 0xfdf   : > { %v2192_v31 = vpop.xlane.xlu1 %2191 }
 0xfe0   : > { %3925 = vrcp.f32 %v2192_v31 }
 0xfe3   : > { %v2346_v34 = vpop.permute.xlu1 %2345 }
 0xfea   : > { %v3926_v32 = vpop.eup %3925 }
 0xfeb   : > { %v2194_v33 = vmul.f32 %v3926_v32, %v3924_v29 }
 0xfed   : > { %3701 = vmatmul.mubr.msk.f32.vlgmr.msra.gmra.mrb[14].mxu1 %vm927_vm2, %v2194_v33 }
 0xfee   : > { %3709 = vmatpush3.xpose.msk.msra.mxu1 %vm927_vm2, %v2348_v11  ;;  %3710 = vmatprep.mubr.msk.f32.mxu1 %vm4107_vm0, %v4108_v1 }
 0xfef   : > { %3718 = vmatprep.subr.mxu1 %v4108_v1 }
 0xff1   : > { %3711 = vmatmul.mubr.msk.f32.vlgmr.msra.gmra.mrb[16].mxu1 %vm927_vm2, %v2346_v34 }
 0xff2   : > { %3720 = vmatprep.mubr.msk.f32.mxu1 %vm4107_vm0, %v4108_v1  ;;  %3719 = vmatpush3.msra.mxu1 %v2095_v54  ;;  %v3189_v54 = vld [vmem:[%s4839_s20 + $0x10] sm:$0xff] }
 0xff3   : > { %3728 = vmatprep.subr.mxu1 %v4108_v1 }
0x10c0   : > { %v2267_v36 = vpop.f32.mrb[14].mxu1 }
0x10c1   : > { %v3702_v37 = vpop.f32.mrb[15].mxu1  ;;  %3706 = vmatmul.mubr.msk.f32.vlgmr.msra.gmra.mrb[18].mxu0 %vm927_vm2, %v2267_v36 }
0x10c2   : > { %3715 = vmatprep.mubr.msk.f32.mxu0 %vm4107_vm0, %v4108_v1 }
0x10c4   : > { %v2419_v38 = vpop.f32.mrb[16].mxu1 }
0x10c5   : > { %v2423_v39 = vsel %vm2182_vm6, -1e+09, %v2419_v38  ;;  %v3712_v40 = vpop.f32.mrb[17].mxu1 }
0x10c6   : > { %v2424_v41 = vsel %vm927_vm2, %v2423_v39, -inf }
0x10c7   : > { %2425 = vmax.xlane.f32.xlu1 %v2424_v41 }
0x10d8   : > { %2435 = vrot.lane.b32.xlu1 %v4597_v13, %s4904_s28  ;;  %s4911_s28 = sld [smem:[#allocation29_spill]] }
0x10dc   : > { %2585 = vrot.lane.b32.xlu1 %v4607_v20, %s4905_s8 }
0x10de   : > { %s4776_s0 = scalar_lea.hbm %s4911_s28, %s3520_s29 }
0x1154   : > { %v2426_v42 = vpop.xlane.xlu1 %2425 }
0x1155   : > { %v2427_v43 = vsub.f32 %v2423_v39, %v2426_v42 }
0x1157   : > { %v2428_v44 = vmul.f32 1.442695, %v2427_v43 }
0x1158   : > { %v2436_v45 = vpop.permute.xlu1 %2435 }
0x1159   : > { %3927 = vpow2.f32 %v2428_v44  ;;  %3714 = vmatpush3.msra.mxu0 %v2436_v45 }
0x115a   : > { %3723 = vmatprep.subr.mxu0 %v4108_v1 }
0x115c   : > { %v2586_v53 = vpop.permute.xlu1 %2585 }
0x1163   : > { %v3928_v46 = vpop.eup %3927 }
0x1164   : > { %v2430_v8 = vsel %vm927_vm2, %v3928_v46, 0.0 }
0x1165   : > { %2431 = vadd.xlane.f32.xlu0 %v2430_v8 }
0x117b   : > { %2587 = vrot.lane.b32.xlu0 %v4597_v13, %s4905_s8  ;;  %s4912_s8 = smov %s4911_s28 }
0x1194   : > { %v2340_v47 = vpop.f32.mrb[18].mxu0 }
0x1195   : > { %v3707_v48 = vpop.f32.mrb[19].mxu0  ;;  %v2344_v6 = vadd.f32 %v3494_v5, %v2340_v47 }
0x1196   : > { %v3102_v48 = vld [vmem:[%s4837_s18] sm:$0xff] }
0x11f2   : > { %v2432_v49 = vpop.xlane.xlu0 %2431 }
0x11f3   : > { %3929 = vrcp.f32 %v2432_v49 }
0x11f6   : > { %v2588_v52 = vpop.permute.xlu0 %2587 }
0x11fd   : > { %v3930_v50 = vpop.eup %3929 }
0x11fe   : > { %v2434_v51 = vmul.f32 %v3930_v50, %v3928_v46  ;;  %v3105_v50 = vld [vmem:[%s4837_s18 + $0x18] sm:$0xff] }
0x1200   : > { %3716 = vmatmul.mubr.msk.f32.vlgmr.msra.gmra.mrb[20].mxu0 %vm927_vm2, %v2434_v51 }
0x1201   : > { %3724 = vmatpush3.xpose.msk.msra.mxu0 %vm927_vm2, %v2588_v52  ;;  %3725 = vmatprep.mubr.msk.f32.mxu0 %vm4107_vm0, %v4108_v1  ;;  %v3187_v52 = vld [vmem:[%s4839_s20] sm:$0xff] }
0x1202   : > { %3733 = vmatprep.subr.mxu0 %v4108_v1 }
0x1204   : > { %3726 = vmatmul.mubr.msk.f32.vlgmr.msra.gmra.mrb[22].mxu0 %vm927_vm2, %v2586_v53  ;;  %v3188_v53 = vld [vmem:[%s4839_s20 + $0x8] sm:$0xff] }
0x1205   : > { %3735 = vmatprep.mubr.msk.f32.mxu0 %vm4107_vm0, %v4108_v1 }
0x12d3   : > { %v2507_v55 = vpop.f32.mrb[20].mxu0 }
0x12d4   : > { %v3717_v56 = vpop.f32.mrb[21].mxu0  ;;  %3721 = vmatmul.mubr.msk.f32.vlgmr.msra.gmra.mrb[18].mxu1 %vm927_vm2, %v2507_v55  ;;  %v3808_v55 = vpack.c.bf16 %v3188_v53, %v3187_v52 }
0x12d5   : > { %3730 = vmatprep.mubr.msk.f32.mxu1 %vm4107_vm0, %v4108_v1  ;;  %v3190_v56 = vld [vmem:[%s4839_s20 + $0x18] sm:$0xff] }
0x12d7   : > { %v2659_v57 = vpop.f32.mrb[22].mxu0 }
0x12d8   : > { %v2663_v58 = vsel %vm2182_vm6, -1e+09, %v2659_v57  ;;  %v3727_v59 = vpop.f32.mrb[23].mxu0  ;;  %v3811_v57 = vpack.c.bf16 %v3190_v56, %v3189_v54 }
0x12d9   : > { %v2664_v60 = vsel %vm927_vm2, %v2663_v58, -inf  ;;  %v3192_v59 = vld [vmem:[%s4839_s20 + $0x28] sm:$0xff] }
0x12da   : > { %2665 = vmax.xlane.f32.xlu1 %v2664_v60 }
0x12eb   : > { %2675 = vrot.lane.b32.xlu1 %v4597_v13, %s4906_s4  ;;  %s4909_s4 = sld [smem:[#allocation13_spill]] }
0x12ef   : > { %2825 = vrot.lane.b32.xlu1 %v4607_v20, %s4907_s3  ;;  %v2096_v20 = vld [vmem:[%s4833_s14 + $0x10] sm:$0xff] }
0x12f0   : > { %3734 = vmatpush3.msra.mxu0 %v2096_v20  ;;  %v3513_v20 = vld [vmem:[%s4838_s19] ss:$0 sm:$0xff] }
0x12f1   : > { %3743 = vmatprep.subr.mxu0 %v4108_v1 }
0x1367   : > { %v2666_v61 = vpop.xlane.xlu1 %2665 }
0x1368   : > { %v2667_v62 = vsub.f32 %v2663_v58, %v2666_v61  ;;  %v3191_v58 = vld [vmem:[%s4839_s20 + $0x20] sm:$0xff] }
0x1369   : > { %v3814_v60 = vpack.c.bf16 %v3192_v59, %v3191_v58 }
0x136a   : > { %v2668_v63 = vmul.f32 1.442695, %v2667_v62 }
0x136b   : > { %v2676_v2 = vpop.permute.xlu1 %2675 }
0x136c   : > { %3931 = vpow2.f32 %v2668_v63  ;;  %3729 = vmatpush3.msra.mxu1 %v2676_v2 }
0x136d   : > { %3738 = vmatprep.subr.mxu1 %v4108_v1 }
0x136f   : > { %v2826_v19 = vpop.permute.xlu1 %2825 }
0x1376   : > { %v3932_v3 = vpop.eup %3931 }
0x1377   : > { %v2670_v4 = vsel %vm927_vm2, %v3932_v3, 0.0 }
0x1378   : > { %2671 = vadd.xlane.f32.xlu0 %v2670_v4 }
0x138e   : > { %2827 = vrot.lane.b32.xlu0 %v4597_v13, %s4907_s3  ;;  %s803_s3 = sand.u32 1, %s4909_s4  }
0x138f   : > { %s3464_s25 = sshll.u32 %s803_s3, 3  ;;  %s3315_s30 = scalar_lea.sflag [#allocation4], %s803_s3 }
0x1390   : > { %s805_s5 = scalar_lea.vmem [#allocation8], %s3464_s25  ;;  %s4035_s25 = sshll.u32 %s4120_s6, 4  ;;  %s4036_s25 = int_to_ptr.vmem [resolvable:$false] %s4035_s25 }
0x1391   : > { %s4037_s2 = scalar_lea.vmem %s4036_s25, 256 }
0x13a7   : > { %v2580_v7 = vpop.f32.mrb[18].mxu1 }
0x13a8   : > { %v2584_v10 = vadd.f32 %v2580_v7, %v2344_v6  ;;  %v3722_v12 = vpop.f32.mrb[19].mxu1  ;;  %v3511_v7 = vld [vmem:[%s4835_s16] ss:$0 sm:$0xff] }
0x1405   : > { %v2672_v14 = vpop.xlane.xlu0 %2671 }
0x1406   : > { %3933 = vrcp.f32 %v2672_v14 }
0x1409   : > { %v2828_v18 = vpop.permute.xlu0 %2827 }
0x1410   : > { %v3934_v15 = vpop.eup %3933 }
0x1411   : > { %v2674_v17 = vmul.f32 %v3934_v15, %v3932_v3 }
0x1413   : > { %3731 = vmatmul.mubr.msk.f32.vlgmr.msra.gmra.mrb[20].mxu1 %vm927_vm2, %v2674_v17  ;;  %v3193_v17 = vld [vmem:[%s4839_s20 + $0x30] sm:$0xff] }
0x1414   : > { %3739 = vmatpush3.xpose.msk.msra.mxu1 %vm927_vm2, %v2828_v18  ;;  %3740 = vmatprep.mubr.msk.f32.mxu1 %vm4107_vm0, %v4108_v1  ;;  %v3194_v18 = vld [vmem:[%s4839_s20 + $0x38] sm:$0xff] }
0x1415   : > { %3748 = vmatprep.subr.mxu1 %v4108_v1 }
0x1417   : > { %3741 = vmatmul.mubr.msk.f32.vlgmr.msra.gmra.mrb[22].mxu1 %vm927_vm2, %v2826_v19  ;;  %v3817_v19 = vpack.c.bf16 %v3194_v18, %v3193_v17 }
0x1418   : > { %3750 = vmatprep.mubr.msk.f32.mxu1 %vm4107_vm0, %v4108_v1  ;;  %3749 = vmatpush3.msra.mxu1 %v2097_v21 }
0x1419   : > { %3807 = vmatprep.subr.bf16.mxu1 %v4106_v0 }
0x14e6   : > { %v2747_v22 = vpop.f32.mrb[20].mxu1 }
0x14e7   : > { %v3732_v23 = vpop.f32.mrb[21].mxu1  ;;  %3736 = vmatmul.mubr.msk.f32.vlgmr.msra.gmra.mrb[24].mxu0 %vm927_vm2, %v2747_v22 }
0x14e8   : > { %3745 = vmatprep.mubr.msk.f32.mxu0 %vm4107_vm0, %v4108_v1 }
0x14ea   : > { %v2899_v24 = vpop.f32.mrb[22].mxu1 }
0x14eb   : > { %v2903_v25 = vsel %vm2182_vm6, -1e+09, %v2899_v24  ;;  %v3742_v26 = vpop.f32.mrb[23].mxu1 }
0x14ec   : > { %v2904_v16 = vsel %vm927_vm2, %v2903_v25, -inf  ;;  %v3515_v26 = vld [vmem:[#allocation2] ss:$0 sm:$0xff] }
0x14ed   : > { %2905 = vmax.xlane.f32.xlu1 %v2904_v16 }
0x14fe   : > { %2915 = vrot.lane.b32.xlu1 %v4597_v13, %s4908_s27  ;;  %s3328_s27 = sshll.u32 %s805_s5, 4  ;;  %s4778_s27 = int_to_ptr.vmem [resolvable:$true] %s3328_s27 }
0x14ff   : > { %s4031_s4 = scalar_lea.vmem %s4778_s27, 128  ;;  %p4038_p4 = scmp.lt.s32.totalorder %s4778_s27, %s4036_s25 }
0x1500   : > { %p4032_p12 = scmp.ne.s32.totalorder %s4778_s27, %s4031_s4  ;;  %p4039_p7 = scmp.lt.s32.totalorder %s4037_s2, %s4031_s4 }
0x1502   : > { %p4033_p2 = pnand %p4032_p12, %p4913_p10  ;;  %p4040_p8 = por %p4039_p7, %p4038_p4 }
0x1504   : > { %p4034_p3 = pneg %p4033_p2 }
0x1506   : > { %p4041_p11 = pnand %p4040_p8, %p4034_p3 }
0x157a   : > { %v2906_v27 = vpop.xlane.xlu1 %2905 }
0x157b   : > { %v2907_v28 = vsub.f32 %v2903_v25, %v2906_v27 }
0x157d   : > { %v2908_v29 = vmul.f32 1.442695, %v2907_v28 }
0x157e   : > { %v2916_v30 = vpop.permute.xlu1 %2915 }
0x157f   : > { %3935 = vpow2.f32 %v2908_v29  ;;  %3744 = vmatpush3.msra.mxu0 %v2916_v30 }
0x1580   : > { %3801 = vmatprep.subr.bf16.mxu0 %v4106_v0 }
0x1589   : > { %v3936_v31 = vpop.eup %3935 }
0x158a   : > { %v2910_v32 = vsel %vm927_vm2, %v3936_v31, 0.0 }
0x158b   : > { %2911 = vadd.xlane.f32.xlu0 %v2910_v32 }
0x15ba   : > { %v2820_v13 = vpop.f32.mrb[24].mxu0 }
0x15bb   : > { %v2824_v33 = vadd.f32 %v2820_v13, %v2584_v10  ;;  %v3737_v11 = vpop.f32.mrb[25].mxu0 }
0x1618   : > { %v2912_v34 = vpop.xlane.xlu0 %2911 }
0x1619   : > { %3937 = vrcp.f32 %v2912_v34 }
0x1623   : > { %v3938_v35 = vpop.eup %3937 }
0x1624   : > { %v2914_v36 = vmul.f32 %v3938_v35, %v3936_v31 }
0x1626   : > { %3746 = vmatmul.mubr.msk.f32.vlgmr.msra.gmra.mrb[26].mxu0 %vm927_vm2, %v2914_v36 }
0x1627   : > { %3761 = vmatprep.mubr.msk.f32.mxu0 %vm4107_vm0, %v4108_v1 }
0x16f9   : > { %v2987_v37 = vpop.f32.mrb[26].mxu0 }
0x16fa   : > { %v3747_v38 = vpop.f32.mrb[27].mxu0  ;;  %3751 = vmatmul.mubr.msk.f32.vlgmr.msra.gmra.mrb[24].mxu1 %vm927_vm2, %v2987_v37 }
0x16fb   : > { %3780 = vmatprep.mubr.msk.f32.mxu1 %vm4107_vm0, %v4108_v1  ;;  %v3103_v1 = vld [vmem:[%s4837_s18 + $0x8] sm:$0xff]  ;;  %3809 = vmatpush3.bf16.msra.mxu1 %v3808_v55 }
0x16fc   : > { %v3802_v49 = vpack.c.bf16 %v3103_v1, %v3102_v48  ;;  %3810 = vmatprep.subr.bf16.mxu1 %v4106_v0 }
0x16fe   : > { %3803 = vmatpush3.bf16.msra.mxu0 %v3802_v49 }
0x16ff   : > { %3804 = vmatprep.subr.bf16.mxu0 %v4106_v0  ;;  %3812 = vmatpush3.bf16.msra.mxu1 %v3811_v57 }
0x1700   : > { %3813 = vmatprep.subr.bf16.mxu1 %v4106_v0 }
0x1703   : > { %3815 = vmatpush3.bf16.msra.mxu1 %v3814_v60 }
0x1704   : > { %3816 = vmatprep.subr.bf16.mxu1 %v4106_v0  ;;  %v3512_v0 = vld [vmem:[%s4836_s17] ss:$0 sm:$0xff] }
0x1707   : > { %3818 = vmatpush3.bf16.msra.mxu1 %v3817_v19 }
0x17cd   : > { %v3060_v39 = vpop.f32.mrb[24].mxu1 }
0x17ce   : > { %v3064_v40 = vadd.f32 %v3060_v39, %v2824_v33  ;;  %v3752_v41 = vpop.f32.mrb[25].mxu1 }
0x17cf   : > { %v3517_v41 = vld [vmem:[#allocation5] ss:$0 sm:$0xff] }
0x17d0   : > { %v3065_v42 = vadd.f32 %v3064_v40, %v4588_v9  ;;  %v3104_v9 = vld [vmem:[%s4837_s18 + $0x10] sm:$0xff] }
0x17d1   : > { %v3805_v51 = vpack.c.bf16 %v3105_v50, %v3104_v9 }
0x17d2   : > { %v3068_v43 = vsel %vm837_vm1, %v3065_v42, 0.0 }
0x17d3   : > { %3069 = vadd.xlane.f32.xlu0 %v3068_v43  ;;  %3806 = vmatpush3.bf16.msra.mxu0 %v3805_v51 }
0x1860   : > { %v3070_v44 = vpop.xlane.xlu0 %3069 }
0x1861   : > { %v3071_v45 = vmul.f32 0.03125, %v3070_v44  ;;  %v3518_v44 = vld [vmem:[#allocation7] ss:$0 sm:$0xff] }
0x1863   : > { %v3072_v46 = vsub.f32 %v3065_v42, %v3071_v45 }
0x1865   : > { %v3073_v8 = vmul.f32 %v3072_v46, %v3072_v46  ;;  %v3093_v10 = vmul.f32 %v3511_v7, %v3072_v46 }
0x1867   : > { %v3074_v47 = vsel %vm837_vm1, %v3073_v8, 0.0 }
0x1868   : > { %3075 = vadd.xlane.f32.xlu0 %v3074_v47 }
0x18f5   : > { %v3076_v61 = vpop.xlane.xlu0 %3075 }
0x18f6   : > { %v3077_v62 = vmul.f32 0.032258064, %v3076_v61 }
0x18f8   : > { %3939 = vrsqrt.f32 %v3077_v62  ;;  %vm3080_vm7 = vcmp.eq.f32.partialorder %v3077_v62, inf  ;;  %v3083_v3 = vand.u32 2147483648, %v3077_v62  ;;  %vm3082_vm8 = vcmp.eq.f32.partialorder %v3077_v62, 0.0 }
0x1902   : > { %v3940_v63 = vpop.eup %3939 }
0x1903   : > { %v3079_v2 = vmul.f32 %v3940_v63, %v3077_v62 }
0x1905   : > { %v3081_v4 = vsel %vm3080_vm7, %v3077_v62, %v3079_v2 }
0x1906   : > { %v3084_v5 = vsel %vm3082_vm8, %v3083_v3, %v3081_v4 }
0x1907   : > { %v3085_v6 = vadd.f32 1e-06, %v3084_v5 }
0x1909   : > { %3941 = vrcp.f32 %v3085_v6 }
0x1913   : > { %v3942_v12 = vpop.eup %3941 }
0x1914   : > { %v3094_v14 = vmul.f32 %v3942_v12, %v3093_v10 }
0x1916   : > { %v3101_v15 = vadd.f32 %v3512_v0, %v3094_v14 }
0x1918   : > { %3762 = vmatmul.mubr.msk.f32.vlgmr.msra.gmra.mrb[28].mxu0 %vm837_vm1, %v3101_v15 }
0x19eb   : > { %v3182_v22 = vpop.f32.mrb[28].mxu0 }
0x19ec   : > { %v3183_v23 = vadd.f32 %v3513_v20, %v3182_v22  ;;  %v3763_v24 = vpop.f32.mrb[29].mxu0 }
0x19ee   : > { %v3186_v25 = vmax.f32 %v3183_v23, 0.0 }
0x19f0   : > { %3781 = vmatmul.mubr.msk.f32.vlgmr.msra.gmra.mrb[26].mxu1 %vm3202_vm9, %v3186_v25 }
0x1ac3   : > { %v3272_v16 = vpop.f32.mrb[26].mxu1 }
0x1ac4   : > { %v3273_v27 = vadd.f32 %v3515_v26, %v3272_v16  ;;  %v3782_v28 = vpop.f32.mrb[27].mxu1 }
0x1ac6   : > { %v3276_v29 = vadd.f32 %v3273_v27, %v3101_v15 }
0x1ac8   : > { %v3279_v30 = vsel %vm837_vm1, %v3276_v29, 0.0 }
0x1ac9   : > { %3280 = vadd.xlane.f32.xlu0 %v3279_v30 }
0x1b56   : > { %v3281_v31 = vpop.xlane.xlu0 %3280 }
0x1b57   : > { %v3282_v32 = vmul.f32 0.03125, %v3281_v31 }
0x1b59   : > { %v3283_v21 = vsub.f32 %v3276_v29, %v3282_v32 }
0x1b5b   : > { %v3284_v13 = vmul.f32 %v3283_v21, %v3283_v21  ;;  %v3304_v42 = vmul.f32 %v3517_v41, %v3283_v21 }
0x1b5d   : > { %v3285_v33 = vsel %vm837_vm1, %v3284_v13, 0.0 }
0x1b5e   : > { %3286 = vadd.xlane.f32.xlu0 %v3285_v33 }
0x1beb   : > { %v3287_v11 = vpop.xlane.xlu0 %3286 }
0x1bec   : > { %v3288_v34 = vmul.f32 0.032258064, %v3287_v11 }
0x1bee   : > { %3943 = vrsqrt.f32 %v3288_v34  ;;  %vm3291_vm10 = vcmp.eq.f32.partialorder %v3288_v34, inf  ;;  %v3294_v37 = vand.u32 2147483648, %v3288_v34  ;;  %vm3293_vm11 = vcmp.eq.f32.partialorder %v3288_v34, 0.0 }
0x1bf8   : > { %v3944_v35 = vpop.eup %3943 }
0x1bf9   : > { %v3290_v36 = vmul.f32 %v3944_v35, %v3288_v34 }
0x1bfb   : > { %v3292_v38 = vsel %vm3291_vm10, %v3288_v34, %v3290_v36 }
0x1bfc   : > { %v3295_v39 = vsel %vm3293_vm11, %v3294_v37, %v3292_v38 }
0x1bfd   : > { %v3296_v40 = vadd.f32 1e-06, %v3295_v39 }
0x1bff   : > { %3945 = vrcp.f32 %v3296_v40 }
0x1c09   : > { %v3946_v43 = vpop.eup %3945 }
0x1c0a   : > { %v3305_v45 = vmul.f32 %v3946_v43, %v3304_v42 }
0x1c0c   : > { %v3312_v46 = vadd.f32 %v3518_v44, %v3305_v45 }
0x1c0e   : > { %3313 = vst.msk [vmem:[%s805_s5] sm:$0xff] %vm837_vm1, %v3312_v46 }
0x1c0f   : > { %4044 = shalt.err (!%p4041_p11)
}
0x1c10   : > { %s4045_s3 = scalar_lea.hbm %s4776_s0, 128  ;;  %s4049_s1 = scalar_lea.hbm %s4912_s8, 256 }
0x1c11   : > { %p4046_p13 = scmp.ne.s32.totalorder %s4776_s0, %s4045_s3  ;;  %p4050_p6 = scmp.lt.u32.totalorder %s4776_s0, %s4912_s8 }
0x1c12   : > { %p4051_p5 = scmp.lt.u32.totalorder %s4049_s1, %s4045_s3  ;;  %p4053_p12 = scmp.lt.u32.totalorder %s4045_s3, %s4776_s0 }
0x1c13   : > { %p4047_p0 = pnand %p4046_p13, %p4913_p10 }
0x1c14   : > { %p4052_p9 = por %p4051_p5, %p4050_p6 }
0x1c15   : > { %p4048_p1 = pneg %p4047_p0 }
0x1c16   : > { %p4054_p2 = por %p4053_p12, %p4052_p9 }
0x1c18   : > { %p4055_p3 = pnand %p4054_p2, %p4048_p1 }
0x1c1a   : > { %4058 = shalt.err (!%p4055_p3)
}
0x1c1b   : > { %3831 = dma.vmem_to_hbm [thread:$0]  (%p4913_p10), %s4778_s27, 128, %s4776_s0, %s3315_s30  }
0x1c1c PF: > { %s4914_s2 = sld [smem:[#allocation15_spill]]  ;;  %s4915_s4 = sld [smem:[#allocation12_spill]] }
0x1c1d   : > { %s4916_s6 = sld [smem:[#allocation19_spill]] }
0x1c22   : > { %p3853_p4 = scmp.ge.s32.totalorder %s4914_s2, 2  ;;  %s3340_s25 = sand.u32 1, %s4915_s4  }
0x1c23   : > { %p4917_p7 = scmp.ne.s32.totalorder %s4916_s6, 0  ;;  %s3341_s29 = scalar_lea.sflag [#allocation4], %s3340_s25 }
0x1c25   : > { %p3844_p8 = pnand %p3853_p4, %p4917_p7 }
0x1c27   : > { %4084 = dma.done.wait (!%p3844_p8), %s3341_s29, 128  }
0x1c28   : > { %4086 = vsyncadd (!%p3844_p8), %s3341_s29, 4294967168  ;;  %s4918_s28 = sld [smem:[#allocation16_spill]]  ;;  %s4919_s5 = sld [smem:[#allocation13_spill]] }
0x1c29   : > { %s4920_s26 = sld [smem:[#allocation14_spill]]  ;;  %s4921_s27 = sld [smem:[#allocation17_spill]] }
0x1c2e   : > { %p36_p11 = scmp.ge.s32.totalorder %s4918_s28, 4  }
0x1c30   :  { %38 = sbr.rel (!%p36_p11) target bundleno = 16 (0x10), region = 173 }
0x1c37   :  { %3346 = vsyncpa [#allocation3], 1 }
0x1c38   :  { %3348 = vsyncpa [#allocation3 + $0x1], 1 }
0x1c39   :  { %3349 = vsyncpa [#allocation6], 1 }
0x1c3a   :  { %3350 = vsyncpa [#allocation4], 1 }
0x1c3b   :  { %3352 = vsyncpa [#allocation4 + $0x1], 1 }

// kernel: decoder_forward.2
= control target key start
LH: loop header
LB: loop body
LE: loop exit
PB: predicated region body
PF: predicated region fallthrough
CT: control target
= control target key end

     0   :  { %s4337_s0 = inlined_call_operand.vmem [shape: f32[2,8,32], index: 0, kind: input, shape index: {}]   ;;  %s4338_s1 = inlined_call_operand.vmem [shape: f32[2,8,32], index: 1, kind: input, shape index: {}]   ;;  %s4339_s2 = inlined_call_operand.vmem [shape: f32[2,8,8], index: 2, kind: input, shape index: {}]   ;;  %s4340_s3 = inlined_call_operand.vmem [shape: f32[2,8,8], index: 3, kind: input, shape index: {}]   ;;  %s4341_s4 = inlined_call_operand.vmem [shape: f32[32,96], index: 4, kind: input, shape index: {}]   ;;  %s4342_s5 = inlined_call_operand.vmem [shape: f32[1,96], index: 5, kind: input, shape index: {}]   ;;  %s4343_s6 = inlined_call_operand.vmem [shape: f32[32,32], index: 6, kind: input, shape index: {}]   ;;  %s4344_s7 = inlined_call_operand.vmem [shape: f32[1,32], index: 7, kind: input, shape index: {}]   ;;  %s4345_s8 = inlined_call_operand.vmem [shape: f32[1,32], index: 8, kind: input, shape index: {}]   ;;  %s4346_s9 = inlined_call_operand.vmem [shape: f32[1,32], index: 9, kind: input, shape index: {}]   ;;  %s4347_s10 = inlined_call_operand.vmem [shape: f32[32,32], index: 10, kind: input, shape index: {}]   ;;  %s4348_s11 = inlined_call_operand.vmem [shape: f32[1,32], index: 11, kind: input, shape index: {}]   ;;  %s4349_s12 = inlined_call_operand.vmem [shape: f32[32,64], index: 12, kind: input, shape index: {}]   ;;  %s4350_s13 = inlined_call_operand.vmem [shape: f32[1,64], index: 13, kind: input, shape index: {}]   ;;  %s4351_s14 = inlined_call_operand.vmem [shape: f32[32,32], index: 14, kind: input, shape index: {}]   ;;  %s4352_s15 = inlined_call_operand.vmem [shape: f32[1,32], index: 15, kind: input, shape index: {}]   ;;  %s4353_s16 = inlined_call_operand.vmem [shape: f32[1,32], index: 16, kind: input, shape index: {}]   ;;  %s4354_s17 = inlined_call_operand.vmem [shape: f32[1,32], index: 17, kind: input, shape index: {}]   ;;  %s4355_s18 = inlined_call_operand.vmem [shape: f32[32,64], index: 18, kind: input, shape index: {}]   ;;  %s4356_s19 = inlined_call_operand.vmem [shape: f32[1,64], index: 19, kind: input, shape index: {}]   ;;  %s4357_s20 = inlined_call_operand.vmem [shape: f32[64,32], index: 20, kind: input, shape index: {}]   ;;  %s4358_s21 = inlined_call_operand.vmem [shape: f32[1,32], index: 21, kind: input, shape index: {}]   ;;  %s4359_s22 = inlined_call_operand.vmem [shape: f32[1,32], index: 22, kind: input, shape index: {}]   ;;  %s4360_s23 = inlined_call_operand.vmem [shape: f32[1,32], index: 23, kind: input, shape index: {}]   ;;  %s4361_s24 = inlined_call_operand.vmem [shape: f32[2,8,32], index: 24, kind: output, shape index: {}]  }
   0x1   :  { %4372 = sst [smem:[#allocation2_spill]] %s4337_s0 }
   0x2   :  { %4373 = sst [smem:[#allocation3_spill]] %s4338_s1 }
   0x3   :  { %4374 = sst [smem:[#allocation4_spill]] %s4339_s2 }
   0x4   :  { %4375 = sst [smem:[#allocation5_spill]] %s4340_s3 }
   0x5   :  { %4376 = sst [smem:[#allocation6_spill]] %s4341_s4 }
   0x6   :  { %4377 = sst [smem:[#allocation7_spill]] %s4342_s5  ;;  %s3936_s5 = smov 0  }
   0x7   :  { %4378 = sst [smem:[#allocation8_spill]] %s4343_s6 }
   0x8   :  { %4379 = sst [smem:[#allocation9_spill]] %s4344_s7 }
   0x9   :  { %4380 = sst [smem:[#allocation10_spill]] %s4345_s8 }
   0xa LB: > { %s3365_s26 = sadd.s32 4294967295, %s3795_s5   ;;  %p3369_p0 = scmp.ge.s32.totalorder %s3795_s5, 1  ;;  %s3795_s5 = sphi %s3936_s5, %s34_s5  }
   0xb   : > { %p688_p1 = scmp.lt.s32.totalorder %s3795_s5, 3 }
   0xd   : > { %p689_p2 = pnand %p3369_p0, %p688_p1 }
   0xe   : > { %s4381_s6 = sld [smem:[#allocation6_spill]] (!%p689_p2)  ;;  %v3797_v3 = vmov (!%p689_p2), 0.0|0.0   ;;  %vm3798_vm0 = vmmov (!%p689_p2), 0   ;;  %v3799_v6 = vmov (!%p689_p2), 0.0   ;;  %p764_p3 = scmp.lt.s32.totalorder (!%p689_p2), %s3365_s26, 1  ;;  %vm799_vm1 = vcmask (!%p689_p2), 261120  }
   0xf   : > { %692 = sbr.rel (%p689_p2) target bundleno = 7085 (0x1bad), region = 116  ;;  %3687 = vmatprep.subr.bf16.mxu0 (!%p689_p2), %v3797_v3  ;;  %3512 = vmatprep.mubr.msk.f32.mxu0 (!%p689_p2), %vm3798_vm0, %v3799_v6  ;;  %s4382_s1 = sld [smem:[#allocation2_spill]] (!%p689_p2)  ;;  %vm889_vm2 = vcmask (!%p689_p2), 64512   ;;  %vm3164_vm9 = vcmask (!%p689_p2), 523264  }
  0x10   : > { %3520 = vmatprep.subr.mxu1 (!%p689_p2), %v3799_v6  ;;  %3522 = vmatprep.mubr.msk.f32.mxu1 (!%p689_p2), %vm3798_vm0, %v3799_v6  ;;  %s4383_s2 = sld [smem:[#allocation7_spill]] (!%p689_p2)  ;;  %s3800_s29 = smov (!%p689_p2), 64  }
  0x11   : > { %s4371_s0 = smov (!%p689_p2), 96   ;;  %s4370_s7 = smov (!%p689_p2), 88  }
  0x12   : > { %s4384_s8 = sld [smem:[#allocation4_spill]] (!%p689_p2)  ;;  %s3805_s28 = smov (!%p689_p2), 120  }
  0x13   : > { %s4368_s30 = smov (!%p689_p2), 112   ;;  %s3810_s3 = smov (!%p689_p2), 40  }
  0x14   : > { %v788_v0 = vld [vmem:[%s4381_s6] sm:$0xff] (!%p689_p2)  ;;  %v789_v1 = vld [vmem:[%s4381_s6 + $0x8] sm:$0xff] (!%p689_p2)  ;;  %v790_v2 = vld [vmem:[%s4381_s6 + $0x10] sm:$0xff] (!%p689_p2) }
  0x15   : > { %v3688_v4 = vpack.c.bf16 (!%p689_p2), %v789_v1, %v788_v0  ;;  %v791_v5 = vld [vmem:[%s4381_s6 + $0x18] sm:$0xff] (!%p689_p2) }
  0x16   : > { %v3691_v7 = vpack.c.bf16 %v791_v5, %v790_v2  ;;  %s4397_s26 = smov (!%p764_p3, %s3365_s26), 1  ;;  %v3375_v9 = vld [vmem:[%s4383_s2] ss:$0 sm:$0xff]  ;;  %s4394_s2 = smov 104  }
  0x17   : > { %3689 = vmatpush3.bf16.msra.mxu0 %v3688_v4  ;;  %s3963_s25 = sshll.u32 %s4397_s26, 3  ;;  %s4365_s26 = smov 104  }
  0x18   : > { %3690 = vmatprep.subr.bf16.mxu0 %v3797_v3  ;;  %s767_s27 = scalar_lea.vmem %s4382_s1, %s3963_s25  ;;  %s775_s4 = scalar_lea.vmem %s4384_s8, %s3963_s25 }
  0x19   : > { %v3969_v8 = vld [vmem:[%s767_s27] sm:$0xff]  ;;  %s3803_s1 = smov 56   ;;  %s4367_s27 = smov 80  }
  0x1a   : > { %v4000_v16 = vld [vmem:[%s775_s4] sm:$0xff]  ;;  %s3807_s4 = smov 48   ;;  %s4386_s8 = sld [smem:[#allocation9_spill]] }
  0x1b   : > { %3692 = vmatpush3.bf16.msra.mxu0 %v3691_v7  ;;  %vm965_vm3 = vcmp.eq.f32.partialorder %v4000_v16, 0.0 }
  0x1c   : > { %3515 = vmatprep.subr.mxu0 %v3799_v6 }
  0x1e   : > { %3513 = vmatmul.mubr.msk.f32.vlgmr.msra.gmra.mrb[0].mxu0 %vm799_vm1, %v3969_v8 }
  0x1f   : > { %3517 = vmatprep.mubr.msk.f32.mxu0 %vm3798_vm0, %v3799_v6 }
  0x20   : > { %v3377_v0 = vld [vmem:[%s4386_s8] ss:$0 sm:$0xff]  ;;  %s4388_s8 = sld [smem:[#allocation10_spill]] }
  0xf1   : > { %v869_v10 = vpop.f32.mrb[0].mxu0 }
  0xf2   : > { %v3979_v11 = vadd.f32 %v3375_v9, %v869_v10  ;;  %v3514_v12 = vpop.f32.mrb[1].mxu0 }
  0xf4   : > { %978 = vrot.lane.b32.xlu1 %v3979_v11, %s3800_s29  ;;  %887 = vrot.lane.b32.xlu0 %v3979_v11, %s4371_s0  ;;  %v3988_v15 = vmul.f32 0.35355338, %v3979_v11  ;;  %s4385_s29 = sld [smem:[#allocation8_spill]]  ;;  %s4392_s0 = smov 112  }
  0xf8   : > { %1130 = vrot.lane.b32.xlu1 %v3979_v11, %s4370_s7 }
  0xfa   : > { %v874_v26 = vld [vmem:[%s4385_s29] sm:$0xff]  ;;  %v875_v51 = vld [vmem:[%s4385_s29 + $0x8] sm:$0xff]  ;;  %v877_v16 = vld [vmem:[%s4385_s29 + $0x18] sm:$0xff] }
 0x166   : > { %v979_v13 = vpop.permute.xlu1 %978  ;;  %v888_v14 = vpop.permute.xlu0 %887 }
 0x167   : > { %3516 = vmatpush3.xpose.msk.msra.mxu0 %vm889_vm2, %v888_v14  ;;  %3521 = vmatpush3.msra.mxu1 %v979_v13  ;;  %v876_v14 = vld [vmem:[%s4385_s29 + $0x10] sm:$0xff] }
 0x168   : > { %3530 = vmatprep.subr.mxu1 %v3799_v6  ;;  %3525 = vmatprep.subr.mxu0 %v3799_v6 }
 0x16a   : > { %3518 = vmatmul.mubr.msk.f32.vlgmr.msra.gmra.mrb[2].mxu0 %vm889_vm2, %v3988_v15  ;;  %v1131_v27 = vpop.permute.xlu1 %1130 }
 0x16b   : > { %3527 = vmatprep.mubr.msk.f32.mxu0 %vm3798_vm0, %v3799_v6  ;;  %3526 = vmatpush3.msra.mxu0 %v874_v26 }
 0x16c   : > { %3535 = vmatprep.subr.mxu0 %v3799_v6 }
 0x23d   : > { %v961_v17 = vpop.f32.mrb[2].mxu0 }
 0x23e   : > { %v966_v18 = vsel %vm965_vm3, -1e+09, %v961_v17  ;;  %v3519_v19 = vpop.f32.mrb[3].mxu0 }
 0x23f   : > { %v967_v20 = vsel %vm889_vm2, %v966_v18, -inf }
 0x240   : > { %968 = vmax.xlane.f32.xlu0 %v967_v20 }
 0x256   : > { %1218 = vrot.lane.b32.xlu0 %v3979_v11, %s3803_s1  ;;  %s4364_s1 = smov 72  }
 0x25a   : > { %1370 = vrot.lane.b32.xlu0 %v3979_v11, %s4367_s27  ;;  %s4387_s27 = sld [smem:[#allocation3_spill]] }
 0x2cd   : > { %v969_v21 = vpop.xlane.xlu0 %968 }
 0x2ce   : > { %v970_v22 = vsub.f32 %v966_v18, %v969_v21 }
 0x2d0   : > { %v971_v23 = vmul.f32 1.442695, %v970_v22 }
 0x2d1   : > { %v1219_v33 = vpop.permute.xlu0 %1218 }
 0x2d2   : > { %3745 = vpow2.f32 %v971_v23 }
 0x2d5   : > { %v1371_v46 = vpop.permute.xlu0 %1370 }
 0x2dc   : > { %v3746_v24 = vpop.eup %3745 }
 0x2dd   : > { %v973_v25 = vsel %vm889_vm2, %v3746_v24, 0.0 }
 0x2de   : > { %974 = vadd.xlane.f32.xlu1 %v973_v25 }
 0x2ef   : > { %1128 = vrot.lane.b32.xlu1 %v3988_v15, %s3805_s28 }
 0x36b   : > { %v975_v28 = vpop.xlane.xlu1 %974 }
 0x36c   : > { %3747 = vrcp.f32 %v975_v28 }
 0x36f   : > { %v1129_v31 = vpop.permute.xlu1 %1128 }
 0x376   : > { %v3748_v29 = vpop.eup %3747 }
 0x377   : > { %v977_v30 = vmul.f32 %v3748_v29, %v3746_v24 }
 0x379   : > { %3523 = vmatmul.mubr.msk.f32.vlgmr.msra.gmra.mrb[0].mxu1 %vm889_vm2, %v977_v30 }
 0x37a   : > { %3531 = vmatpush3.xpose.msk.msra.mxu1 %vm889_vm2, %v1131_v27  ;;  %3532 = vmatprep.mubr.msk.f32.mxu1 %vm3798_vm0, %v3799_v6 }
 0x37b   : > { %3540 = vmatprep.subr.mxu1 %v3799_v6 }
 0x37d   : > { %3533 = vmatmul.mubr.msk.f32.vlgmr.msra.gmra.mrb[2].mxu1 %vm889_vm2, %v1129_v31 }
 0x37e   : > { %3542 = vmatprep.mubr.msk.f32.mxu1 %vm3798_vm0, %v3799_v6  ;;  %3541 = vmatpush3.msra.mxu1 %v875_v51 }
 0x37f   : > { %3550 = vmatprep.subr.mxu1 %v3799_v6 }
 0x44c   : > { %v1050_v32 = vpop.f32.mrb[0].mxu1 }
 0x44d   : > { %v3524_v34 = vpop.f32.mrb[1].mxu1  ;;  %3528 = vmatmul.mubr.msk.f32.vlgmr.msra.gmra.mrb[4].mxu0 %vm889_vm2, %v1050_v32 }
 0x44e   : > { %3536 = vmatpush3.msra.mxu0 %v1219_v33  ;;  %3537 = vmatprep.mubr.msk.f32.mxu0 %vm3798_vm0, %v3799_v6 }
 0x44f   : > { %3545 = vmatprep.subr.mxu0 %v3799_v6 }
 0x450   : > { %v1202_v35 = vpop.f32.mrb[2].mxu1 }
 0x451   : > { %v1206_v36 = vsel %vm965_vm3, -1e+09, %v1202_v35  ;;  %v3534_v37 = vpop.f32.mrb[3].mxu1 }
 0x452   : > { %v1207_v38 = vsel %vm889_vm2, %v1206_v36, -inf }
 0x453   : > { %1208 = vmax.xlane.f32.xlu1 %v1207_v38 }
 0x4e0   : > { %v1209_v39 = vpop.xlane.xlu1 %1208 }
 0x4e1   : > { %v1210_v40 = vsub.f32 %v1206_v36, %v1209_v39 }
 0x4e3   : > { %v1211_v41 = vmul.f32 1.442695, %v1210_v40 }
 0x4e5   : > { %3749 = vpow2.f32 %v1211_v41 }
 0x4ef   : > { %v3750_v42 = vpop.eup %3749 }
 0x4f0   : > { %v1213_v43 = vsel %vm889_vm2, %v3750_v42, 0.0 }
 0x4f1   : > { %1214 = vadd.xlane.f32.xlu0 %v1213_v43 }
 0x507   : > { %1368 = vrot.lane.b32.xlu0 %v3988_v15, %s4368_s30  ;;  %s771_s30 = scalar_lea.vmem %s4387_s27, %s3963_s25 }
 0x520   : > { %v1123_v44 = vpop.f32.mrb[4].mxu0 }
 0x521   : > { %v3529_v45 = vpop.f32.mrb[5].mxu0  ;;  %v1127_v1 = vadd.f32 %v3377_v0, %v1123_v44 }
 0x522   : > { %v1972_v45 = vld [vmem:[%s4349_s12] sm:$0xff] }
 0x57e   : > { %v1215_v47 = vpop.xlane.xlu0 %1214 }
 0x57f   : > { %3751 = vrcp.f32 %v1215_v47 }
 0x582   : > { %v1369_v50 = vpop.permute.xlu0 %1368 }
 0x589   : > { %v3752_v48 = vpop.eup %3751 }
 0x58a   : > { %v1217_v49 = vmul.f32 %v3752_v48, %v3750_v42  ;;  %v1888_v48 = vld [vmem:[%s4347_s10 + $0x8] sm:$0xff] }
 0x58c   : > { %3538 = vmatmul.mubr.msk.f32.vlgmr.msra.gmra.mrb[6].mxu0 %vm889_vm2, %v1217_v49  ;;  %v1974_v49 = vld [vmem:[%s4349_s12 + $0x10] sm:$0xff] }
 0x58d   : > { %3546 = vmatpush3.xpose.msk.msra.mxu0 %vm889_vm2, %v1371_v46  ;;  %3547 = vmatprep.mubr.msk.f32.mxu0 %vm3798_vm0, %v3799_v6  ;;  %v1973_v46 = vld [vmem:[%s4349_s12 + $0x8] sm:$0xff] }
 0x58e   : > { %3555 = vmatprep.subr.mxu0 %v3799_v6  ;;  %v3700_v47 = vpack.c.bf16 %v1973_v46, %v1972_v45 }
 0x590   : > { %3548 = vmatmul.mubr.msk.f32.vlgmr.msra.gmra.mrb[8].mxu0 %vm889_vm2, %v1369_v50  ;;  %v1975_v50 = vld [vmem:[%s4349_s12 + $0x18] sm:$0xff] }
 0x591   : > { %3557 = vmatprep.mubr.msk.f32.mxu0 %vm3798_vm0, %v3799_v6  ;;  %3556 = vmatpush3.msra.mxu0 %v876_v14 }
 0x592   : > { %3565 = vmatprep.subr.mxu0 %v3799_v6 }
 0x65f   : > { %v1290_v52 = vpop.f32.mrb[6].mxu0 }
 0x660   : > { %v3539_v53 = vpop.f32.mrb[7].mxu0  ;;  %3543 = vmatmul.mubr.msk.f32.vlgmr.msra.gmra.mrb[4].mxu1 %vm889_vm2, %v1290_v52  ;;  %v1889_v52 = vld [vmem:[%s4347_s10 + $0x10] sm:$0xff] }
 0x661   : > { %3552 = vmatprep.mubr.msk.f32.mxu1 %vm3798_vm0, %v3799_v6  ;;  %v1890_v53 = vld [vmem:[%s4347_s10 + $0x18] sm:$0xff] }
 0x663   : > { %v1442_v54 = vpop.f32.mrb[8].mxu0 }
 0x664   : > { %v1446_v55 = vsel %vm965_vm3, -1e+09, %v1442_v54  ;;  %v3549_v56 = vpop.f32.mrb[9].mxu0  ;;  %v3703_v54 = vpack.c.bf16 %v1975_v50, %v1974_v49 }
 0x665   : > { %v1447_v57 = vsel %vm889_vm2, %v1446_v55, -inf  ;;  %v785_v56 = vld [vmem:[%s771_s30] sm:$0xff]  ;;  %s4393_s30 = smov 80  }
 0x666   : > { %1448 = vmax.xlane.f32.xlu1 %v1447_v57 }
 0x677   : > { %1458 = vrot.lane.b32.xlu1 %v3979_v11, %s3807_s4  ;;  %s4390_s4 = smov 96  }
 0x67b   : > { %1610 = vrot.lane.b32.xlu1 %v3979_v11, %s4364_s1  ;;  %s4395_s1 = smov 72  }
 0x67f   : > { %1608 = vrot.lane.b32.xlu1 %v3988_v15, %s4365_s26  ;;  %s4391_s26 = smov 88  }
 0x6f3   : > { %v1449_v58 = vpop.xlane.xlu1 %1448 }
 0x6f4   : > { %v1450_v59 = vsub.f32 %v1446_v55, %v1449_v58  ;;  %v3697_v55 = vpack.c.bf16 %v1890_v53, %v1889_v52 }
 0x6f6   : > { %v1451_v60 = vmul.f32 1.442695, %v1450_v59 }
 0x6f7   : > { %v1459_v61 = vpop.permute.xlu1 %1458 }
 0x6f8   : > { %3753 = vpow2.f32 %v1451_v60  ;;  %3551 = vmatpush3.msra.mxu1 %v1459_v61 }
 0x6f9   : > { %3560 = vmatprep.subr.mxu1 %v3799_v6 }
 0x6fb   : > { %v1611_v10 = vpop.permute.xlu1 %1610 }
 0x6ff   : > { %v1609_v13 = vpop.permute.xlu1 %1608 }
 0x702   : > { %v3754_v62 = vpop.eup %3753 }
 0x703   : > { %v1453_v63 = vsel %vm889_vm2, %v3754_v62, 0.0 }
 0x704   : > { %1454 = vadd.xlane.f32.xlu0 %v1453_v63 }
 0x733   : > { %v1363_v2 = vpop.f32.mrb[4].mxu1 }
 0x734   : > { %v1367_v4 = vadd.f32 %v1363_v2, %v1127_v1  ;;  %v3544_v5 = vpop.f32.mrb[5].mxu1  ;;  %v3394_v1 = vld [vmem:[%s4388_s8] ss:$0 sm:$0xff] }
 0x735   : > { %v3395_v5 = vld [vmem:[%s4346_s9] ss:$0 sm:$0xff] }
 0x791   : > { %v1455_v7 = vpop.xlane.xlu0 %1454 }
 0x792   : > { %3755 = vrcp.f32 %v1455_v7 }
 0x79c   : > { %v3756_v9 = vpop.eup %3755 }
 0x79d   : > { %v1457_v12 = vmul.f32 %v3756_v9, %v3754_v62 }
 0x79f   : > { %3553 = vmatmul.mubr.msk.f32.vlgmr.msra.gmra.mrb[6].mxu1 %vm889_vm2, %v1457_v12 }
 0x7a0   : > { %3561 = vmatpush3.xpose.msk.msra.mxu1 %vm889_vm2, %v1611_v10  ;;  %3562 = vmatprep.mubr.msk.f32.mxu1 %vm3798_vm0, %v3799_v6  ;;  %v3398_v10 = vld [vmem:[%s4350_s13] ss:$0 sm:$0xff] }
 0x7a1   : > { %3570 = vmatprep.subr.mxu1 %v3799_v6 }
 0x7a3   : > { %3563 = vmatmul.mubr.msk.f32.vlgmr.msra.gmra.mrb[8].mxu1 %vm889_vm2, %v1609_v13 }
 0x7a4   : > { %3572 = vmatprep.mubr.msk.f32.mxu1 %vm3798_vm0, %v3799_v6  ;;  %3571 = vmatpush3.msra.mxu1 %v877_v16 }
 0x7a5   : > { %3699 = vmatprep.subr.bf16.mxu1 %v3797_v3 }
 0x872   : > { %v1530_v15 = vpop.f32.mrb[6].mxu1 }
 0x873   : > { %v3554_v17 = vpop.f32.mrb[7].mxu1  ;;  %3558 = vmatmul.mubr.msk.f32.vlgmr.msra.gmra.mrb[10].mxu0 %vm889_vm2, %v1530_v15  ;;  %v3396_v15 = vld [vmem:[%s4348_s11] ss:$0 sm:$0xff] }
 0x874   : > { %3567 = vmatprep.mubr.msk.f32.mxu0 %vm3798_vm0, %v3799_v6 }
 0x876   : > { %v1682_v18 = vpop.f32.mrb[8].mxu1 }
 0x877   : > { %v1686_v19 = vsel %vm965_vm3, -1e+09, %v1682_v18  ;;  %v3564_v20 = vpop.f32.mrb[9].mxu1 }
 0x878   : > { %v1687_v21 = vsel %vm889_vm2, %v1686_v19, -inf }
 0x879   : > { %1688 = vmax.xlane.f32.xlu1 %v1687_v21 }
 0x906   : > { %v1689_v22 = vpop.xlane.xlu1 %1688 }
 0x907   : > { %v1690_v23 = vsub.f32 %v1686_v19, %v1689_v22 }
 0x909   : > { %v1691_v24 = vmul.f32 1.442695, %v1690_v23 }
 0x90b   : > { %3757 = vpow2.f32 %v1691_v24 }
 0x915   : > { %v3758_v25 = vpop.eup %3757 }
 0x916   : > { %v1693_v26 = vsel %vm889_vm2, %v3758_v25, 0.0 }
 0x917   : > { %1694 = vadd.xlane.f32.xlu0 %v1693_v26 }
 0x92d   : > { %1698 = vrot.lane.b32.xlu0 %v3979_v11, %s3810_s3  ;;  %s4389_s3 = sld [smem:[#allocation5_spill]] }
 0x933   : > { %s779_s8 = scalar_lea.vmem %s4389_s3, %s3963_s25 }
 0x934   : > { %v4166_v21 = vld [vmem:[%s779_s8] sm:$0xff]  ;;  %s783_s8 = scalar_lea.vmem %s4361_s24, %s3963_s25 }
 0x935   : > { %vm2144_vm6 = vcmp.eq.f32.partialorder %v4166_v21, 0.0  ;;  %v2059_v21 = vld [vmem:[%s4351_s14 + $0x18] sm:$0xff] }
 0x946   : > { %v1603_v27 = vpop.f32.mrb[10].mxu0 }
 0x947   : > { %v1607_v28 = vadd.f32 %v1603_v27, %v1367_v4  ;;  %v3559_v29 = vpop.f32.mrb[11].mxu0 }
 0x9a4   : > { %v1695_v30 = vpop.xlane.xlu0 %1694 }
 0x9a5   : > { %3759 = vrcp.f32 %v1695_v30 }
 0x9a8   : > { %v1699_v31 = vpop.permute.xlu0 %1698 }
 0x9a9   : > { %3566 = vmatpush3.msra.mxu0 %v1699_v31 }
 0x9aa   : > { %3693 = vmatprep.subr.bf16.mxu0 %v3797_v3 }
 0x9af   : > { %v3760_v32 = vpop.eup %3759 }
 0x9b0   : > { %v1697_v33 = vmul.f32 %v3760_v32, %v3758_v25 }
 0x9b2   : > { %3568 = vmatmul.mubr.msk.f32.vlgmr.msra.gmra.mrb[12].mxu0 %vm889_vm2, %v1697_v33 }
 0x9b3   : > { %3583 = vmatprep.mubr.msk.f32.mxu0 %vm3798_vm0, %v3799_v6 }
 0xa85   : > { %v1770_v11 = vpop.f32.mrb[12].mxu0 }
 0xa86   : > { %v3569_v34 = vpop.f32.mrb[13].mxu0  ;;  %3573 = vmatmul.mubr.msk.f32.vlgmr.msra.gmra.mrb[10].mxu1 %vm889_vm2, %v1770_v11 }
 0xa87   : > { %3594 = vmatprep.mubr.msk.f32.mxu1 %vm3798_vm0, %v3799_v6  ;;  %3701 = vmatpush3.bf16.msra.mxu1 %v3700_v47 }
 0xa88   : > { %3702 = vmatprep.subr.bf16.mxu1 %v3797_v3 }
 0xa8b   : > { %3704 = vmatpush3.bf16.msra.mxu1 %v3703_v54  ;;  %v2057_v54 = vld [vmem:[%s4351_s14 + $0x8] sm:$0xff] }
 0xa8c   : > { %3602 = vmatprep.subr.mxu1 %v3799_v6 }
 0xa8e   : > { %3595 = vmatmul.mubr.msk.f32.vlgmr.msra.gmra.mrb[12].mxu1 %vm799_vm1, %v785_v56 }
 0xa8f   : > { %3604 = vmatprep.mubr.msk.f32.mxu1 %vm3798_vm0, %v3799_v6 }
 0xb59   : > { %v1843_v35 = vpop.f32.mrb[10].mxu1 }
 0xb5a   : > { %v1847_v36 = vadd.f32 %v1843_v35, %v1607_v28  ;;  %v3574_v37 = vpop.f32.mrb[11].mxu1  ;;  %v2056_v35 = vld [vmem:[%s4351_s14] sm:$0xff] }
 0xb5c   : > { %v1848_v38 = vadd.f32 %v1847_v36, %v3969_v8  ;;  %v1887_v8 = vld [vmem:[%s4347_s10] sm:$0xff] }
 0xb5d   : > { %v3694_v51 = vpack.c.bf16 %v1888_v48, %v1887_v8 }
 0xb5e   : > { %v1851_v39 = vsel %vm799_vm1, %v1848_v38, 0.0 }
 0xb5f   : > { %1852 = vadd.xlane.f32.xlu0 %v1851_v39  ;;  %3695 = vmatpush3.bf16.msra.mxu0 %v3694_v51 }
 0xb60   : > { %3696 = vmatprep.subr.bf16.mxu0 %v3797_v3 }
 0xb61   : > { %v2052_v12 = vpop.f32.mrb[12].mxu1 }
 0xb62   : > { %v4146_v13 = vadd.f32 %v3398_v10, %v2052_v12  ;;  %v3596_v14 = vpop.f32.mrb[13].mxu1 }
 0xb63   : > { %3698 = vmatpush3.bf16.msra.mxu0 %v3697_v55 }
 0xb64   : > { %3597 = vmatprep.subr.mxu0 %v3799_v6 }
 0xb75   : > { %2309 = vrot.lane.b32.xlu0 %v4146_v13, %s3805_s28 }
 0xbec   : > { %v1853_v40 = vpop.xlane.xlu0 %1852 }
 0xbed   : > { %v1855_v41 = vmul.f32 0.03125, %v1853_v40 }
 0xbef   : > { %v1856_v42 = vsub.f32 %v1848_v38, %v1855_v41 }
 0xbf0   : > { %v2310_v11 = vpop.permute.xlu0 %2309 }
 0xbf1   : > { %v1857_v43 = vmul.f32 %v1856_v42, %v1856_v42  ;;  %v1878_v2 = vmul.f32 %v3394_v1, %v1856_v42 }
 0xbf3   : > { %v1858_v44 = vsel %vm799_vm1, %v1857_v43, 0.0 }
 0xbf4   : > { %1859 = vadd.xlane.f32.xlu1 %v1858_v44 }
 0xc81   : > { %v1860_v57 = vpop.xlane.xlu1 %1859 }
 0xc82   : > { %v1862_v58 = vmul.f32 0.032258064, %v1860_v57 }
 0xc84   : > { %3761 = vrsqrt.f32 %v1862_v58  ;;  %vm1865_vm4 = vcmp.eq.f32.partialorder %v1862_v58, inf  ;;  %v1868_v61 = vand.u32 2147483648, %v1862_v58  ;;  %vm1867_vm5 = vcmp.eq.f32.partialorder %v1862_v58, 0.0 }
 0xc8e   : > { %v3762_v59 = vpop.eup %3761 }
 0xc8f   : > { %v1864_v60 = vmul.f32 %v3762_v59, %v1862_v58 }
 0xc91   : > { %v1866_v62 = vsel %vm1865_vm4, %v1862_v58, %v1864_v60 }
 0xc92   : > { %v1869_v63 = vsel %vm1867_vm5, %v1868_v61, %v1866_v62 }
 0xc93   : > { %v1870_v0 = vadd.f32 1e-06, %v1869_v63 }
 0xc95   : > { %3763 = vrcp.f32 %v1870_v0 }
 0xc9f   : > { %v3764_v4 = vpop.eup %3763 }
 0xca0   : > { %v1879_v7 = vmul.f32 %v3764_v4, %v1878_v2  ;;  %v3400_v4 = vld [vmem:[%s4352_s15] ss:$0 sm:$0xff] }
 0xca2   : > { %v4137_v9 = vadd.f32 %v3395_v5, %v1879_v7 }
 0xca4   : > { %3584 = vmatmul.mubr.msk.f32.vlgmr.msra.gmra.mrb[14].mxu0 %vm799_vm1, %v4137_v9 }
 0xca5   : > { %3599 = vmatprep.mubr.msk.f32.mxu0 %vm3798_vm0, %v3799_v6  ;;  %3598 = vmatpush3.xpose.msk.msra.mxu0 %vm889_vm2, %v4146_v13 }
 0xca6   : > { %3607 = vmatprep.subr.mxu0 %v3799_v6 }
 0xd77   : > { %v1967_v17 = vpop.f32.mrb[14].mxu0 }
 0xd78   : > { %v1968_v18 = vadd.f32 %v3396_v15, %v1967_v17  ;;  %v3585_v19 = vpop.f32.mrb[15].mxu0 }
 0xd7a   : > { %v4156_v20 = vmul.f32 0.35355338, %v1968_v18 }
 0xd7c   : > { %3600 = vmatmul.mubr.msk.f32.vlgmr.msra.gmra.mrb[16].mxu0 %vm889_vm2, %v4156_v20 }
 0xd7d   : > { %3609 = vmatprep.mubr.msk.f32.mxu0 %vm3798_vm0, %v3799_v6  ;;  %3608 = vmatpush3.msra.mxu0 %v2056_v35 }
 0xd7e   : > { %3617 = vmatprep.subr.mxu0 %v3799_v6 }
 0xe4f   : > { %v2140_v22 = vpop.f32.mrb[16].mxu0 }
 0xe50   : > { %v2145_v23 = vsel %vm2144_vm6, -1e+09, %v2140_v22  ;;  %v3601_v24 = vpop.f32.mrb[17].mxu0 }
 0xe51   : > { %v2146_v25 = vsel %vm889_vm2, %v2145_v23, -inf }
 0xe52   : > { %2147 = vmax.xlane.f32.xlu1 %v2146_v25 }
 0xe63   : > { %2157 = vrot.lane.b32.xlu1 %v4146_v13, %s4390_s4 }
 0xedf   : > { %v2148_v26 = vpop.xlane.xlu1 %2147 }
 0xee0   : > { %v2149_v16 = vsub.f32 %v2145_v23, %v2148_v26 }
 0xee2   : > { %v2150_v27 = vmul.f32 1.442695, %v2149_v16 }
 0xee3   : > { %v2158_v28 = vpop.permute.xlu1 %2157 }
 0xee4   : > { %3765 = vpow2.f32 %v2150_v27  ;;  %3603 = vmatpush3.msra.mxu1 %v2158_v28 }
 0xee5   : > { %3612 = vmatprep.subr.mxu1 %v3799_v6 }
 0xeee   : > { %v3766_v29 = vpop.eup %3765 }
 0xeef   : > { %v2152_v30 = vsel %vm889_vm2, %v3766_v29, 0.0 }
 0xef0   : > { %2153 = vadd.xlane.f32.xlu1 %v2152_v30 }
 0xf01   : > { %2307 = vrot.lane.b32.xlu1 %v4156_v20, %s3805_s28 }
 0xf7d   : > { %v2154_v31 = vpop.xlane.xlu1 %2153 }
 0xf7e   : > { %3767 = vrcp.f32 %v2154_v31 }
 0xf81   : > { %v2308_v34 = vpop.permute.xlu1 %2307 }
 0xf88   : > { %v3768_v32 = vpop.eup %3767 }
 0xf89   : > { %v2156_v33 = vmul.f32 %v3768_v32, %v3766_v29 }
 0xf8b   : > { %3605 = vmatmul.mubr.msk.f32.vlgmr.msra.gmra.mrb[14].mxu1 %vm889_vm2, %v2156_v33 }
 0xf8c   : > { %3613 = vmatpush3.xpose.msk.msra.mxu1 %vm889_vm2, %v2310_v11  ;;  %3614 = vmatprep.mubr.msk.f32.mxu1 %vm3798_vm0, %v3799_v6 }
 0xf8d   : > { %3622 = vmatprep.subr.mxu1 %v3799_v6 }
 0xf8f   : > { %3615 = vmatmul.mubr.msk.f32.vlgmr.msra.gmra.mrb[16].mxu1 %vm889_vm2, %v2308_v34 }
 0xf90   : > { %3624 = vmatprep.mubr.msk.f32.mxu1 %vm3798_vm0, %v3799_v6  ;;  %3623 = vmatpush3.msra.mxu1 %v2057_v54  ;;  %v3151_v54 = vld [vmem:[%s4357_s20 + $0x10] sm:$0xff] }
 0xf91   : > { %3632 = vmatprep.subr.mxu1 %v3799_v6 }
0x105e   : > { %v2229_v36 = vpop.f32.mrb[14].mxu1 }
0x105f   : > { %v3606_v37 = vpop.f32.mrb[15].mxu1  ;;  %3610 = vmatmul.mubr.msk.f32.vlgmr.msra.gmra.mrb[18].mxu0 %vm889_vm2, %v2229_v36 }
0x1060   : > { %3619 = vmatprep.mubr.msk.f32.mxu0 %vm3798_vm0, %v3799_v6 }
0x1062   : > { %v2381_v38 = vpop.f32.mrb[16].mxu1 }
0x1063   : > { %v2385_v39 = vsel %vm2144_vm6, -1e+09, %v2381_v38  ;;  %v3616_v40 = vpop.f32.mrb[17].mxu1 }
0x1064   : > { %v2386_v41 = vsel %vm889_vm2, %v2385_v39, -inf }
0x1065   : > { %2387 = vmax.xlane.f32.xlu1 %v2386_v41 }
0x1076   : > { %2397 = vrot.lane.b32.xlu1 %v4146_v13, %s4391_s26 }
0x107a   : > { %2547 = vrot.lane.b32.xlu1 %v4156_v20, %s4392_s0 }
0x10f2   : > { %v2388_v42 = vpop.xlane.xlu1 %2387 }
0x10f3   : > { %v2389_v43 = vsub.f32 %v2385_v39, %v2388_v42 }
0x10f5   : > { %v2390_v44 = vmul.f32 1.442695, %v2389_v43 }
0x10f6   : > { %v2398_v45 = vpop.permute.xlu1 %2397 }
0x10f7   : > { %3769 = vpow2.f32 %v2390_v44  ;;  %3618 = vmatpush3.msra.mxu0 %v2398_v45 }
0x10f8   : > { %3627 = vmatprep.subr.mxu0 %v3799_v6 }
0x10fa   : > { %v2548_v53 = vpop.permute.xlu1 %2547 }
0x1101   : > { %v3770_v46 = vpop.eup %3769 }
0x1102   : > { %v2392_v8 = vsel %vm889_vm2, %v3770_v46, 0.0 }
0x1103   : > { %2393 = vadd.xlane.f32.xlu0 %v2392_v8 }
0x1119   : > { %2549 = vrot.lane.b32.xlu0 %v4146_v13, %s4392_s0 }
0x1132   : > { %v2302_v47 = vpop.f32.mrb[18].mxu0 }
0x1133   : > { %v3611_v48 = vpop.f32.mrb[19].mxu0  ;;  %v2306_v5 = vadd.f32 %v3400_v4, %v2302_v47 }
0x1134   : > { %v3064_v48 = vld [vmem:[%s4355_s18] sm:$0xff] }
0x1190   : > { %v2394_v49 = vpop.xlane.xlu0 %2393 }
0x1191   : > { %3771 = vrcp.f32 %v2394_v49 }
0x1194   : > { %v2550_v52 = vpop.permute.xlu0 %2549 }
0x119b   : > { %v3772_v50 = vpop.eup %3771 }
0x119c   : > { %v2396_v51 = vmul.f32 %v3772_v50, %v3770_v46  ;;  %v3067_v50 = vld [vmem:[%s4355_s18 + $0x18] sm:$0xff] }
0x119e   : > { %3620 = vmatmul.mubr.msk.f32.vlgmr.msra.gmra.mrb[20].mxu0 %vm889_vm2, %v2396_v51 }
0x119f   : > { %3628 = vmatpush3.xpose.msk.msra.mxu0 %vm889_vm2, %v2550_v52  ;;  %3629 = vmatprep.mubr.msk.f32.mxu0 %vm3798_vm0, %v3799_v6  ;;  %v3149_v52 = vld [vmem:[%s4357_s20] sm:$0xff] }
0x11a0   : > { %3637 = vmatprep.subr.mxu0 %v3799_v6 }
0x11a2   : > { %3630 = vmatmul.mubr.msk.f32.vlgmr.msra.gmra.mrb[22].mxu0 %vm889_vm2, %v2548_v53  ;;  %v3150_v53 = vld [vmem:[%s4357_s20 + $0x8] sm:$0xff] }
0x11a3   : > { %3639 = vmatprep.mubr.msk.f32.mxu0 %vm3798_vm0, %v3799_v6 }
0x1271   : > { %v2469_v55 = vpop.f32.mrb[20].mxu0 }
0x1272   : > { %v3621_v56 = vpop.f32.mrb[21].mxu0  ;;  %3625 = vmatmul.mubr.msk.f32.vlgmr.msra.gmra.mrb[18].mxu1 %vm889_vm2, %v2469_v55  ;;  %v3712_v55 = vpack.c.bf16 %v3150_v53, %v3149_v52 }
0x1273   : > { %3634 = vmatprep.mubr.msk.f32.mxu1 %vm3798_vm0, %v3799_v6  ;;  %v3152_v56 = vld [vmem:[%s4357_s20 + $0x18] sm:$0xff] }
0x1275   : > { %v2621_v57 = vpop.f32.mrb[22].mxu0 }
0x1276   : > { %v2625_v58 = vsel %vm2144_vm6, -1e+09, %v2621_v57  ;;  %v3631_v59 = vpop.f32.mrb[23].mxu0  ;;  %v3715_v57 = vpack.c.bf16 %v3152_v56, %v3151_v54 }
0x1277   : > { %v2626_v60 = vsel %vm889_vm2, %v2625_v58, -inf  ;;  %v3154_v59 = vld [vmem:[%s4357_s20 + $0x28] sm:$0xff] }
0x1278   : > { %2627 = vmax.xlane.f32.xlu1 %v2626_v60 }
0x1289   : > { %2637 = vrot.lane.b32.xlu1 %v4146_v13, %s4393_s30 }
0x128d   : > { %2787 = vrot.lane.b32.xlu1 %v4156_v20, %s4394_s2  ;;  %v2058_v20 = vld [vmem:[%s4351_s14 + $0x10] sm:$0xff] }
0x128e   : > { %3638 = vmatpush3.msra.mxu0 %v2058_v20  ;;  %v3419_v20 = vld [vmem:[%s4356_s19] ss:$0 sm:$0xff] }
0x128f   : > { %3647 = vmatprep.subr.mxu0 %v3799_v6 }
0x1305   : > { %v2628_v61 = vpop.xlane.xlu1 %2627 }
0x1306   : > { %v2629_v62 = vsub.f32 %v2625_v58, %v2628_v61  ;;  %v3153_v58 = vld [vmem:[%s4357_s20 + $0x20] sm:$0xff] }
0x1307   : > { %v3718_v60 = vpack.c.bf16 %v3154_v59, %v3153_v58 }
0x1308   : > { %v2630_v63 = vmul.f32 1.442695, %v2629_v62 }
0x1309   : > { %v2638_v0 = vpop.permute.xlu1 %2637 }
0x130a   : > { %3773 = vpow2.f32 %v2630_v63  ;;  %3633 = vmatpush3.msra.mxu1 %v2638_v0 }
0x130b   : > { %3642 = vmatprep.subr.mxu1 %v3799_v6 }
0x130d   : > { %v2788_v19 = vpop.permute.xlu1 %2787 }
0x1314   : > { %v3774_v1 = vpop.eup %3773 }
0x1315   : > { %v2632_v2 = vsel %vm889_vm2, %v3774_v1, 0.0 }
0x1316   : > { %2633 = vadd.xlane.f32.xlu0 %v2632_v2 }
0x132c   : > { %2789 = vrot.lane.b32.xlu0 %v4146_v13, %s4394_s2 }
0x1345   : > { %v2542_v7 = vpop.f32.mrb[18].mxu1 }
0x1346   : > { %v2546_v10 = vadd.f32 %v2542_v7, %v2306_v5  ;;  %v3626_v12 = vpop.f32.mrb[19].mxu1  ;;  %v3417_v7 = vld [vmem:[%s4353_s16] ss:$0 sm:$0xff] }
0x13a3   : > { %v2634_v14 = vpop.xlane.xlu0 %2633 }
0x13a4   : > { %3775 = vrcp.f32 %v2634_v14 }
0x13a7   : > { %v2790_v18 = vpop.permute.xlu0 %2789 }
0x13ae   : > { %v3776_v15 = vpop.eup %3775 }
0x13af   : > { %v2636_v17 = vmul.f32 %v3776_v15, %v3774_v1 }
0x13b1   : > { %3635 = vmatmul.mubr.msk.f32.vlgmr.msra.gmra.mrb[20].mxu1 %vm889_vm2, %v2636_v17  ;;  %v3155_v17 = vld [vmem:[%s4357_s20 + $0x30] sm:$0xff] }
0x13b2   : > { %3643 = vmatpush3.xpose.msk.msra.mxu1 %vm889_vm2, %v2790_v18  ;;  %3644 = vmatprep.mubr.msk.f32.mxu1 %vm3798_vm0, %v3799_v6  ;;  %v3156_v18 = vld [vmem:[%s4357_s20 + $0x38] sm:$0xff] }
0x13b3   : > { %3652 = vmatprep.subr.mxu1 %v3799_v6 }
0x13b5   : > { %3645 = vmatmul.mubr.msk.f32.vlgmr.msra.gmra.mrb[22].mxu1 %vm889_vm2, %v2788_v19  ;;  %v3721_v19 = vpack.c.bf16 %v3156_v18, %v3155_v17 }
0x13b6   : > { %3654 = vmatprep.mubr.msk.f32.mxu1 %vm3798_vm0, %v3799_v6  ;;  %3653 = vmatpush3.msra.mxu1 %v2059_v21 }
0x13b7   : > { %3711 = vmatprep.subr.bf16.mxu1 %v3797_v3 }
0x1484   : > { %v2709_v22 = vpop.f32.mrb[20].mxu1 }
0x1485   : > { %v3636_v23 = vpop.f32.mrb[21].mxu1  ;;  %3640 = vmatmul.mubr.msk.f32.vlgmr.msra.gmra.mrb[24].mxu0 %vm889_vm2, %v2709_v22 }
0x1486   : > { %3649 = vmatprep.mubr.msk.f32.mxu0 %vm3798_vm0, %v3799_v6 }
0x1488   : > { %v2861_v24 = vpop.f32.mrb[22].mxu1 }
0x1489   : > { %v2865_v25 = vsel %vm2144_vm6, -1e+09, %v2861_v24  ;;  %v3646_v26 = vpop.f32.mrb[23].mxu1 }
0x148a   : > { %v2866_v16 = vsel %vm889_vm2, %v2865_v25, -inf  ;;  %v3421_v26 = vld [vmem:[%s4358_s21] ss:$0 sm:$0xff] }
0x148b   : > { %2867 = vmax.xlane.f32.xlu1 %v2866_v16 }
0x149c   : > { %2877 = vrot.lane.b32.xlu1 %v4146_v13, %s4395_s1 }
0x1518   : > { %v2868_v27 = vpop.xlane.xlu1 %2867 }
0x1519   : > { %v2869_v28 = vsub.f32 %v2865_v25, %v2868_v27 }
0x151b   : > { %v2870_v29 = vmul.f32 1.442695, %v2869_v28 }
0x151c   : > { %v2878_v30 = vpop.permute.xlu1 %2877 }
0x151d   : > { %3777 = vpow2.f32 %v2870_v29  ;;  %3648 = vmatpush3.msra.mxu0 %v2878_v30 }
0x151e   : > { %3705 = vmatprep.subr.bf16.mxu0 %v3797_v3 }
0x1527   : > { %v3778_v31 = vpop.eup %3777 }
0x1528   : > { %v2872_v32 = vsel %vm889_vm2, %v3778_v31, 0.0 }
0x1529   : > { %2873 = vadd.xlane.f32.xlu0 %v2872_v32 }
0x1558   : > { %v2782_v13 = vpop.f32.mrb[24].mxu0 }
0x1559   : > { %v2786_v33 = vadd.f32 %v2782_v13, %v2546_v10  ;;  %v3641_v11 = vpop.f32.mrb[25].mxu0 }
0x15b6   : > { %v2874_v34 = vpop.xlane.xlu0 %2873 }
0x15b7   : > { %3779 = vrcp.f32 %v2874_v34 }
0x15c1   : > { %v3780_v35 = vpop.eup %3779 }
0x15c2   : > { %v2876_v36 = vmul.f32 %v3780_v35, %v3778_v31 }
0x15c4   : > { %3650 = vmatmul.mubr.msk.f32.vlgmr.msra.gmra.mrb[26].mxu0 %vm889_vm2, %v2876_v36 }
0x15c5   : > { %3665 = vmatprep.mubr.msk.f32.mxu0 %vm3798_vm0, %v3799_v6 }
0x1697   : > { %v2949_v37 = vpop.f32.mrb[26].mxu0 }
0x1698   : > { %v3651_v38 = vpop.f32.mrb[27].mxu0  ;;  %3655 = vmatmul.mubr.msk.f32.vlgmr.msra.gmra.mrb[24].mxu1 %vm889_vm2, %v2949_v37 }
0x1699   : > { %3684 = vmatprep.mubr.msk.f32.mxu1 %vm3798_vm0, %v3799_v6  ;;  %v3065_v6 = vld [vmem:[%s4355_s18 + $0x8] sm:$0xff]  ;;  %3713 = vmatpush3.bf16.msra.mxu1 %v3712_v55 }
0x169a   : > { %v3706_v49 = vpack.c.bf16 %v3065_v6, %v3064_v48  ;;  %3714 = vmatprep.subr.bf16.mxu1 %v3797_v3 }
0x169c   : > { %3707 = vmatpush3.bf16.msra.mxu0 %v3706_v49 }
0x169d   : > { %3708 = vmatprep.subr.bf16.mxu0 %v3797_v3  ;;  %3716 = vmatpush3.bf16.msra.mxu1 %v3715_v57 }
0x169e   : > { %3717 = vmatprep.subr.bf16.mxu1 %v3797_v3 }
0x16a1   : > { %3719 = vmatpush3.bf16.msra.mxu1 %v3718_v60 }
0x16a2   : > { %3720 = vmatprep.subr.bf16.mxu1 %v3797_v3  ;;  %v3418_v3 = vld [vmem:[%s4354_s17] ss:$0 sm:$0xff] }
0x16a5   : > { %3722 = vmatpush3.bf16.msra.mxu1 %v3721_v19 }
0x176b   : > { %v3022_v39 = vpop.f32.mrb[24].mxu1 }
0x176c   : > { %v3026_v40 = vadd.f32 %v3022_v39, %v2786_v33  ;;  %v3656_v41 = vpop.f32.mrb[25].mxu1 }
0x176d   : > { %v3423_v41 = vld [vmem:[%s4359_s22] ss:$0 sm:$0xff] }
0x176e   : > { %v3027_v42 = vadd.f32 %v3026_v40, %v4137_v9  ;;  %v3066_v9 = vld [vmem:[%s4355_s18 + $0x10] sm:$0xff] }
0x176f   : > { %v3709_v51 = vpack.c.bf16 %v3067_v50, %v3066_v9 }
0x1770   : > { %v3030_v43 = vsel %vm799_vm1, %v3027_v42, 0.0 }
0x1771   : > { %3031 = vadd.xlane.f32.xlu0 %v3030_v43  ;;  %3710 = vmatpush3.bf16.msra.mxu0 %v3709_v51 }
0x17fe   : > { %v3032_v44 = vpop.xlane.xlu0 %3031 }
0x17ff   : > { %v3033_v45 = vmul.f32 0.03125, %v3032_v44  ;;  %v3424_v44 = vld [vmem:[%s4360_s23] ss:$0 sm:$0xff] }
0x1801   : > { %v3034_v46 = vsub.f32 %v3027_v42, %v3033_v45 }
0x1803   : > { %v3035_v8 = vmul.f32 %v3034_v46, %v3034_v46  ;;  %v3055_v10 = vmul.f32 %v3417_v7, %v3034_v46 }
0x1805   : > { %v3036_v47 = vsel %vm799_vm1, %v3035_v8, 0.0 }
0x1806   : > { %3037 = vadd.xlane.f32.xlu0 %v3036_v47 }
0x1893   : > { %v3038_v61 = vpop.xlane.xlu0 %3037 }
0x1894   : > { %v3039_v62 = vmul.f32 0.032258064, %v3038_v61 }
0x1896   : > { %3781 = vrsqrt.f32 %v3039_v62  ;;  %vm3042_vm7 = vcmp.eq.f32.partialorder %v3039_v62, inf  ;;  %v3045_v1 = vand.u32 2147483648, %v3039_v62  ;;  %vm3044_vm8 = vcmp.eq.f32.partialorder %v3039_v62, 0.0 }
0x18a0   : > { %v3782_v63 = vpop.eup %3781 }
0x18a1   : > { %v3041_v0 = vmul.f32 %v3782_v63, %v3039_v62 }
0x18a3   : > { %v3043_v2 = vsel %vm3042_vm7, %v3039_v62, %v3041_v0 }
0x18a4   : > { %v3046_v4 = vsel %vm3044_vm8, %v3045_v1, %v3043_v2 }
0x18a5   : > { %v3047_v5 = vadd.f32 1e-06, %v3046_v4 }
0x18a7   : > { %3783 = vrcp.f32 %v3047_v5 }
0x18b1   : > { %v3784_v12 = vpop.eup %3783 }
0x18b2   : > { %v3056_v14 = vmul.f32 %v3784_v12, %v3055_v10 }
0x18b4   : > { %v3063_v15 = vadd.f32 %v3418_v3, %v3056_v14 }
0x18b6   : > { %3666 = vmatmul.mubr.msk.f32.vlgmr.msra.gmra.mrb[28].mxu0 %vm799_vm1, %v3063_v15 }
0x1989   : > { %v3144_v22 = vpop.f32.mrb[28].mxu0 }
0x198a   : > { %v3145_v23 = vadd.f32 %v3419_v20, %v3144_v22  ;;  %v3667_v24 = vpop.f32.mrb[29].mxu0 }
0x198c   : > { %v3148_v25 = vmax.f32 %v3145_v23, 0.0 }
0x198e   : > { %3685 = vmatmul.mubr.msk.f32.vlgmr.msra.gmra.mrb[26].mxu1 %vm3164_vm9, %v3148_v25 }
0x1a61   : > { %v3234_v16 = vpop.f32.mrb[26].mxu1 }
0x1a62   : > { %v3235_v27 = vadd.f32 %v3421_v26, %v3234_v16  ;;  %v3686_v28 = vpop.f32.mrb[27].mxu1 }
0x1a64   : > { %v3238_v29 = vadd.f32 %v3235_v27, %v3063_v15 }
0x1a66   : > { %v3241_v30 = vsel %vm799_vm1, %v3238_v29, 0.0 }
0x1a67   : > { %3242 = vadd.xlane.f32.xlu0 %v3241_v30 }
0x1af4   : > { %v3243_v31 = vpop.xlane.xlu0 %3242 }
0x1af5   : > { %v3244_v32 = vmul.f32 0.03125, %v3243_v31 }
0x1af7   : > { %v3245_v21 = vsub.f32 %v3238_v29, %v3244_v32 }
0x1af9   : > { %v3246_v13 = vmul.f32 %v3245_v21, %v3245_v21  ;;  %v3266_v42 = vmul.f32 %v3423_v41, %v3245_v21 }
0x1afb   : > { %v3247_v33 = vsel %vm799_vm1, %v3246_v13, 0.0 }
0x1afc   : > { %3248 = vadd.xlane.f32.xlu0 %v3247_v33 }
0x1b89   : > { %v3249_v11 = vpop.xlane.xlu0 %3248 }
0x1b8a   : > { %v3250_v34 = vmul.f32 0.032258064, %v3249_v11 }
0x1b8c   : > { %3785 = vrsqrt.f32 %v3250_v34  ;;  %vm3253_vm10 = vcmp.eq.f32.partialorder %v3250_v34, inf  ;;  %v3256_v37 = vand.u32 2147483648, %v3250_v34  ;;  %vm3255_vm11 = vcmp.eq.f32.partialorder %v3250_v34, 0.0 }
0x1b96   : > { %v3786_v35 = vpop.eup %3785 }
0x1b97   : > { %v3252_v36 = vmul.f32 %v3786_v35, %v3250_v34 }
0x1b99   : > { %v3254_v38 = vsel %vm3253_vm10, %v3250_v34, %v3252_v36 }
0x1b9a   : > { %v3257_v39 = vsel %vm3255_vm11, %v3256_v37, %v3254_v38 }
0x1b9b   : > { %v3258_v40 = vadd.f32 1e-06, %v3257_v39 }
0x1b9d   : > { %3787 = vrcp.f32 %v3258_v40 }
0x1ba7   : > { %v3788_v43 = vpop.eup %3787 }
0x1ba8   : > { %v3267_v45 = vmul.f32 %v3788_v43, %v3266_v42 }
0x1baa   : > { %v3274_v46 = vadd.f32 %v3424_v44, %v3267_v45 }
0x1bac   : > { %3275 = vst.msk [vmem:[%s783_s8] sm:$0xff] %vm799_vm1, %v3274_v46 }
0x1bad PF: > { %s34_s5 = sadd.s32 1, %s3795_s5  }
0x1bae   : > { %p31_p4 = scmp.ge.s32.totalorder %s34_s5, 4  }
0x1bb0   :  { %33 = sbr.rel (!%p31_p4) target bundleno = 10 (0xa), region = 155 }

</bundles_post_ra>
